<compile_context>
chip_gen: v7x
topology: tpu7x:2x2x1
jax: 0.10.0
libtpu: 0.0.40
codegen_flags: <defaults>
</compile_context>

<pallas_src>
import functools

import jax
import jax.numpy as jnp
from jax import lax
from jax.experimental import pallas as pl
from jax.experimental.pallas import tpu as pltpu

# ---- problem dims (SimplestCNN) --------------------------------------------
B = 2                    # batch
CIN = 1                  # input channels
H = W = 28               # spatial
COUT = 16                # conv out channels
K = 5                    # conv kernel size
HC = H - K + 1           # 24 = conv output spatial size
HP = HC // 2             # 12 = spatial size after 2x2 max pool
FC_IN = COUT * HP * HP   # 2304
FC_OUT = 10

# ---- kernel-internal lane layout --------------------------------------------
# Conv matmul output columns: col = parity*256 + jp*16 + c  with j = 2*jp + parity.
# jp padded 12 -> 16 so each parity half is exactly 2 lane-tiles (256 lanes).
NPH = 16                 # padded jp slots per parity half
NHALF = NPH * COUT       # 256 lanes per parity half (128-aligned)
NCONV = 2 * NHALF        # 512 = Toeplitz matmul output width
WIDE = HP * NHALF        # 3072 = flattened activation width fed to the FC
HPAD = 32                # padded image rows per batch element (8-aligned)


# -----------------------------------------------------------------------------
# Fused kernel: conv (MXU Toeplitz) + bias + relu + 2x2 max-pool + fc + log_softmax
# One grid step processes `bb` batch elements (bb = 1 on v7x, bb = B otherwise).
# -----------------------------------------------------------------------------
def fused_kernel(x_ref, t_ref, bvec_ref, wfc_ref, bfc_ref, o_ref, flat_ref, *, bb):
    # x_ref:    (bb*HPAD, 28)  padded input rows; batch b lives at rows [b*32, b*32+28)
    # t_ref:    (5, 28, 512)   Toeplitz conv weights, one (28,512) slab per kernel row
    # bvec_ref: (1, 512)       per-channel conv bias broadcast over the lane layout
    # wfc_ref:  (3072, 10)     FC weight in the kernel's flat layout (zeros at pads)
    # bfc_ref:  (1, 10)
    # o_ref:    (bb, 1, 10)
    # flat_ref: (bb, 3072)     VMEM scratch: lane-dense pooled activations
    bvec = bvec_ref[...]                                         # (1, 512)

    for b in range(bb):                                          # static unroll
        base = b * HPAD
        ye = None   # conv rows 2i   (even)
        yo = None   # conv rows 2i+1 (odd)
        # xs_k[i, :] = x[b, k + 2i, :]; it feeds ye via T_k and yo via T_{k-1}.
        for k in range(K + 1):
            xk = x_ref[pl.ds(base + k, HP, 2), :]                # (12, 28) strided load
            if k < K:
                pe = jnp.dot(xk, t_ref[k], preferred_element_type=jnp.float32)
                ye = pe if ye is None else ye + pe               # (12, 512)
            if k >= 1:
                po = jnp.dot(xk, t_ref[k - 1], preferred_element_type=jnp.float32)
                yo = po if yo is None else yo + po               # (12, 512)

        # row half of the 2x2 pool, then bias + relu (commute with the max)
        rm = jnp.maximum(jnp.maximum(ye, yo) + bvec, 0.0)        # (12, 512)
        # column half of the 2x2 pool: even-j half vs odd-j half (128-aligned)
        cm = jnp.maximum(rm[:, :NHALF], rm[:, NHALF:])           # (12, 256)

        # flatten h into lanes -> one (1, 3072) row; every offset is 128-aligned
        for h in range(HP):
            flat_ref[b:b + 1, h * NHALF:(h + 1) * NHALF] = cm[h:h + 1, :]

    # FC + log_softmax: (bb, 3072) @ (3072, 10) on the MXU
    logits = jnp.dot(flat_ref[...], wfc_ref[...],
                     preferred_element_type=jnp.float32) + bfc_ref[...]
    m = jnp.max(logits, axis=1, keepdims=True)
    s = logits - m
    lse = jnp.log(jnp.sum(jnp.exp(s), axis=1, keepdims=True))
    out = s - lse                                                # (bb, 10)
    for b in range(bb):
        o_ref[b] = out[b:b + 1, :].astype(o_ref.dtype)


# -----------------------------------------------------------------------------
# Host-side parameter prep (free glue, traced once under jit)
# -----------------------------------------------------------------------------
def _prep_inputs(x):
    # pad rows 28 -> 32 and stack the batch along sublanes: (B*32, 28)
    xp = jnp.zeros((B, HPAD, W), jnp.float32)
    xp = xp.at[:, :H, :].set(x.reshape(B, H, W).astype(jnp.float32))
    return xp.reshape(B * HPAD, W)


def _prep_toeplitz(w_conv):
    # T_ki[w, col(j,c)] = w_conv[c, 0, ki, w - j]  for 0 <= w - j < K, else 0
    w = w_conv.reshape(COUT, K, K).astype(jnp.float32)           # [c, ki, kj]
    wt = jnp.transpose(w, (1, 2, 0))                             # [ki, kj, c]
    d = jnp.arange(W)[:, None] - jnp.arange(HC)[None, :]         # (28, 24)
    valid = ((d >= 0) & (d < K)).astype(jnp.float32)
    t = wt[:, jnp.clip(d, 0, K - 1), :] * valid[None, :, :, None]  # (5,28,24,16)
    t = t.reshape(K, W, HP, 2, COUT)                             # j = 2*jp + parity
    t = jnp.transpose(t, (0, 1, 3, 2, 4))                        # [ki, w, par, jp, c]
    tz = jnp.zeros((K, W, 2, NPH, COUT), jnp.float32)
    tz = tz.at[:, :, :, :HP, :].set(t)                           # pad jp 12 -> 16
    return tz.reshape(K, W, NCONV)                               # (5, 28, 512)


def _prep_conv_bias(b_conv):
    # bvec[0, par*256 + jp*16 + c] = b_conv[c]
    return jnp.tile(b_conv.astype(jnp.float32), 2 * NPH).reshape(1, NCONV)


def _prep_fc_weight(w_fc):
    # torch flat index c*144 + h*12 + jp  ->  kernel flat index h*256 + jp*16 + c
    w4 = w_fc.reshape(COUT, HP, HP, FC_OUT).astype(jnp.float32)  # [c, h, jp, o]
    w4 = jnp.transpose(w4, (1, 2, 0, 3))                         # [h, jp, c, o]
    wz = jnp.zeros((HP, NPH, COUT, FC_OUT), jnp.float32)
    wz = wz.at[:, :HP, :, :].set(w4)                             # zeros at padded jp
    return wz.reshape(WIDE, FC_OUT)                              # (3072, 10)


def _batch_block_for_device():
    kind = ""
    try:
        kind = jax.devices()[0].device_kind.lower()
    except Exception:
        pass
    # v7x: 2 TensorCores/chip -> one batch element per "parallel" grid step so the
    # batch shards across cores.  Single-TC v5e/v6e: fuse the whole batch into one
    # grid step (sublane-stacked) to avoid per-step grid overhead.
    if "v7" in kind or "7x" in kind:
        return 1
    return B


def make_forward(bb):
    assert B % bb == 0
    kernel = functools.partial(fused_kernel, bb=bb)

    call = pl.pallas_call(
        kernel,
        out_shape=jax.ShapeDtypeStruct((B, 1, FC_OUT), jnp.float32),
        grid=(B // bb,),
        in_specs=[
            pl.BlockSpec((bb * HPAD, W), lambda g: (g, 0)),      # padded input rows
            pl.BlockSpec((K, W, NCONV), lambda g: (0, 0, 0)),    # Toeplitz conv weights
            pl.BlockSpec((1, NCONV), lambda g: (0, 0)),          # conv bias vector
            pl.BlockSpec((WIDE, FC_OUT), lambda g: (0, 0)),      # FC weight (K, N)
            pl.BlockSpec((1, FC_OUT), lambda g: (0, 0)),         # FC bias
        ],
        out_specs=pl.BlockSpec((bb, 1, FC_OUT), lambda g: (g, 0, 0)),
        scratch_shapes=[pltpu.VMEM((bb, WIDE), jnp.float32)],    # flat activations
        compiler_params=pltpu.CompilerParams(
            dimension_semantics=("parallel",)),
    )

    @jax.jit
    def forward(x, w_conv, b_conv, w_fc, b_fc):
        out = call(_prep_inputs(x), _prep_toeplitz(w_conv), _prep_conv_bias(b_conv),
                   _prep_fc_weight(w_fc), b_fc.reshape(1, FC_OUT).astype(jnp.float32))
        return out.reshape(B, FC_OUT)                            # (B, 10) log-probs

    return forward


# -----------------------------------------------------------------------------
# Pure-JAX reference (matches SimplestCNN.forward), full-precision matmuls
# -----------------------------------------------------------------------------
def ref_forward(x, w_conv, b_conv, w_fc, b_fc):
    out = lax.conv_general_dilated(
        x, w_conv, window_strides=(1, 1), padding="VALID",
        dimension_numbers=("NCHW", "OIHW", "NCHW"),
        precision=lax.Precision.HIGHEST)
    out = out + b_conv[None, :, None, None]
    out = jnp.maximum(out, 0.0)
    out = lax.reduce_window(out, -jnp.inf, lax.max,
                            (1, 1, 2, 2), (1, 1, 2, 2), "VALID")
    flat = out.reshape(B, -1)
    logits = jnp.dot(flat, w_fc, precision=lax.Precision.HIGHEST) + b_fc
    return jax.nn.log_softmax(logits, axis=1)


if __name__ == "__main__":
    key = jax.random.PRNGKey(0)
    kx, kw1, kb1, kw2, kb2 = jax.random.split(key, 5)

    # PyTorch-shaped parameters: conv (16,1,5,5); fc weight stored as (2304, 10)
    # so the model computes flat @ W + b (same convention in kernel and reference).
    x = jax.random.normal(kx, (B, CIN, H, W), dtype=jnp.float32)
    w_conv = jax.random.normal(kw1, (COUT, CIN, K, K), dtype=jnp.float32) * 0.2
    b_conv = jax.random.normal(kb1, (COUT,), dtype=jnp.float32) * 0.1
    w_fc = jax.random.normal(kw2, (FC_IN, FC_OUT), dtype=jnp.float32) * 0.02
    b_fc = jax.random.normal(kb2, (FC_OUT,), dtype=jnp.float32) * 0.1

    forward = make_forward(_batch_block_for_device())
    out = jax.block_until_ready(forward(x, w_conv, b_conv, w_fc, b_fc))

    ref = ref_forward(x, w_conv, b_conv, w_fc, b_fc)
    assert out.shape == (B, FC_OUT) and out.dtype == jnp.float32
    err = float(jnp.max(jnp.abs(out - ref)))
    # tolerance covers MXU f32 pass differences vs the HIGHEST-precision reference
    assert jnp.allclose(out, ref, atol=2e-2, rtol=2e-2), f"max abs err {err}"
    print("KERNEL_OK")
</pallas_src>

<mosaic_0001>
module attributes {stable_mosaic.version = 11 : i64} {
  func.func @fused_kernel(%arg0: i32, %arg1: memref<64x28xf32, #tpu.memory_space<vmem>>, %arg2: memref<5x28x512xf32, #tpu.memory_space<vmem>>, %arg3: memref<1x512xf32, #tpu.memory_space<vmem>>, %arg4: memref<3072x10xf32, #tpu.memory_space<vmem>>, %arg5: memref<1x10xf32, #tpu.memory_space<vmem>>, %arg6: memref<2x1x10xf32, #tpu.memory_space<vmem>>, %arg7: memref<2x3072xf32, #tpu.memory_space<vmem>>) attributes {dimension_semantics = [#tpu.dimension_semantics<parallel>], iteration_bounds = array<i64: 1>, scalar_prefetch = 0 : i64, scratch_operands = 1 : i64, tpu.core_type = #tpu.core_type<tc>, window_params = [{transform_indices = @transform_0, window_bounds = array<i64: 64, 28>}, {pipeline_mode = #tpu.pipeline_mode<synchronous>, transform_indices = @transform_1, window_bounds = array<i64: 5, 28, 512>}, {pipeline_mode = #tpu.pipeline_mode<synchronous>, transform_indices = @transform_2, window_bounds = array<i64: 1, 512>}, {pipeline_mode = #tpu.pipeline_mode<synchronous>, transform_indices = @transform_3, window_bounds = array<i64: 3072, 10>}, {pipeline_mode = #tpu.pipeline_mode<synchronous>, transform_indices = @transform_4, window_bounds = array<i64: 1, 10>}, {transform_indices = @transform_5, window_bounds = array<i64: 2, 1, 10>}]} {
    %c0 = arith.constant 0 : index
    %c0_0 = arith.constant 0 : index
    %0 = vector.load %arg3[%c0, %c0_0] : memref<1x512xf32, #tpu.memory_space<vmem>>, vector<1x512xf32>
    %c0_1 = arith.constant 0 : index
    %c0_2 = arith.constant 0 : index
    %1 = tpu.strided_load %arg1[%c0_1, %c0_2] {strides = array<i32: 2, 1>} : memref<64x28xf32, #tpu.memory_space<vmem>>, vector<12x28xf32>
    %c0_3 = arith.constant 0 : index
    %c0_4 = arith.constant 0 : index
    %c0_5 = arith.constant 0 : index
    %2 = vector.load %arg2[%c0_3, %c0_4, %c0_5] : memref<5x28x512xf32, #tpu.memory_space<vmem>>, vector<1x28x512xf32>
    %3 = vector.shape_cast %2 : vector<1x28x512xf32> to vector<28x512xf32>
    %cst = arith.constant dense<0.000000e+00> : vector<12x512xf32>
    %4 = tpu.matmul %1, %3, %cst {dimension_numbers = #tpu.dot_dimension_numbers<[1], [0], [0], [1], [0, 0, 1, 1], [], []>} : vector<12x28xf32>, vector<28x512xf32>, vector<12x512xf32> -> vector<12x512xf32>
    %c1 = arith.constant 1 : index
    %c0_6 = arith.constant 0 : index
    %5 = tpu.strided_load %arg1[%c1, %c0_6] {strides = array<i32: 2, 1>} : memref<64x28xf32, #tpu.memory_space<vmem>>, vector<12x28xf32>
    %c1_7 = arith.constant 1 : index
    %c0_8 = arith.constant 0 : index
    %c0_9 = arith.constant 0 : index
    %6 = vector.load %arg2[%c1_7, %c0_8, %c0_9] : memref<5x28x512xf32, #tpu.memory_space<vmem>>, vector<1x28x512xf32>
    %7 = vector.shape_cast %6 : vector<1x28x512xf32> to vector<28x512xf32>
    %cst_10 = arith.constant dense<0.000000e+00> : vector<12x512xf32>
    %8 = tpu.matmul %5, %7, %cst_10 {dimension_numbers = #tpu.dot_dimension_numbers<[1], [0], [0], [1], [0, 0, 1, 1], [], []>} : vector<12x28xf32>, vector<28x512xf32>, vector<12x512xf32> -> vector<12x512xf32>
    %9 = arith.addf %4, %8 : vector<12x512xf32>
    %c0_11 = arith.constant 0 : index
    %c0_12 = arith.constant 0 : index
    %c0_13 = arith.constant 0 : index
    %10 = vector.load %arg2[%c0_11, %c0_12, %c0_13] : memref<5x28x512xf32, #tpu.memory_space<vmem>>, vector<1x28x512xf32>
    %11 = vector.shape_cast %10 : vector<1x28x512xf32> to vector<28x512xf32>
    %cst_14 = arith.constant dense<0.000000e+00> : vector<12x512xf32>
    %12 = tpu.matmul %5, %11, %cst_14 {dimension_numbers = #tpu.dot_dimension_numbers<[1], [0], [0], [1], [0, 0, 1, 1], [], []>} : vector<12x28xf32>, vector<28x512xf32>, vector<12x512xf32> -> vector<12x512xf32>
    %c2 = arith.constant 2 : index
    %c0_15 = arith.constant 0 : index
    %13 = tpu.strided_load %arg1[%c2, %c0_15] {strides = array<i32: 2, 1>} : memref<64x28xf32, #tpu.memory_space<vmem>>, vector<12x28xf32>
    %c2_16 = arith.constant 2 : index
    %c0_17 = arith.constant 0 : index
    %c0_18 = arith.constant 0 : index
    %14 = vector.load %arg2[%c2_16, %c0_17, %c0_18] : memref<5x28x512xf32, #tpu.memory_space<vmem>>, vector<1x28x512xf32>
    %15 = vector.shape_cast %14 : vector<1x28x512xf32> to vector<28x512xf32>
    %cst_19 = arith.constant dense<0.000000e+00> : vector<12x512xf32>
    %16 = tpu.matmul %13, %15, %cst_19 {dimension_numbers = #tpu.dot_dimension_numbers<[1], [0], [0], [1], [0, 0, 1, 1], [], []>} : vector<12x28xf32>, vector<28x512xf32>, vector<12x512xf32> -> vector<12x512xf32>
    %17 = arith.addf %9, %16 : vector<12x512xf32>
    %c1_20 = arith.constant 1 : index
    %c0_21 = arith.constant 0 : index
    %c0_22 = arith.constant 0 : index
    %18 = vector.load %arg2[%c1_20, %c0_21, %c0_22] : memref<5x28x512xf32, #tpu.memory_space<vmem>>, vector<1x28x512xf32>
    %19 = vector.shape_cast %18 : vector<1x28x512xf32> to vector<28x512xf32>
    %cst_23 = arith.constant dense<0.000000e+00> : vector<12x512xf32>
    %20 = tpu.matmul %13, %19, %cst_23 {dimension_numbers = #tpu.dot_dimension_numbers<[1], [0], [0], [1], [0, 0, 1, 1], [], []>} : vector<12x28xf32>, vector<28x512xf32>, vector<12x512xf32> -> vector<12x512xf32>
    %21 = arith.addf %12, %20 : vector<12x512xf32>
    %c3 = arith.constant 3 : index
    %c0_24 = arith.constant 0 : index
    %22 = tpu.strided_load %arg1[%c3, %c0_24] {strides = array<i32: 2, 1>} : memref<64x28xf32, #tpu.memory_space<vmem>>, vector<12x28xf32>
    %c3_25 = arith.constant 3 : index
    %c0_26 = arith.constant 0 : index
    %c0_27 = arith.constant 0 : index
    %23 = vector.load %arg2[%c3_25, %c0_26, %c0_27] : memref<5x28x512xf32, #tpu.memory_space<vmem>>, vector<1x28x512xf32>
    %24 = vector.shape_cast %23 : vector<1x28x512xf32> to vector<28x512xf32>
    %cst_28 = arith.constant dense<0.000000e+00> : vector<12x512xf32>
    %25 = tpu.matmul %22, %24, %cst_28 {dimension_numbers = #tpu.dot_dimension_numbers<[1], [0], [0], [1], [0, 0, 1, 1], [], []>} : vector<12x28xf32>, vector<28x512xf32>, vector<12x512xf32> -> vector<12x512xf32>
    %26 = arith.addf %17, %25 : vector<12x512xf32>
    %c2_29 = arith.constant 2 : index
    %c0_30 = arith.constant 0 : index
    %c0_31 = arith.constant 0 : index
    %27 = vector.load %arg2[%c2_29, %c0_30, %c0_31] : memref<5x28x512xf32, #tpu.memory_space<vmem>>, vector<1x28x512xf32>
    %28 = vector.shape_cast %27 : vector<1x28x512xf32> to vector<28x512xf32>
    %cst_32 = arith.constant dense<0.000000e+00> : vector<12x512xf32>
    %29 = tpu.matmul %22, %28, %cst_32 {dimension_numbers = #tpu.dot_dimension_numbers<[1], [0], [0], [1], [0, 0, 1, 1], [], []>} : vector<12x28xf32>, vector<28x512xf32>, vector<12x512xf32> -> vector<12x512xf32>
    %30 = arith.addf %21, %29 : vector<12x512xf32>
    %c4 = arith.constant 4 : index
    %c0_33 = arith.constant 0 : index
    %31 = tpu.strided_load %arg1[%c4, %c0_33] {strides = array<i32: 2, 1>} : memref<64x28xf32, #tpu.memory_space<vmem>>, vector<12x28xf32>
    %c4_34 = arith.constant 4 : index
    %c0_35 = arith.constant 0 : index
    %c0_36 = arith.constant 0 : index
    %32 = vector.load %arg2[%c4_34, %c0_35, %c0_36] : memref<5x28x512xf32, #tpu.memory_space<vmem>>, vector<1x28x512xf32>
    %33 = vector.shape_cast %32 : vector<1x28x512xf32> to vector<28x512xf32>
    %cst_37 = arith.constant dense<0.000000e+00> : vector<12x512xf32>
    %34 = tpu.matmul %31, %33, %cst_37 {dimension_numbers = #tpu.dot_dimension_numbers<[1], [0], [0], [1], [0, 0, 1, 1], [], []>} : vector<12x28xf32>, vector<28x512xf32>, vector<12x512xf32> -> vector<12x512xf32>
    %35 = arith.addf %26, %34 : vector<12x512xf32>
    %c3_38 = arith.constant 3 : index
    %c0_39 = arith.constant 0 : index
    %c0_40 = arith.constant 0 : index
    %36 = vector.load %arg2[%c3_38, %c0_39, %c0_40] : memref<5x28x512xf32, #tpu.memory_space<vmem>>, vector<1x28x512xf32>
    %37 = vector.shape_cast %36 : vector<1x28x512xf32> to vector<28x512xf32>
    %cst_41 = arith.constant dense<0.000000e+00> : vector<12x512xf32>
    %38 = tpu.matmul %31, %37, %cst_41 {dimension_numbers = #tpu.dot_dimension_numbers<[1], [0], [0], [1], [0, 0, 1, 1], [], []>} : vector<12x28xf32>, vector<28x512xf32>, vector<12x512xf32> -> vector<12x512xf32>
    %39 = arith.addf %30, %38 : vector<12x512xf32>
    %c5 = arith.constant 5 : index
    %c0_42 = arith.constant 0 : index
    %40 = tpu.strided_load %arg1[%c5, %c0_42] {strides = array<i32: 2, 1>} : memref<64x28xf32, #tpu.memory_space<vmem>>, vector<12x28xf32>
    %c4_43 = arith.constant 4 : index
    %c0_44 = arith.constant 0 : index
    %c0_45 = arith.constant 0 : index
    %41 = vector.load %arg2[%c4_43, %c0_44, %c0_45] : memref<5x28x512xf32, #tpu.memory_space<vmem>>, vector<1x28x512xf32>
    %42 = vector.shape_cast %41 : vector<1x28x512xf32> to vector<28x512xf32>
    %cst_46 = arith.constant dense<0.000000e+00> : vector<12x512xf32>
    %43 = tpu.matmul %40, %42, %cst_46 {dimension_numbers = #tpu.dot_dimension_numbers<[1], [0], [0], [1], [0, 0, 1, 1], [], []>} : vector<12x28xf32>, vector<28x512xf32>, vector<12x512xf32> -> vector<12x512xf32>
    %44 = arith.addf %39, %43 : vector<12x512xf32>
    %45 = arith.maximumf %35, %44 : vector<12x512xf32>
    %46 = vector.broadcast %0 : vector<1x512xf32> to vector<12x512xf32>
    %47 = arith.addf %45, %46 : vector<12x512xf32>
    %cst_47 = arith.constant 0.000000e+00 : f32
    %48 = vector.broadcast %cst_47 : f32 to vector<12x512xf32>
    %49 = arith.maximumf %47, %48 : vector<12x512xf32>
    %50 = vector.extract_strided_slice %49 {offsets = [0, 0], sizes = [12, 256], strides = [1, 1]} : vector<12x512xf32> to vector<12x256xf32>
    %51 = vector.extract_strided_slice %49 {offsets = [0, 256], sizes = [12, 256], strides = [1, 1]} : vector<12x512xf32> to vector<12x256xf32>
    %52 = arith.maximumf %50, %51 : vector<12x256xf32>
    %53 = vector.extract_strided_slice %52 {offsets = [0, 0], sizes = [1, 256], strides = [1, 1]} : vector<12x256xf32> to vector<1x256xf32>
    %c0_48 = arith.constant 0 : index
    %c0_49 = arith.constant 0 : index
    %54 = vector.load %arg7[%c0_48, %c0_49] : memref<2x3072xf32, #tpu.memory_space<vmem>>, vector<1x256xf32>
    tpu.vector_store %arg7[%c0_48, %c0_49], %53 {strides = array<i32>} : memref<2x3072xf32, #tpu.memory_space<vmem>>, vector<1x256xf32>,
    %55 = vector.extract_strided_slice %52 {offsets = [1, 0], sizes = [1, 256], strides = [1, 1]} : vector<12x256xf32> to vector<1x256xf32>
    %c0_50 = arith.constant 0 : index
    %c256 = arith.constant 256 : index
    %56 = vector.load %arg7[%c0_50, %c256] : memref<2x3072xf32, #tpu.memory_space<vmem>>, vector<1x256xf32>
    tpu.vector_store %arg7[%c0_50, %c256], %55 {strides = array<i32>} : memref<2x3072xf32, #tpu.memory_space<vmem>>, vector<1x256xf32>,
    %57 = vector.extract_strided_slice %52 {offsets = [2, 0], sizes = [1, 256], strides = [1, 1]} : vector<12x256xf32> to vector<1x256xf32>
    %c0_51 = arith.constant 0 : index
    %c512 = arith.constant 512 : index
    %58 = vector.load %arg7[%c0_51, %c512] : memref<2x3072xf32, #tpu.memory_space<vmem>>, vector<1x256xf32>
    tpu.vector_store %arg7[%c0_51, %c512], %57 {strides = array<i32>} : memref<2x3072xf32, #tpu.memory_space<vmem>>, vector<1x256xf32>,
    %59 = vector.extract_strided_slice %52 {offsets = [3, 0], sizes = [1, 256], strides = [1, 1]} : vector<12x256xf32> to vector<1x256xf32>
    %c0_52 = arith.constant 0 : index
    %c768 = arith.constant 768 : index
    %60 = vector.load %arg7[%c0_52, %c768] : memref<2x3072xf32, #tpu.memory_space<vmem>>, vector<1x256xf32>
    tpu.vector_store %arg7[%c0_52, %c768], %59 {strides = array<i32>} : memref<2x3072xf32, #tpu.memory_space<vmem>>, vector<1x256xf32>,
    %61 = vector.extract_strided_slice %52 {offsets = [4, 0], sizes = [1, 256], strides = [1, 1]} : vector<12x256xf32> to vector<1x256xf32>
    %c0_53 = arith.constant 0 : index
    %c1024 = arith.constant 1024 : index
    %62 = vector.load %arg7[%c0_53, %c1024] : memref<2x3072xf32, #tpu.memory_space<vmem>>, vector<1x256xf32>
    tpu.vector_store %arg7[%c0_53, %c1024], %61 {strides = array<i32>} : memref<2x3072xf32, #tpu.memory_space<vmem>>, vector<1x256xf32>,
    %63 = vector.extract_strided_slice %52 {offsets = [5, 0], sizes = [1, 256], strides = [1, 1]} : vector<12x256xf32> to vector<1x256xf32>
    %c0_54 = arith.constant 0 : index
    %c1280 = arith.constant 1280 : index
    %64 = vector.load %arg7[%c0_54, %c1280] : memref<2x3072xf32, #tpu.memory_space<vmem>>, vector<1x256xf32>
    tpu.vector_store %arg7[%c0_54, %c1280], %63 {strides = array<i32>} : memref<2x3072xf32, #tpu.memory_space<vmem>>, vector<1x256xf32>,
    %65 = vector.extract_strided_slice %52 {offsets = [6, 0], sizes = [1, 256], strides = [1, 1]} : vector<12x256xf32> to vector<1x256xf32>
    %c0_55 = arith.constant 0 : index
    %c1536 = arith.constant 1536 : index
    %66 = vector.load %arg7[%c0_55, %c1536] : memref<2x3072xf32, #tpu.memory_space<vmem>>, vector<1x256xf32>
    tpu.vector_store %arg7[%c0_55, %c1536], %65 {strides = array<i32>} : memref<2x3072xf32, #tpu.memory_space<vmem>>, vector<1x256xf32>,
    %67 = vector.extract_strided_slice %52 {offsets = [7, 0], sizes = [1, 256], strides = [1, 1]} : vector<12x256xf32> to vector<1x256xf32>
    %c0_56 = arith.constant 0 : index
    %c1792 = arith.constant 1792 : index
    %68 = vector.load %arg7[%c0_56, %c1792] : memref<2x3072xf32, #tpu.memory_space<vmem>>, vector<1x256xf32>
    tpu.vector_store %arg7[%c0_56, %c1792], %67 {strides = array<i32>} : memref<2x3072xf32, #tpu.memory_space<vmem>>, vector<1x256xf32>,
    %69 = vector.extract_strided_slice %52 {offsets = [8, 0], sizes = [1, 256], strides = [1, 1]} : vector<12x256xf32> to vector<1x256xf32>
    %c0_57 = arith.constant 0 : index
    %c2048 = arith.constant 2048 : index
    %70 = vector.load %arg7[%c0_57, %c2048] : memref<2x3072xf32, #tpu.memory_space<vmem>>, vector<1x256xf32>
    tpu.vector_store %arg7[%c0_57, %c2048], %69 {strides = array<i32>} : memref<2x3072xf32, #tpu.memory_space<vmem>>, vector<1x256xf32>,
    %71 = vector.extract_strided_slice %52 {offsets = [9, 0], sizes = [1, 256], strides = [1, 1]} : vector<12x256xf32> to vector<1x256xf32>
    %c0_58 = arith.constant 0 : index
    %c2304 = arith.constant 2304 : index
    %72 = vector.load %arg7[%c0_58, %c2304] : memref<2x3072xf32, #tpu.memory_space<vmem>>, vector<1x256xf32>
    tpu.vector_store %arg7[%c0_58, %c2304], %71 {strides = array<i32>} : memref<2x3072xf32, #tpu.memory_space<vmem>>, vector<1x256xf32>,
    %73 = vector.extract_strided_slice %52 {offsets = [10, 0], sizes = [1, 256], strides = [1, 1]} : vector<12x256xf32> to vector<1x256xf32>
    %c0_59 = arith.constant 0 : index
    %c2560 = arith.constant 2560 : index
    %74 = vector.load %arg7[%c0_59, %c2560] : memref<2x3072xf32, #tpu.memory_space<vmem>>, vector<1x256xf32>
    tpu.vector_store %arg7[%c0_59, %c2560], %73 {strides = array<i32>} : memref<2x3072xf32, #tpu.memory_space<vmem>>, vector<1x256xf32>,
    %75 = vector.extract_strided_slice %52 {offsets = [11, 0], sizes = [1, 256], strides = [1, 1]} : vector<12x256xf32> to vector<1x256xf32>
    %c0_60 = arith.constant 0 : index
    %c2816 = arith.constant 2816 : index
    %76 = vector.load %arg7[%c0_60, %c2816] : memref<2x3072xf32, #tpu.memory_space<vmem>>, vector<1x256xf32>
    tpu.vector_store %arg7[%c0_60, %c2816], %75 {strides = array<i32>} : memref<2x3072xf32, #tpu.memory_space<vmem>>, vector<1x256xf32>,
    %c32 = arith.constant 32 : index
    %c0_61 = arith.constant 0 : index
    %77 = tpu.strided_load %arg1[%c32, %c0_61] {strides = array<i32: 2, 1>} : memref<64x28xf32, #tpu.memory_space<vmem>>, vector<12x28xf32>
    %c0_62 = arith.constant 0 : index
    %c0_63 = arith.constant 0 : index
    %c0_64 = arith.constant 0 : index
    %78 = vector.load %arg2[%c0_62, %c0_63, %c0_64] : memref<5x28x512xf32, #tpu.memory_space<vmem>>, vector<1x28x512xf32>
    %79 = vector.shape_cast %78 : vector<1x28x512xf32> to vector<28x512xf32>
    %cst_65 = arith.constant dense<0.000000e+00> : vector<12x512xf32>
    %80 = tpu.matmul %77, %79, %cst_65 {dimension_numbers = #tpu.dot_dimension_numbers<[1], [0], [0], [1], [0, 0, 1, 1], [], []>} : vector<12x28xf32>, vector<28x512xf32>, vector<12x512xf32> -> vector<12x512xf32>
    %c33 = arith.constant 33 : index
    %c0_66 = arith.constant 0 : index
    %81 = tpu.strided_load %arg1[%c33, %c0_66] {strides = array<i32: 2, 1>} : memref<64x28xf32, #tpu.memory_space<vmem>>, vector<12x28xf32>
    %c1_67 = arith.constant 1 : index
    %c0_68 = arith.constant 0 : index
    %c0_69 = arith.constant 0 : index
    %82 = vector.load %arg2[%c1_67, %c0_68, %c0_69] : memref<5x28x512xf32, #tpu.memory_space<vmem>>, vector<1x28x512xf32>
    %83 = vector.shape_cast %82 : vector<1x28x512xf32> to vector<28x512xf32>
    %cst_70 = arith.constant dense<0.000000e+00> : vector<12x512xf32>
    %84 = tpu.matmul %81, %83, %cst_70 {dimension_numbers = #tpu.dot_dimension_numbers<[1], [0], [0], [1], [0, 0, 1, 1], [], []>} : vector<12x28xf32>, vector<28x512xf32>, vector<12x512xf32> -> vector<12x512xf32>
    %85 = arith.addf %80, %84 : vector<12x512xf32>
    %c0_71 = arith.constant 0 : index
    %c0_72 = arith.constant 0 : index
    %c0_73 = arith.constant 0 : index
    %86 = vector.load %arg2[%c0_71, %c0_72, %c0_73] : memref<5x28x512xf32, #tpu.memory_space<vmem>>, vector<1x28x512xf32>
    %87 = vector.shape_cast %86 : vector<1x28x512xf32> to vector<28x512xf32>
    %cst_74 = arith.constant dense<0.000000e+00> : vector<12x512xf32>
    %88 = tpu.matmul %81, %87, %cst_74 {dimension_numbers = #tpu.dot_dimension_numbers<[1], [0], [0], [1], [0, 0, 1, 1], [], []>} : vector<12x28xf32>, vector<28x512xf32>, vector<12x512xf32> -> vector<12x512xf32>
    %c34 = arith.constant 34 : index
    %c0_75 = arith.constant 0 : index
    %89 = tpu.strided_load %arg1[%c34, %c0_75] {strides = array<i32: 2, 1>} : memref<64x28xf32, #tpu.memory_space<vmem>>, vector<12x28xf32>
    %c2_76 = arith.constant 2 : index
    %c0_77 = arith.constant 0 : index
    %c0_78 = arith.constant 0 : index
    %90 = vector.load %arg2[%c2_76, %c0_77, %c0_78] : memref<5x28x512xf32, #tpu.memory_space<vmem>>, vector<1x28x512xf32>
    %91 = vector.shape_cast %90 : vector<1x28x512xf32> to vector<28x512xf32>
    %cst_79 = arith.constant dense<0.000000e+00> : vector<12x512xf32>
    %92 = tpu.matmul %89, %91, %cst_79 {dimension_numbers = #tpu.dot_dimension_numbers<[1], [0], [0], [1], [0, 0, 1, 1], [], []>} : vector<12x28xf32>, vector<28x512xf32>, vector<12x512xf32> -> vector<12x512xf32>
    %93 = arith.addf %85, %92 : vector<12x512xf32>
    %c1_80 = arith.constant 1 : index
    %c0_81 = arith.constant 0 : index
    %c0_82 = arith.constant 0 : index
    %94 = vector.load %arg2[%c1_80, %c0_81, %c0_82] : memref<5x28x512xf32, #tpu.memory_space<vmem>>, vector<1x28x512xf32>
    %95 = vector.shape_cast %94 : vector<1x28x512xf32> to vector<28x512xf32>
    %cst_83 = arith.constant dense<0.000000e+00> : vector<12x512xf32>
    %96 = tpu.matmul %89, %95, %cst_83 {dimension_numbers = #tpu.dot_dimension_numbers<[1], [0], [0], [1], [0, 0, 1, 1], [], []>} : vector<12x28xf32>, vector<28x512xf32>, vector<12x512xf32> -> vector<12x512xf32>
    %97 = arith.addf %88, %96 : vector<12x512xf32>
    %c35 = arith.constant 35 : index
    %c0_84 = arith.constant 0 : index
    %98 = tpu.strided_load %arg1[%c35, %c0_84] {strides = array<i32: 2, 1>} : memref<64x28xf32, #tpu.memory_space<vmem>>, vector<12x28xf32>
    %c3_85 = arith.constant 3 : index
    %c0_86 = arith.constant 0 : index
    %c0_87 = arith.constant 0 : index
    %99 = vector.load %arg2[%c3_85, %c0_86, %c0_87] : memref<5x28x512xf32, #tpu.memory_space<vmem>>, vector<1x28x512xf32>
    %100 = vector.shape_cast %99 : vector<1x28x512xf32> to vector<28x512xf32>
    %cst_88 = arith.constant dense<0.000000e+00> : vector<12x512xf32>
    %101 = tpu.matmul %98, %100, %cst_88 {dimension_numbers = #tpu.dot_dimension_numbers<[1], [0], [0], [1], [0, 0, 1, 1], [], []>} : vector<12x28xf32>, vector<28x512xf32>, vector<12x512xf32> -> vector<12x512xf32>
    %102 = arith.addf %93, %101 : vector<12x512xf32>
    %c2_89 = arith.constant 2 : index
    %c0_90 = arith.constant 0 : index
    %c0_91 = arith.constant 0 : index
    %103 = vector.load %arg2[%c2_89, %c0_90, %c0_91] : memref<5x28x512xf32, #tpu.memory_space<vmem>>, vector<1x28x512xf32>
    %104 = vector.shape_cast %103 : vector<1x28x512xf32> to vector<28x512xf32>
    %cst_92 = arith.constant dense<0.000000e+00> : vector<12x512xf32>
    %105 = tpu.matmul %98, %104, %cst_92 {dimension_numbers = #tpu.dot_dimension_numbers<[1], [0], [0], [1], [0, 0, 1, 1], [], []>} : vector<12x28xf32>, vector<28x512xf32>, vector<12x512xf32> -> vector<12x512xf32>
    %106 = arith.addf %97, %105 : vector<12x512xf32>
    %c36 = arith.constant 36 : index
    %c0_93 = arith.constant 0 : index
    %107 = tpu.strided_load %arg1[%c36, %c0_93] {strides = array<i32: 2, 1>} : memref<64x28xf32, #tpu.memory_space<vmem>>, vector<12x28xf32>
    %c4_94 = arith.constant 4 : index
    %c0_95 = arith.constant 0 : index
    %c0_96 = arith.constant 0 : index
    %108 = vector.load %arg2[%c4_94, %c0_95, %c0_96] : memref<5x28x512xf32, #tpu.memory_space<vmem>>, vector<1x28x512xf32>
    %109 = vector.shape_cast %108 : vector<1x28x512xf32> to vector<28x512xf32>
    %cst_97 = arith.constant dense<0.000000e+00> : vector<12x512xf32>
    %110 = tpu.matmul %107, %109, %cst_97 {dimension_numbers = #tpu.dot_dimension_numbers<[1], [0], [0], [1], [0, 0, 1, 1], [], []>} : vector<12x28xf32>, vector<28x512xf32>, vector<12x512xf32> -> vector<12x512xf32>
    %111 = arith.addf %102, %110 : vector<12x512xf32>
    %c3_98 = arith.constant 3 : index
    %c0_99 = arith.constant 0 : index
    %c0_100 = arith.constant 0 : index
    %112 = vector.load %arg2[%c3_98, %c0_99, %c0_100] : memref<5x28x512xf32, #tpu.memory_space<vmem>>, vector<1x28x512xf32>
    %113 = vector.shape_cast %112 : vector<1x28x512xf32> to vector<28x512xf32>
    %cst_101 = arith.constant dense<0.000000e+00> : vector<12x512xf32>
    %114 = tpu.matmul %107, %113, %cst_101 {dimension_numbers = #tpu.dot_dimension_numbers<[1], [0], [0], [1], [0, 0, 1, 1], [], []>} : vector<12x28xf32>, vector<28x512xf32>, vector<12x512xf32> -> vector<12x512xf32>
    %115 = arith.addf %106, %114 : vector<12x512xf32>
    %c37 = arith.constant 37 : index
    %c0_102 = arith.constant 0 : index
    %116 = tpu.strided_load %arg1[%c37, %c0_102] {strides = array<i32: 2, 1>} : memref<64x28xf32, #tpu.memory_space<vmem>>, vector<12x28xf32>
    %c4_103 = arith.constant 4 : index
    %c0_104 = arith.constant 0 : index
    %c0_105 = arith.constant 0 : index
    %117 = vector.load %arg2[%c4_103, %c0_104, %c0_105] : memref<5x28x512xf32, #tpu.memory_space<vmem>>, vector<1x28x512xf32>
    %118 = vector.shape_cast %117 : vector<1x28x512xf32> to vector<28x512xf32>
    %cst_106 = arith.constant dense<0.000000e+00> : vector<12x512xf32>
    %119 = tpu.matmul %116, %118, %cst_106 {dimension_numbers = #tpu.dot_dimension_numbers<[1], [0], [0], [1], [0, 0, 1, 1], [], []>} : vector<12x28xf32>, vector<28x512xf32>, vector<12x512xf32> -> vector<12x512xf32>
    %120 = arith.addf %115, %119 : vector<12x512xf32>
    %121 = arith.maximumf %111, %120 : vector<12x512xf32>
    %122 = vector.broadcast %0 : vector<1x512xf32> to vector<12x512xf32>
    %123 = arith.addf %121, %122 : vector<12x512xf32>
    %cst_107 = arith.constant 0.000000e+00 : f32
    %124 = vector.broadcast %cst_107 : f32 to vector<12x512xf32>
    %125 = arith.maximumf %123, %124 : vector<12x512xf32>
    %126 = vector.extract_strided_slice %125 {offsets = [0, 0], sizes = [12, 256], strides = [1, 1]} : vector<12x512xf32> to vector<12x256xf32>
    %127 = vector.extract_strided_slice %125 {offsets = [0, 256], sizes = [12, 256], strides = [1, 1]} : vector<12x512xf32> to vector<12x256xf32>
    %128 = arith.maximumf %126, %127 : vector<12x256xf32>
    %129 = vector.extract_strided_slice %128 {offsets = [0, 0], sizes = [1, 256], strides = [1, 1]} : vector<12x256xf32> to vector<1x256xf32>
    %c1_108 = arith.constant 1 : index
    %c0_109 = arith.constant 0 : index
    %130 = vector.load %arg7[%c1_108, %c0_109] : memref<2x3072xf32, #tpu.memory_space<vmem>>, vector<1x256xf32>
    tpu.vector_store %arg7[%c1_108, %c0_109], %129 {strides = array<i32>} : memref<2x3072xf32, #tpu.memory_space<vmem>>, vector<1x256xf32>,
    %131 = vector.extract_strided_slice %128 {offsets = [1, 0], sizes = [1, 256], strides = [1, 1]} : vector<12x256xf32> to vector<1x256xf32>
    %c1_110 = arith.constant 1 : index
    %c256_111 = arith.constant 256 : index
    %132 = vector.load %arg7[%c1_110, %c256_111] : memref<2x3072xf32, #tpu.memory_space<vmem>>, vector<1x256xf32>
    tpu.vector_store %arg7[%c1_110, %c256_111], %131 {strides = array<i32>} : memref<2x3072xf32, #tpu.memory_space<vmem>>, vector<1x256xf32>,
    %133 = vector.extract_strided_slice %128 {offsets = [2, 0], sizes = [1, 256], strides = [1, 1]} : vector<12x256xf32> to vector<1x256xf32>
    %c1_112 = arith.constant 1 : index
    %c512_113 = arith.constant 512 : index
    %134 = vector.load %arg7[%c1_112, %c512_113] : memref<2x3072xf32, #tpu.memory_space<vmem>>, vector<1x256xf32>
    tpu.vector_store %arg7[%c1_112, %c512_113], %133 {strides = array<i32>} : memref<2x3072xf32, #tpu.memory_space<vmem>>, vector<1x256xf32>,
    %135 = vector.extract_strided_slice %128 {offsets = [3, 0], sizes = [1, 256], strides = [1, 1]} : vector<12x256xf32> to vector<1x256xf32>
    %c1_114 = arith.constant 1 : index
    %c768_115 = arith.constant 768 : index
    %136 = vector.load %arg7[%c1_114, %c768_115] : memref<2x3072xf32, #tpu.memory_space<vmem>>, vector<1x256xf32>
    tpu.vector_store %arg7[%c1_114, %c768_115], %135 {strides = array<i32>} : memref<2x3072xf32, #tpu.memory_space<vmem>>, vector<1x256xf32>,
    %137 = vector.extract_strided_slice %128 {offsets = [4, 0], sizes = [1, 256], strides = [1, 1]} : vector<12x256xf32> to vector<1x256xf32>
    %c1_116 = arith.constant 1 : index
    %c1024_117 = arith.constant 1024 : index
    %138 = vector.load %arg7[%c1_116, %c1024_117] : memref<2x3072xf32, #tpu.memory_space<vmem>>, vector<1x256xf32>
    tpu.vector_store %arg7[%c1_116, %c1024_117], %137 {strides = array<i32>} : memref<2x3072xf32, #tpu.memory_space<vmem>>, vector<1x256xf32>,
    %139 = vector.extract_strided_slice %128 {offsets = [5, 0], sizes = [1, 256], strides = [1, 1]} : vector<12x256xf32> to vector<1x256xf32>
    %c1_118 = arith.constant 1 : index
    %c1280_119 = arith.constant 1280 : index
    %140 = vector.load %arg7[%c1_118, %c1280_119] : memref<2x3072xf32, #tpu.memory_space<vmem>>, vector<1x256xf32>
    tpu.vector_store %arg7[%c1_118, %c1280_119], %139 {strides = array<i32>} : memref<2x3072xf32, #tpu.memory_space<vmem>>, vector<1x256xf32>,
    %141 = vector.extract_strided_slice %128 {offsets = [6, 0], sizes = [1, 256], strides = [1, 1]} : vector<12x256xf32> to vector<1x256xf32>
    %c1_120 = arith.constant 1 : index
    %c1536_121 = arith.constant 1536 : index
    %142 = vector.load %arg7[%c1_120, %c1536_121] : memref<2x3072xf32, #tpu.memory_space<vmem>>, vector<1x256xf32>
    tpu.vector_store %arg7[%c1_120, %c1536_121], %141 {strides = array<i32>} : memref<2x3072xf32, #tpu.memory_space<vmem>>, vector<1x256xf32>,
    %143 = vector.extract_strided_slice %128 {offsets = [7, 0], sizes = [1, 256], strides = [1, 1]} : vector<12x256xf32> to vector<1x256xf32>
    %c1_122 = arith.constant 1 : index
    %c1792_123 = arith.constant 1792 : index
    %144 = vector.load %arg7[%c1_122, %c1792_123] : memref<2x3072xf32, #tpu.memory_space<vmem>>, vector<1x256xf32>
    tpu.vector_store %arg7[%c1_122, %c1792_123], %143 {strides = array<i32>} : memref<2x3072xf32, #tpu.memory_space<vmem>>, vector<1x256xf32>,
    %145 = vector.extract_strided_slice %128 {offsets = [8, 0], sizes = [1, 256], strides = [1, 1]} : vector<12x256xf32> to vector<1x256xf32>
    %c1_124 = arith.constant 1 : index
    %c2048_125 = arith.constant 2048 : index
    %146 = vector.load %arg7[%c1_124, %c2048_125] : memref<2x3072xf32, #tpu.memory_space<vmem>>, vector<1x256xf32>
    tpu.vector_store %arg7[%c1_124, %c2048_125], %145 {strides = array<i32>} : memref<2x3072xf32, #tpu.memory_space<vmem>>, vector<1x256xf32>,
    %147 = vector.extract_strided_slice %128 {offsets = [9, 0], sizes = [1, 256], strides = [1, 1]} : vector<12x256xf32> to vector<1x256xf32>
    %c1_126 = arith.constant 1 : index
    %c2304_127 = arith.constant 2304 : index
    %148 = vector.load %arg7[%c1_126, %c2304_127] : memref<2x3072xf32, #tpu.memory_space<vmem>>, vector<1x256xf32>
    tpu.vector_store %arg7[%c1_126, %c2304_127], %147 {strides = array<i32>} : memref<2x3072xf32, #tpu.memory_space<vmem>>, vector<1x256xf32>,
    %149 = vector.extract_strided_slice %128 {offsets = [10, 0], sizes = [1, 256], strides = [1, 1]} : vector<12x256xf32> to vector<1x256xf32>
    %c1_128 = arith.constant 1 : index
    %c2560_129 = arith.constant 2560 : index
    %150 = vector.load %arg7[%c1_128, %c2560_129] : memref<2x3072xf32, #tpu.memory_space<vmem>>, vector<1x256xf32>
    tpu.vector_store %arg7[%c1_128, %c2560_129], %149 {strides = array<i32>} : memref<2x3072xf32, #tpu.memory_space<vmem>>, vector<1x256xf32>,
    %151 = vector.extract_strided_slice %128 {offsets = [11, 0], sizes = [1, 256], strides = [1, 1]} : vector<12x256xf32> to vector<1x256xf32>
    %c1_130 = arith.constant 1 : index
    %c2816_131 = arith.constant 2816 : index
    %152 = vector.load %arg7[%c1_130, %c2816_131] : memref<2x3072xf32, #tpu.memory_space<vmem>>, vector<1x256xf32>
    tpu.vector_store %arg7[%c1_130, %c2816_131], %151 {strides = array<i32>} : memref<2x3072xf32, #tpu.memory_space<vmem>>, vector<1x256xf32>,
    %c0_132 = arith.constant 0 : index
    %c0_133 = arith.constant 0 : index
    %153 = vector.load %arg7[%c0_132, %c0_133] : memref<2x3072xf32, #tpu.memory_space<vmem>>, vector<2x3072xf32>
    %c0_134 = arith.constant 0 : index
    %c0_135 = arith.constant 0 : index
    %154 = vector.load %arg4[%c0_134, %c0_135] : memref<3072x10xf32, #tpu.memory_space<vmem>>, vector<3072x10xf32>
    %cst_136 = arith.constant dense<0.000000e+00> : vector<2x10xf32>
    %155 = tpu.matmul %153, %154, %cst_136 {dimension_numbers = #tpu.dot_dimension_numbers<[1], [0], [0], [1], [0, 0, 1, 1], [], []>} : vector<2x3072xf32>, vector<3072x10xf32>, vector<2x10xf32> -> vector<2x10xf32>
    %c0_137 = arith.constant 0 : index
    %c0_138 = arith.constant 0 : index
    %156 = vector.load %arg5[%c0_137, %c0_138] : memref<1x10xf32, #tpu.memory_space<vmem>>, vector<1x10xf32>
    %157 = vector.broadcast %156 : vector<1x10xf32> to vector<2x10xf32>
    %158 = arith.addf %155, %157 : vector<2x10xf32>
    %cst_139 = arith.constant dense<0xFF800000> : vector<2xf32>
    %159 = vector.multi_reduction <maximumf>, %158, %cst_139 [1] : vector<2x10xf32> to vector<2xf32>
    %160 = vector.shape_cast %159 : vector<2xf32> to vector<2x1xf32>
    %161 = vector.broadcast %160 : vector<2x1xf32> to vector<2x10xf32>
    %162 = arith.subf %158, %161 : vector<2x10xf32>
    %163 = math.exp %162 : vector<2x10xf32>
    %cst_140 = arith.constant dense<0.000000e+00> : vector<2xf32>
    %164 = vector.multi_reduction <add>, %163, %cst_140 [1] : vector<2x10xf32> to vector<2xf32>
    %165 = vector.shape_cast %164 : vector<2xf32> to vector<2x1xf32>
    %166 = math.log %165 : vector<2x1xf32>
    %167 = vector.broadcast %166 : vector<2x1xf32> to vector<2x10xf32>
    %168 = arith.subf %162, %167 : vector<2x10xf32>
    %169 = vector.extract_strided_slice %168 {offsets = [0, 0], sizes = [1, 10], strides = [1, 1]} : vector<2x10xf32> to vector<1x10xf32>
    %c0_141 = arith.constant 0 : index
    %c0_142 = arith.constant 0 : index
    %c0_143 = arith.constant 0 : index
    %170 = vector.load %arg6[%c0_141, %c0_142, %c0_143] : memref<2x1x10xf32, #tpu.memory_space<vmem>>, vector<1x1x10xf32>
    %171 = vector.shape_cast %170 : vector<1x1x10xf32> to vector<1x10xf32>
    %172 = vector.shape_cast %169 : vector<1x10xf32> to vector<1x1x10xf32>
    tpu.vector_store %arg6[%c0_141, %c0_142, %c0_143], %172 {strides = array<i32>} : memref<2x1x10xf32, #tpu.memory_space<vmem>>, vector<1x1x10xf32>,
    %173 = vector.extract_strided_slice %168 {offsets = [1, 0], sizes = [1, 10], strides = [1, 1]} : vector<2x10xf32> to vector<1x10xf32>
    %c1_144 = arith.constant 1 : index
    %c0_145 = arith.constant 0 : index
    %c0_146 = arith.constant 0 : index
    %174 = vector.load %arg6[%c1_144, %c0_145, %c0_146] : memref<2x1x10xf32, #tpu.memory_space<vmem>>, vector<1x1x10xf32>
    %175 = vector.shape_cast %174 : vector<1x1x10xf32> to vector<1x10xf32>
    %176 = vector.shape_cast %173 : vector<1x10xf32> to vector<1x1x10xf32>
    tpu.vector_store %arg6[%c1_144, %c0_145, %c0_146], %176 {strides = array<i32>} : memref<2x1x10xf32, #tpu.memory_space<vmem>>, vector<1x1x10xf32>,
    return
  }
  func.func @transform_0(%arg0: i32) -> (i32, i32) {
    %c0_i32 = arith.constant 0 : i32
    %c0_i32_0 = arith.constant 0 : i32
    return %arg0, %c0_i32 : i32, i32
  }
  func.func @transform_1(%arg0: i32) -> (i32, i32, i32) {
    %c0_i32 = arith.constant 0 : i32
    %c0_i32_0 = arith.constant 0 : i32
    %c0_i32_1 = arith.constant 0 : i32
    %c0_i32_2 = arith.constant 0 : i32
    return %c0_i32, %c0_i32_0, %c0_i32_1 : i32, i32, i32
  }
  func.func @transform_2(%arg0: i32) -> (i32, i32) {
    %c0_i32 = arith.constant 0 : i32
    %c0_i32_0 = arith.constant 0 : i32
    %c0_i32_1 = arith.constant 0 : i32
    return %c0_i32, %c0_i32_0 : i32, i32
  }
  func.func @transform_3(%arg0: i32) -> (i32, i32) {
    %c0_i32 = arith.constant 0 : i32
    %c0_i32_0 = arith.constant 0 : i32
    %c0_i32_1 = arith.constant 0 : i32
    return %c0_i32, %c0_i32_0 : i32, i32
  }
  func.func @transform_4(%arg0: i32) -> (i32, i32) {
    %c0_i32 = arith.constant 0 : i32
    %c0_i32_0 = arith.constant 0 : i32
    %c0_i32_1 = arith.constant 0 : i32
    return %c0_i32, %c0_i32_0 : i32, i32
  }
  func.func @transform_5(%arg0: i32) -> (i32, i32, i32) {
    %c0_i32 = arith.constant 0 : i32
    %c0_i32_0 = arith.constant 0 : i32
    %c0_i32_1 = arith.constant 0 : i32
    return %arg0, %c0_i32, %c0_i32_0 : i32, i32, i32
  }
}

</mosaic_0001>

<bundles_post_ra>
// kernel: tile.8
= control target key start
LH: loop header
LB: loop body
LE: loop exit
PB: predicated region body
PF: predicated region fallthrough
CT: control target
= control target key end

     0   :  { %s40_s0 = inlined_call_operand.vmem [shape: f32[16], index: 0, kind: input, shape index: {}]   ;;  %s41_s1 = inlined_call_operand.vmem [shape: f32[32,16], index: 1, kind: output, shape index: {}]  }
   0x1   :  { %v4_v0 = vld [vmem:[%s40_s0] ss:$0 sm:$0xff] }
   0x2   :  { %5 = vst [vmem:[%s41_s1] sm:$0xff] %v4_v0  ;;  %12 = vst [vmem:[%s41_s1 + $0x8] sm:$0xff] %v4_v0 }
   0x3   :  { %13 = vst [vmem:[%s41_s1 + $0x10] sm:$0xff] %v4_v0  ;;  %14 = vst [vmem:[%s41_s1 + $0x18] sm:$0xff] %v4_v0 }

// kernel: tile.9
= control target key start
LH: loop header
LB: loop body
LE: loop exit
PB: predicated region body
PF: predicated region fallthrough
CT: control target
= control target key end

     0   :  { %s89_s8 = smov 112   ;;  %s90_s11 = smov 80   ;;  %vm3_vm0 = vcmask 130048   ;;  %vm9_vm1 = vcmask 1048448   ;;  %vm15_vm2 = vcmask 917248   ;;  %vm21_vm3 = vcmask 786048   ;;  %s142_s0 = inlined_call_operand.vmem [shape: f32[32,16], index: 0, kind: input, shape index: {}]   ;;  %s143_s1 = inlined_call_operand.vmem [shape: f32[1,512], index: 1, kind: output, shape index: {}]  }
   0x1   :  { %v72_v0 = vld [vmem:[%s142_s0 + $0x7] ss:$8 sm:$0xf]   ;;  %v74_v1 = vld [vmem:[%s142_s0 + $0x5] ss:$8 sm:$0xf]  }
   0x2   :  { %7 = vrot.lane.b32.xlu0 %v72_v0, %s89_s8  ;;  %19 = vrot.lane.b32.xlu1 %v74_v1, %s90_s11  ;;  %v73_v2 = vld [vmem:[%s142_s0 + $0x6] ss:$8 sm:$0xf]   ;;  %v75_v3 = vld [vmem:[%s142_s0 + $0x4] ss:$8 sm:$0xf]  }
   0x3   :  { %s91_s16 = smov 96   ;;  %v2_v4 = vld [vmem:[%s142_s0] ss:$8 sm:$0xf]   ;;  %s92_s19 = smov 64   ;;  %vm27_vm4 = vcmask 654848  }
   0x4   :  { %v76_v5 = vld [vmem:[%s142_s0 + $0x3] ss:$8 sm:$0xf]   ;;  %4 = vst.msk [vmem:[#allocation0] ss:$8 sm:$0xf] %vm3_vm0, %v2_v4  }
   0x5   :  { %v77_v6 = vld [vmem:[%s142_s0 + $0x2] ss:$8 sm:$0xf]   ;;  %s93_s24 = smov 48   ;;  %s94_s25 = smov 32   ;;  %vm33_vm5 = vcmask 523648  }
   0x6   :  { %13 = vrot.lane.b32.xlu0 %v73_v2, %s91_s16  ;;  %25 = vrot.lane.b32.xlu1 %v75_v3, %s92_s19  ;;  %v78_v7 = vld [vmem:[%s142_s0 + $0x1] ss:$8 sm:$0xf]   ;;  %s95_s0 = smov 16   ;;  %vm39_vm6 = vcmask 392448   ;;  %vm45_vm7 = vcmask 261248  }
   0xa   :  { %31 = vrot.lane.b32.xlu0 %v76_v5, %s93_s24  ;;  %37 = vrot.lane.b32.xlu1 %v77_v6, %s94_s25 }
   0xe   :  { %43 = vrot.lane.b32.xlu0 %v78_v7, %s95_s0 }
  0x74   :  { %v8_v8 = vpop.permute.xlu0 %7   ;;  %v20_v9 = vpop.permute.xlu1 %19  }
  0x75   :  { %10 = vst.msk [vmem:[#allocation0] ss:$8 sm:$0xf] %vm9_vm1, %v8_v8  }
  0x78   :  { %v14_v10 = vpop.permute.xlu0 %13   ;;  %v26_v11 = vpop.permute.xlu1 %25  }
  0x79   :  { %16 = vst.msk [vmem:[#allocation0] ss:$8 sm:$0xf] %vm15_vm2, %v14_v10  }
  0x7a   :  { %22 = vst.msk [vmem:[#allocation0] ss:$8 sm:$0xf] %vm21_vm3, %v20_v9  }
  0x7b   :  { %28 = vst.msk [vmem:[#allocation0] ss:$8 sm:$0xf] %vm27_vm4, %v26_v11  }
  0x7c   :  { %v32_v12 = vpop.permute.xlu0 %31   ;;  %v38_v13 = vpop.permute.xlu1 %37  }
  0x7d   :  { %34 = vst.msk [vmem:[#allocation0] ss:$8 sm:$0xf] %vm33_vm5, %v32_v12  }
  0x7e   :  { %40 = vst.msk [vmem:[#allocation0] ss:$8 sm:$0xf] %vm39_vm6, %v38_v13  }
  0x80   :  { %v44_v14 = vpop.permute.xlu0 %43  }
  0x81   :  { %46 = vst.msk [vmem:[#allocation0] ss:$8 sm:$0xf] %vm45_vm7, %v44_v14  }
  0x88   :  { %v50_v15 = vld [vmem:[#allocation0] sm:$0x1]  ;;  %v54_v16 = vld [vmem:[#allocation0 + $0x8] sm:$0x1]  ;;  %v59_v17 = vld [vmem:[#allocation0 + $0x10] sm:$0x1] }
  0x89   :  { %52 = vst [vmem:[%s143_s1] sm:$0x1] %v50_v15  ;;  %79 = vst [vmem:[%s143_s1 + $0x1] sm:$0x1] %v54_v16  ;;  %v65_v18 = vld [vmem:[#allocation0 + $0x18] sm:$0x1] }
  0x8a   :  { %80 = vst [vmem:[%s143_s1 + $0x2] sm:$0x1] %v59_v17  ;;  %81 = vst [vmem:[%s143_s1 + $0x3] sm:$0x1] %v65_v18 }

// kernel: forward.1
= control target key start
LH: loop header
LB: loop body
LE: loop exit
PB: predicated region body
PF: predicated region fallthrough
CT: control target
= control target key end

     0   :  { %vm69_vm0 = vcmask 1043456   ;;  %v7001_v7 = vmov 0.0   ;;  %vm7002_vm1 = vmmov 1   ;;  %vm62_vm3 = vcmask 228352   ;;  %s9425_s0 = inlined_call_operand.vmem [shape: f32[64,28], index: 0, kind: input, shape index: {}]   ;;  %s9426_s1 = inlined_call_operand.vmem [shape: f32[5,28,512], index: 1, kind: input, shape index: {}]   ;;  %s9427_s2 = inlined_call_operand.vmem [shape: f32[1,512], index: 2, kind: input, shape index: {}]   ;;  %s9428_s3 = inlined_call_operand.vmem [shape: f32[3072,10], index: 3, kind: input, shape index: {}]   ;;  %s9429_s4 = inlined_call_operand.vmem [shape: f32[1,10], index: 4, kind: input, shape index: {}]   ;;  %s9430_s5 = inlined_call_operand.hbm [shape: f32[2,1,10], index: 5, kind: output, shape index: {}]  }
   0x1   :  { %v5320_v0 = vld [vmem:[%s9426_s1 + $0x88] sm:$0xff]  ;;  %v5322_v2 = vld [vmem:[%s9426_s1 + $0x98] sm:$0xff]  ;;  %v5319_v5 = vld [vmem:[%s9426_s1 + $0x80] sm:$0xff]  ;;  %146 = vmatprep.mubr.f32.mxu0 %v7001_v7  ;;  %223 = vmatprep.mubr.f32.mxu1 %v7001_v7 }
   0x2   :  { %v5324_v1 = vld [vmem:[%s9426_s1 + $0xa8] sm:$0xff]  ;;  %v5326_v4 = vld [vmem:[%s9426_s1 + $0xb8] sm:$0xff]  ;;  %v5323_v6 = vld [vmem:[%s9426_s1 + $0xa0] sm:$0xff] }
   0x3   :  { %v7047_v3 = vpack.c.bf16 %v5324_v1, %v5320_v0  ;;  %v7060_v8 = vpack.c.bf16 %v5326_v4, %v5322_v2  ;;  %v7062_v9 = vpack.c.bf16 %v5323_v6, %v5319_v5  ;;  %v5321_v10 = vld [vmem:[%s9426_s1 + $0x90] sm:$0xff]  ;;  %v7073_v12 = vld [vmem:[%s9426_s1 + $0xc8] sm:$0xff]  ;;  %vm7082_vm2 = vmpackc.low %vm69_vm0, %vm7002_vm1 }
   0x4   :  { %v5325_v11 = vld [vmem:[%s9426_s1 + $0xb0] sm:$0xff]  ;;  %v5332_v14 = vld [vmem:[%s9426_s1 + $0xe8] sm:$0xf]  ;;  %v7089_v16 = vld [vmem:[%s9426_s1 + $0xd8] sm:$0xff] }
   0x5   :  { %6049 = vmatprep.subr.bf16.mxu0 %v7047_v3  ;;  %v7076_v13 = vpack.c.bf16 %v5325_v11, %v5321_v10  ;;  %6059 = vmatprep.subr.bf16.mxu1 %v7060_v8  ;;  %v7094_v17 = vpack.c.bf16 %v5332_v14, %v7073_v12  ;;  %v5334_v18 = vld [vmem:[%s9426_s1 + $0xf8] sm:$0xf]  ;;  %v7102_v19 = vld [vmem:[%s9426_s1 + $0xc0] sm:$0xff]  ;;  %v7117_v23 = vld [vmem:[%s9426_s1 + $0xd0] sm:$0xff] }
   0x6   :  { %6051 = vmatpush1.bf16.msra.mxu0 %v7062_v9  ;;  %v5331_v20 = vld [vmem:[%s9426_s1 + $0xe0] sm:$0xf]  ;;  %v7109_v21 = vpack.c.bf16 %v5334_v18, %v7089_v16  ;;  %v5333_v24 = vld [vmem:[%s9426_s1 + $0xf0] sm:$0xf]  ;;  %v26_v26 = vld [vmem:[%s9426_s1 + $0x8] sm:$0xff] }
   0x7   :  { %6061 = vmatpush1.bf16.msra.mxu1 %v7076_v13  ;;  %v7112_v22 = vpack.c.bf16 %v5331_v20, %v7102_v19  ;;  %6054 = vmatprep.subr.msk.bf16.mxu0 %vm7082_vm2, %v7094_v17  ;;  %v7126_v25 = vpack.c.bf16 %v5333_v24, %v7117_v23  ;;  %v30_v27 = vld [vmem:[%s9426_s1 + $0x28] sm:$0xff]  ;;  %v28_v28 = vld [vmem:[%s9426_s1 + $0x18] sm:$0xff]  ;;  %v25_v31 = vld [vmem:[%s9426_s1] sm:$0xff] }
   0x8   :  { %6064 = vmatprep.subr.msk.bf16.mxu1 %vm7082_vm2, %v7109_v21  ;;  %v7140_v29 = vpack.c.bf16 %v30_v27, %v26_v26  ;;  %v32_v30 = vld [vmem:[%s9426_s1 + $0x38] sm:$0xff]  ;;  %v29_v32 = vld [vmem:[%s9426_s1 + $0x20] sm:$0xff]  ;;  %v27_v36 = vld [vmem:[%s9426_s1 + $0x10] sm:$0xff] }
   0x9   :  { %v7157_v33 = vld [vmem:[%s9425_s0 + $0x1] ss:$2 sm:$0xff]  ;;  %v7159_v34 = vpack.c.bf16 %v32_v30, %v28_v28  ;;  %v7161_v35 = vpack.c.bf16 %v29_v32, %v25_v31  ;;  %v31_v37 = vld [vmem:[%s9426_s1 + $0x30] sm:$0xff]  ;;  %v7186_v41 = vld [vmem:[%s9426_s1 + $0x58] sm:$0xff] }
   0xa   :  { %6057 = vmatpush1.bf16.msk.msra.mxu0 %vm7082_vm2, %v7112_v22  ;;  %v7173_v38 = vpack.c.bf16 %v31_v37, %v27_v36  ;;  %v7178_v39 = vld [vmem:[%s9426_s1 + $0x48] sm:$0xff]  ;;  %v40_v43 = vld [vmem:[%s9426_s1 + $0x78] sm:$0xf]  ;;  %v7198_v44 = vld [vmem:[%s9426_s1 + $0x40] sm:$0xff] }
   0xb   :  { %6067 = vmatpush1.bf16.msk.msra.mxu1 %vm7082_vm2, %v7126_v25  ;;  %6069 = vmatprep.subr.bf16.mxu0 %v7140_v29  ;;  %v38_v40 = vld [vmem:[%s9426_s1 + $0x68] sm:$0xf]  ;;  %v37_v45 = vld [vmem:[%s9426_s1 + $0x60] sm:$0xf]  ;;  %v7211_v47 = vpack.c.bf16 %v40_v43, %v7186_v41  ;;  %v7216_v48 = vld [vmem:[%s9426_s1 + $0x50] sm:$0xff] }
   0xc   :  { %6079 = vmatprep.subr.bf16.mxu1 %v7159_v34  ;;  %v7190_v42 = vpack.c.bf16 %v38_v40, %v7178_v39  ;;  %v7208_v46 = vld [vmem:[%s9425_s0 + $0x11] ss:$2 sm:$0xf]  ;;  %v7225_v50 = vpack.c.bf16 %v37_v45, %v7198_v44  ;;  %v5354_v51 = vld [vmem:[%s9426_s1 + $0x108] sm:$0xff]  ;;  %v5356_v53 = vld [vmem:[%s9426_s1 + $0x118] sm:$0xff] }
   0xd   :  { %5337 = vmatmul.mubr.msk.f32.vlgmr.msra.gmra.mrb[0].mxu0 %vm62_vm3, %v7157_v33  ;;  %v39_v49 = vld [vmem:[%s9426_s1 + $0x70] sm:$0xf]  ;;  %v5358_v52 = vld [vmem:[%s9426_s1 + $0x128] sm:$0xff]  ;;  %v5360_v55 = vld [vmem:[%s9426_s1 + $0x138] sm:$0xff] }
   0xe   :  { %5341 = vmatmul.mubr.msk.f32.vlgmr.msra.gmra.mrb[0].mxu1 %vm62_vm3, %v7157_v33  ;;  %6071 = vmatpush1.bf16.msra.mxu0 %v7161_v35  ;;  %v7239_v54 = vpack.c.bf16 %v39_v49, %v7216_v48  ;;  %v5353_v56 = vld [vmem:[%s9426_s1 + $0x100] sm:$0xff]  ;;  %v7254_v58 = vpack.c.bf16 %v5358_v52, %v5354_v51  ;;  %v5355_v59 = vld [vmem:[%s9426_s1 + $0x110] sm:$0xff]  ;;  %v7267_v61 = vpack.c.bf16 %v5360_v55, %v5356_v53  ;;  %v7272_v62 = vld [vmem:[%s9426_s1 + $0x148] sm:$0xff] }
   0xf   :  { %6081 = vmatpush1.bf16.msra.mxu1 %v7173_v38  ;;  %152 = vmatprep.mubr.f32.mxu0 %v7001_v7  ;;  %v5357_v57 = vld [vmem:[%s9426_s1 + $0x120] sm:$0xff]  ;;  %v5359_v60 = vld [vmem:[%s9426_s1 + $0x130] sm:$0xff]  ;;  %v5366_v63 = vld [vmem:[%s9426_s1 + $0x168] sm:$0xf] }
  0x10   :  { %229 = vmatprep.mubr.f32.mxu1 %v7001_v7  ;;  %6074 = vmatprep.subr.msk.bf16.mxu0 %vm7082_vm2, %v7190_v42  ;;  %v22_v0 = vld [vmem:[%s9425_s0] ss:$2 sm:$0xff]  ;;  %v7285_v1 = vpack.c.bf16 %v5357_v57, %v5353_v56  ;;  %v7290_v2 = vld [vmem:[%s9426_s1 + $0x158] sm:$0xff]  ;;  %v7299_v5 = vpack.c.bf16 %v5359_v60, %v5355_v59  ;;  %v7312_v11 = vpack.c.bf16 %v5366_v63, %v7272_v62  ;;  %v7317_v14 = vld [vmem:[%s9426_s1 + $0x150] sm:$0xff] }
  0x11   :  { %5338 = vmatmul.mubr.msk.f32.gmra.mrb[2].mxu0 %vm62_vm3, %v7208_v46  ;;  %6084 = vmatprep.subr.msk.bf16.mxu1 %vm7082_vm2, %v7211_v47  ;;  %v5368_v4 = vld [vmem:[%s9426_s1 + $0x178] sm:$0xf]  ;;  %v7304_v6 = vld [vmem:[%s9426_s1 + $0x140] sm:$0xff]  ;;  %v5367_v18 = vld [vmem:[%s9426_s1 + $0x170] sm:$0xf] }
  0x12   :  { %5342 = vmatmul.mubr.msk.f32.gmra.mrb[2].mxu1 %vm62_vm3, %v7208_v46  ;;  %6077 = vmatpush1.bf16.msk.msra.mxu0 %vm7082_vm2, %v7225_v50  ;;  %v5365_v10 = vld [vmem:[%s9426_s1 + $0x160] sm:$0xf]  ;;  %v7325_v20 = vpack.c.bf16 %v5368_v4, %v7290_v2  ;;  %v5316_v24 = vld [vmem:[%s9425_s0 + $0x10] ss:$2 sm:$0xf]  ;;  %v7338_v27 = vpack.c.bf16 %v5367_v18, %v7317_v14 }
  0x13   :  { %6087 = vmatpush1.bf16.msk.msra.mxu1 %vm7082_vm2, %v7239_v54  ;;  %318 = vmatprep.mubr.f32.mxu0 %v7001_v7  ;;  %v7333_v26 = vpack.c.bf16 %v5365_v10, %v7304_v6  ;;  %v5351_v28 = vld [vmem:[%s9425_s0 + $0x2] ss:$2 sm:$0xff]  ;;  %v5352_v30 = vld [vmem:[%s9425_s0 + $0x12] ss:$2 sm:$0xf] }
  0x14   :  { %395 = vmatprep.mubr.f32.mxu1 %v7001_v7  ;;  %6089 = vmatprep.subr.bf16.mxu0 %v7254_v58  ;;  %v5395_v31 = vld [vmem:[%s9426_s1 + $0x180] sm:$0xff]  ;;  %v5397_v37 = vld [vmem:[%s9426_s1 + $0x190] sm:$0xff]  ;;  %v5408_v45 = vld [vmem:[%s9426_s1 + $0x1e8] sm:$0xf] }
  0x15   :  { %5345 = vmatmul.mubr.msk.f32.vlgmr.msra.gmra.mrb[0].mxu0 %vm62_vm3, %v22_v0  ;;  %6099 = vmatprep.subr.bf16.mxu1 %v7267_v61  ;;  %v5399_v32 = vld [vmem:[%s9426_s1 + $0x1a0] sm:$0xff]  ;;  %v5401_v40 = vld [vmem:[%s9426_s1 + $0x1b0] sm:$0xff]  ;;  %v5410_v51 = vld [vmem:[%s9426_s1 + $0x1f8] sm:$0xf] }
  0x16   :  { %5349 = vmatmul.mubr.msk.f32.vlgmr.msra.gmra.mrb[0].mxu1 %vm62_vm3, %v22_v0  ;;  %6091 = vmatpush1.bf16.msra.mxu0 %v7285_v1  ;;  %v7442_v49 = vpack.c.bf16 %v5399_v32, %v5395_v31  ;;  %v7456_v52 = vpack.c.bf16 %v5401_v40, %v5397_v37  ;;  %v5407_v53 = vld [vmem:[%s9426_s1 + $0x1e0] sm:$0xf]  ;;  %v5409_v56 = vld [vmem:[%s9426_s1 + $0x1f0] sm:$0xf] }
  0x17   :  { %6101 = vmatpush1.bf16.msra.mxu1 %v7299_v5  ;;  %324 = vmatprep.mubr.f32.mxu0 %v7001_v7 }
  0x18   :  { %401 = vmatprep.mubr.f32.mxu1 %v7001_v7  ;;  %6094 = vmatprep.subr.msk.bf16.mxu0 %vm7082_vm2, %v7312_v11 }
  0x19   :  { %5346 = vmatmul.mubr.msk.f32.gmra.mrb[2].mxu0 %vm62_vm3, %v5316_v24  ;;  %6104 = vmatprep.subr.msk.bf16.mxu1 %vm7082_vm2, %v7325_v20 }
  0x1a   :  { %5350 = vmatmul.mubr.msk.f32.gmra.mrb[2].mxu1 %vm62_vm3, %v5316_v24  ;;  %6097 = vmatpush1.bf16.msk.msra.mxu0 %vm7082_vm2, %v7333_v26 }
  0x1b   :  { %6107 = vmatpush1.bf16.msk.msra.mxu1 %vm7082_vm2, %v7338_v27  ;;  %511 = vmatprep.mubr.f32.mxu0 %v7001_v7 }
  0x1c   :  { %588 = vmatprep.mubr.f32.mxu1 %v7001_v7  ;;  %6109 = vmatprep.subr.bf16.mxu0 %v7047_v3 }
  0x1d   :  { %5371 = vmatmul.mubr.msk.f32.vlgmr.msra.gmra.mrb[0].mxu0 %vm62_vm3, %v5351_v28  ;;  %6119 = vmatprep.subr.bf16.mxu1 %v7060_v8 }
  0x1e   :  { %5375 = vmatmul.mubr.msk.f32.vlgmr.msra.gmra.mrb[0].mxu1 %vm62_vm3, %v5351_v28  ;;  %6111 = vmatpush1.bf16.msra.mxu0 %v7062_v9 }
  0x1f   :  { %6121 = vmatpush1.bf16.msra.mxu1 %v7076_v13  ;;  %517 = vmatprep.mubr.f32.mxu0 %v7001_v7 }
  0x20   :  { %594 = vmatprep.mubr.f32.mxu1 %v7001_v7  ;;  %6114 = vmatprep.subr.msk.bf16.mxu0 %vm7082_vm2, %v7094_v17  ;;  %v5396_v17 = vld [vmem:[%s9426_s1 + $0x188] sm:$0xff] }
  0x21   :  { %5372 = vmatmul.mubr.msk.f32.gmra.mrb[2].mxu0 %vm62_vm3, %v5352_v30  ;;  %6124 = vmatprep.subr.msk.bf16.mxu1 %vm7082_vm2, %v7109_v21  ;;  %v5400_v21 = vld [vmem:[%s9426_s1 + $0x1a8] sm:$0xff] }
  0x22   :  { %5376 = vmatmul.mubr.msk.f32.gmra.mrb[2].mxu1 %vm62_vm3, %v5352_v30  ;;  %6117 = vmatpush1.bf16.msk.msra.mxu0 %vm7082_vm2, %v7112_v22  ;;  %v5398_v22 = vld [vmem:[%s9426_s1 + $0x198] sm:$0xff]  ;;  %v7416_v36 = vpack.c.bf16 %v5400_v21, %v5396_v17 }
  0x23   :  { %6127 = vmatpush1.bf16.msk.msra.mxu1 %vm7082_vm2, %v7126_v25  ;;  %673 = vmatprep.mubr.f32.mxu0 %v7001_v7  ;;  %v5402_v25 = vld [vmem:[%s9426_s1 + $0x1b8] sm:$0xff] }
  0x24   :  { %750 = vmatprep.mubr.f32.mxu1 %v7001_v7  ;;  %6129 = vmatprep.subr.bf16.mxu0 %v7140_v29  ;;  %v7428_v43 = vpack.c.bf16 %v5402_v25, %v5398_v22 }
  0x25   :  { %5379 = vmatmul.mubr.msk.f32.vlgmr.msra.gmra.mrb[4].mxu0 %vm62_vm3, %v5351_v28  ;;  %6139 = vmatprep.subr.bf16.mxu1 %v7159_v34 }
  0x26   :  { %5383 = vmatmul.mubr.msk.f32.vlgmr.msra.gmra.mrb[4].mxu1 %vm62_vm3, %v5351_v28  ;;  %6131 = vmatpush1.bf16.msra.mxu0 %v7161_v35 }
  0x27   :  { %6141 = vmatpush1.bf16.msra.mxu1 %v7173_v38  ;;  %679 = vmatprep.mubr.f32.mxu0 %v7001_v7 }
  0x28   :  { %756 = vmatprep.mubr.f32.mxu1 %v7001_v7  ;;  %6134 = vmatprep.subr.msk.bf16.mxu0 %vm7082_vm2, %v7190_v42  ;;  %v7433_v42 = vld [vmem:[%s9426_s1 + $0x1c8] sm:$0xff] }
  0x29   :  { %5380 = vmatmul.mubr.msk.f32.gmra.mrb[6].mxu0 %vm62_vm3, %v5352_v30  ;;  %6144 = vmatprep.subr.msk.bf16.mxu1 %vm7082_vm2, %v7211_v47  ;;  %v7447_v47 = vld [vmem:[%s9426_s1 + $0x1d8] sm:$0xff]  ;;  %v7469_v55 = vpack.c.bf16 %v5408_v45, %v7433_v42 }
  0x2a   :  { %5384 = vmatmul.mubr.msk.f32.gmra.mrb[6].mxu1 %vm62_vm3, %v5352_v30  ;;  %6137 = vmatpush1.bf16.msk.msra.mxu0 %vm7082_vm2, %v7225_v50  ;;  %v7461_v50 = vld [vmem:[%s9426_s1 + $0x1c0] sm:$0xff]  ;;  %v7483_v57 = vpack.c.bf16 %v5410_v51, %v7447_v47 }
  0x2b   :  { %6147 = vmatpush1.bf16.msk.msra.mxu1 %vm7082_vm2, %v7239_v54  ;;  %827 = vmatprep.mubr.f32.mxu0 %v7001_v7  ;;  %v7474_v54 = vld [vmem:[%s9426_s1 + $0x1d0] sm:$0xff]  ;;  %v7489_v59 = vpack.c.bf16 %v5407_v53, %v7461_v50 }
  0x2c   :  { %904 = vmatprep.mubr.f32.mxu1 %v7001_v7  ;;  %6149 = vmatprep.subr.bf16.mxu0 %v7416_v36 }
  0x2d   :  { %5387 = vmatmul.mubr.msk.f32.vlgmr.msra.gmra.mrb[4].mxu0 %vm62_vm3, %v7157_v33  ;;  %6159 = vmatprep.subr.bf16.mxu1 %v7428_v43 }
  0x2e   :  { %5391 = vmatmul.mubr.msk.f32.vlgmr.msra.gmra.mrb[4].mxu1 %vm62_vm3, %v7157_v33  ;;  %6151 = vmatpush1.bf16.msra.mxu0 %v7442_v49 }
  0x2f   :  { %10 = vsyncpa [#allocation4], 0  ;;  %6161 = vmatpush1.bf16.msra.mxu1 %v7456_v52  ;;  %833 = vmatprep.mubr.f32.mxu0 %v7001_v7  ;;  %v7494_v60 = vpack.c.bf16 %v5409_v56, %v7474_v54  ;;  %v5393_v33 = vld [vmem:[%s9425_s0 + $0x3] ss:$2 sm:$0xff]  ;;  %v5432_v4 = vld [vmem:[%s9426_s1 + $0x218] sm:$0xff]  ;;  %vm5282_vm5 = vcmask 74752  }
  0x30   :  { %910 = vmatprep.mubr.f32.mxu1 %v7001_v7  ;;  %6154 = vmatprep.subr.msk.bf16.mxu0 %vm7082_vm2, %v7469_v55  ;;  %v5434_v63 = vld [vmem:[%s9426_s1 + $0x228] sm:$0xff]  ;;  %v5394_v0 = vld [vmem:[%s9425_s0 + $0x13] ss:$2 sm:$0xf]  ;;  %v5429_v18 = vld [vmem:[%s9426_s1 + $0x200] sm:$0xff]  ;;  %vm5295_vm6 = vcmask 73728  }
  0x31   :  { %5388 = vmatmul.mubr.msk.f32.gmra.mrb[6].mxu0 %vm62_vm3, %v7208_v46  ;;  %6164 = vmatprep.subr.msk.bf16.mxu1 %vm7082_vm2, %v7483_v57  ;;  %v5436_v10 = vld [vmem:[%s9426_s1 + $0x238] sm:$0xff]  ;;  %v5433_v24 = vld [vmem:[%s9426_s1 + $0x220] sm:$0xff]  ;;  %v5431_v30 = vld [vmem:[%s9426_s1 + $0x210] sm:$0xff]  ;;  %vm5298_vm7 = vcmask 74753  }
  0x32   :  { %5392 = vmatmul.mubr.msk.f32.gmra.mrb[6].mxu1 %vm62_vm3, %v7208_v46  ;;  %6157 = vmatpush1.bf16.msk.msra.mxu0 %vm7082_vm2, %v7489_v59  ;;  %v5430_v46 = vld [vmem:[%s9426_s1 + $0x208] sm:$0xff]  ;;  %v5435_v17 = vld [vmem:[%s9426_s1 + $0x230] sm:$0xff]  ;;  %v7562_v21 = vpack.c.bf16 %v5436_v10, %v5432_v4  ;;  %v7576_v25 = vpack.c.bf16 %v5433_v24, %v5429_v18  ;;  %v5444_v31 = vld [vmem:[%s9426_s1 + $0x278] sm:$0xf] }
  0x33   :  { %6167 = vmatpush1.bf16.msk.msra.mxu1 %vm7082_vm2, %v7494_v60  ;;  %1020 = vmatprep.mubr.f32.mxu0 %v7001_v7  ;;  %v7550_v28 = vpack.c.bf16 %v5434_v63, %v5430_v46  ;;  %v5442_v22 = vld [vmem:[%s9426_s1 + $0x268] sm:$0xf]  ;;  %v7590_v32 = vpack.c.bf16 %v5435_v17, %v5431_v30  ;;  %v5441_v37 = vld [vmem:[%s9426_s1 + $0x260] sm:$0xf]  ;;  %v5443_v45 = vld [vmem:[%s9426_s1 + $0x270] sm:$0xf] }
  0x34   :  { %1097 = vmatprep.mubr.f32.mxu1 %v7001_v7  ;;  %6169 = vmatprep.subr.bf16.mxu0 %v7254_v58  ;;  %v5428_v46 = vld [vmem:[%s9425_s0 + $0x14] ss:$2 sm:$0xf]  ;;  %v1998_v24 = vld [vmem:[%s9426_s1 + $0x60] sm:$0xf] }
  0x35   :  { %5413 = vmatmul.mubr.msk.f32.vlgmr.msra.gmra.mrb[0].mxu0 %vm62_vm3, %v5393_v33  ;;  %6179 = vmatprep.subr.bf16.mxu1 %v7267_v61  ;;  %v2000_v17 = vld [vmem:[%s9426_s1 + $0x70] sm:$0xf]  ;;  %v3935_v15 = vld [vmem:[%s9428_s3 + $0x80] sm:$0xff] }
  0x36   :  { %5417 = vmatmul.mubr.msk.f32.vlgmr.msra.gmra.mrb[0].mxu1 %vm62_vm3, %v5393_v33  ;;  %6171 = vmatpush1.bf16.msra.mxu0 %v7285_v1 }
  0x37   :  { %6181 = vmatpush1.bf16.msra.mxu1 %v7299_v5  ;;  %1026 = vmatprep.mubr.f32.mxu0 %v7001_v7 }
  0x38   :  { %1103 = vmatprep.mubr.f32.mxu1 %v7001_v7  ;;  %6174 = vmatprep.subr.msk.bf16.mxu0 %vm7082_vm2, %v7312_v11  ;;  %v7567_v11 = vld [vmem:[%s9426_s1 + $0x248] sm:$0xff] }
  0x39   :  { %5414 = vmatmul.mubr.msk.f32.gmra.mrb[2].mxu0 %vm62_vm3, %v5394_v0  ;;  %6184 = vmatprep.subr.msk.bf16.mxu1 %vm7082_vm2, %v7325_v20  ;;  %v7581_v20 = vld [vmem:[%s9426_s1 + $0x258] sm:$0xff]  ;;  %v6192_v40 = vpack.c.bf16 %v5442_v22, %v7567_v11 }
  0x3a   :  { %5418 = vmatmul.mubr.msk.f32.gmra.mrb[2].mxu1 %vm62_vm3, %v5394_v0  ;;  %6177 = vmatpush1.bf16.msk.msra.mxu0 %vm7082_vm2, %v7333_v26  ;;  %v7595_v26 = vld [vmem:[%s9426_s1 + $0x240] sm:$0xff]  ;;  %v6202_v51 = vpack.c.bf16 %v5444_v31, %v7581_v20  ;;  %v7773_v31 = vpack.c.bf16 %v1998_v24, %v7198_v44  ;;  %v5522_v44 = vld [vmem:[%s9426_s1 + $0x168] sm:$0xf] }
  0x3b   :  { %6187 = vmatpush1.bf16.msk.msra.mxu1 %vm7082_vm2, %v7338_v27  ;;  %1182 = vmatprep.mubr.f32.mxu0 %v7001_v7  ;;  %v7606_v27 = vld [vmem:[%s9426_s1 + $0x250] sm:$0xff]  ;;  %v6195_v53 = vpack.c.bf16 %v5441_v37, %v7595_v26  ;;  %v5524_v37 = vld [vmem:[%s9426_s1 + $0x178] sm:$0xf] }
  0x3c   :  { %1259 = vmatprep.mubr.f32.mxu1 %v7001_v7  ;;  %6189 = vmatprep.subr.bf16.mxu0 %v7550_v28  ;;  %v6205_v56 = vpack.c.bf16 %v5443_v45, %v7606_v27  ;;  %v7813_v45 = vpack.c.bf16 %v5522_v44, %v7272_v62  ;;  %v5472_v62 = vld [vmem:[%s9425_s0 + $0x30] ss:$2 sm:$0xf]  ;;  %v3971_v44 = vld [vmem:[%s9428_s3 + $0x1a0] sm:$0xff] }
  0x3d   :  { %5421 = vmatmul.mubr.msk.f32.vlgmr.msra.gmra.mrb[4].mxu0 %vm62_vm3, %v5393_v33  ;;  %6199 = vmatprep.subr.bf16.mxu1 %v7562_v21 }
  0x3e   :  { %5425 = vmatmul.mubr.msk.f32.vlgmr.msra.gmra.mrb[4].mxu1 %vm62_vm3, %v5393_v33  ;;  %6191 = vmatpush1.bf16.msra.mxu0 %v7576_v25  ;;  %v5427_v33 = vld [vmem:[%s9425_s0 + $0x4] ss:$2 sm:$0xff] }
  0x3f   :  { %6201 = vmatpush1.bf16.msra.mxu1 %v7590_v32  ;;  %1188 = vmatprep.mubr.f32.mxu0 %v7001_v7 }
  0x40   :  { %1265 = vmatprep.mubr.f32.mxu1 %v7001_v7  ;;  %6194 = vmatprep.subr.msk.bf16.mxu0 %vm7082_vm2, %v6192_v40 }
  0x41   :  { %5422 = vmatmul.mubr.msk.f32.gmra.mrb[6].mxu0 %vm62_vm3, %v5394_v0  ;;  %6204 = vmatprep.subr.msk.bf16.mxu1 %vm7082_vm2, %v6202_v51 }
  0x42   :  { %5426 = vmatmul.mubr.msk.f32.gmra.mrb[6].mxu1 %vm62_vm3, %v5394_v0  ;;  %6197 = vmatpush1.bf16.msk.msra.mxu0 %vm7082_vm2, %v6195_v53  ;;  %v5489_v0 = vld [vmem:[%s9426_s1 + $0xf0] sm:$0xf] }
  0x43   :  { %6207 = vmatpush1.bf16.msk.msra.mxu1 %vm7082_vm2, %v6205_v56  ;;  %1383 = vmatprep.mubr.f32.mxu0 %v7001_v7  ;;  %v7718_v18 = vpack.c.bf16 %v5489_v0, %v7117_v23  ;;  %v2001_v23 = vld [vmem:[%s9426_s1 + $0x78] sm:$0xf]  ;;  %v3921_v0 = vld [vmem:[%s9428_s3 + $0x10] sm:$0xff] }
  0x44   :  { %1460 = vmatprep.mubr.f32.mxu1 %v7001_v7  ;;  %6209 = vmatprep.subr.bf16.mxu0 %v7416_v36  ;;  %v7762_v22 = vpack.c.bf16 %v2001_v23, %v7186_v41  ;;  %v7778_v41 = vpack.c.bf16 %v2000_v17, %v7216_v48  ;;  %v5471_v48 = vld [vmem:[%s9425_s0 + $0x20] ss:$2 sm:$0xff]  ;;  %v3954_v23 = vld [vmem:[%s9428_s3 + $0x118] sm:$0xff] }
  0x45   :  { %5447 = vmatmul.mubr.msk.f32.vlgmr.msra.gmra.mrb[0].mxu0 %vm62_vm3, %v5427_v33  ;;  %6219 = vmatprep.subr.bf16.mxu1 %v7428_v43  ;;  %v3940_v17 = vld [vmem:[%s9428_s3 + $0xa8] sm:$0xff] }
  0x46   :  { %5451 = vmatmul.mubr.msk.f32.vlgmr.msra.gmra.mrb[0].mxu1 %vm62_vm3, %v5427_v33  ;;  %6211 = vmatpush1.bf16.msra.mxu0 %v7442_v49 }
  0x47   :  { %6221 = vmatpush1.bf16.msra.mxu1 %v7456_v52  ;;  %1389 = vmatprep.mubr.f32.mxu0 %v7001_v7 }
  0x48   :  { %1466 = vmatprep.mubr.f32.mxu1 %v7001_v7  ;;  %6214 = vmatprep.subr.msk.bf16.mxu0 %vm7082_vm2, %v7469_v55  ;;  %v5488_v55 = vld [vmem:[%s9426_s1 + $0xe8] sm:$0xf] }
  0x49   :  { %5448 = vmatmul.mubr.msk.f32.gmra.mrb[2].mxu0 %vm62_vm3, %v5428_v46  ;;  %6224 = vmatprep.subr.msk.bf16.mxu1 %vm7082_vm2, %v7483_v57  ;;  %v5461_v57 = vld [vmem:[%s9425_s0 + $0x5] ss:$2 sm:$0xff]  ;;  %v7697_v63 = vpack.c.bf16 %v5488_v55, %v7073_v12  ;;  %v5462_v12 = vld [vmem:[%s9425_s0 + $0x15] ss:$2 sm:$0xf] }
  0x4a   :  { %5452 = vmatmul.mubr.msk.f32.gmra.mrb[2].mxu1 %vm62_vm3, %v5428_v46  ;;  %6217 = vmatpush1.bf16.msk.msra.mxu0 %vm7082_vm2, %v7489_v59  ;;  %v5490_v59 = vld [vmem:[%s9426_s1 + $0xf8] sm:$0xf]  ;;  %v3952_v55 = vld [vmem:[%s9428_s3 + $0x108] sm:$0xff] }
  0x4b   :  { %6227 = vmatpush1.bf16.msk.msra.mxu1 %vm7082_vm2, %v7494_v60  ;;  %1545 = vmatprep.mubr.f32.mxu0 %v7001_v7  ;;  %v5487_v60 = vld [vmem:[%s9426_s1 + $0xe0] sm:$0xf]  ;;  %v7705_v4 = vpack.c.bf16 %v5490_v59, %v7089_v16  ;;  %v1999_v16 = vld [vmem:[%s9426_s1 + $0x68] sm:$0xf]  ;;  %v3937_v59 = vld [vmem:[%s9428_s3 + $0x90] sm:$0xff] }
  0x4c   :  { %1622 = vmatprep.mubr.f32.mxu1 %v7001_v7  ;;  %6229 = vmatprep.subr.bf16.mxu0 %v7550_v28  ;;  %v7713_v10 = vpack.c.bf16 %v5487_v60, %v7102_v19  ;;  %v7738_v19 = vld [vmem:[%s9425_s0 + $0x21] ss:$2 sm:$0xff]  ;;  %v7753_v30 = vpack.c.bf16 %v1999_v16, %v7178_v39  ;;  %v7770_v39 = vld [vmem:[%s9425_s0 + $0x31] ss:$2 sm:$0xf]  ;;  %v3938_v60 = vld [vmem:[%s9428_s3 + $0x98] sm:$0xff] }
  0x4d   :  { %5455 = vmatmul.mubr.msk.f32.vlgmr.msra.gmra.mrb[4].mxu0 %vm62_vm3, %v5427_v33  ;;  %6239 = vmatprep.subr.bf16.mxu1 %v7562_v21 }
  0x4e   :  { %5459 = vmatmul.mubr.msk.f32.vlgmr.msra.gmra.mrb[4].mxu1 %vm62_vm3, %v5427_v33  ;;  %6231 = vmatpush1.bf16.msra.mxu0 %v7576_v25 }
  0x4f   :  { %6241 = vmatpush1.bf16.msra.mxu1 %v7590_v32  ;;  %1551 = vmatprep.mubr.f32.mxu0 %v7001_v7 }
  0x50   :  { %1628 = vmatprep.mubr.f32.mxu1 %v7001_v7  ;;  %6234 = vmatprep.subr.msk.bf16.mxu0 %vm7082_vm2, %v6192_v40  ;;  %v5521_v40 = vld [vmem:[%s9426_s1 + $0x160] sm:$0xf] }
  0x51   :  { %5456 = vmatmul.mubr.msk.f32.gmra.mrb[6].mxu0 %vm62_vm3, %v5428_v46  ;;  %6244 = vmatprep.subr.msk.bf16.mxu1 %vm7082_vm2, %v6202_v51  ;;  %v5523_v51 = vld [vmem:[%s9426_s1 + $0x170] sm:$0xf] }
  0x52   :  { %5460 = vmatmul.mubr.msk.f32.gmra.mrb[6].mxu1 %vm62_vm3, %v5428_v46  ;;  %6237 = vmatpush1.bf16.msk.msra.mxu0 %vm7082_vm2, %v6195_v53  ;;  %v7821_v53 = vpack.c.bf16 %v5524_v37, %v7290_v2  ;;  %v7834_v33 = vpack.c.bf16 %v5523_v51, %v7317_v14  ;;  %v5507_v2 = vld [vmem:[%s9425_s0 + $0x22] ss:$2 sm:$0xff]  ;;  %v5549_v14 = vld [vmem:[%s9425_s0 + $0x23] ss:$2 sm:$0xff] }
  0x53   :  { %6247 = vmatpush1.bf16.msk.msra.mxu1 %vm7082_vm2, %v6205_v56  ;;  %1717 = vmatprep.mubr.f32.mxu0 %v7001_v7  ;;  %v7829_v56 = vpack.c.bf16 %v5521_v40, %v7304_v6  ;;  %v5508_v6 = vld [vmem:[%s9425_s0 + $0x32] ss:$2 sm:$0xf]  ;;  %v3951_v46 = vld [vmem:[%s9428_s3 + $0x100] sm:$0xff] }
  0x54   :  { %1794 = vmatprep.mubr.f32.mxu1 %v7001_v7  ;;  %6249 = vmatprep.subr.bf16.mxu0 %v7047_v3  ;;  %v3955_v40 = vld [vmem:[%s9428_s3 + $0x120] sm:$0xff] }
  0x55   :  { %5465 = vmatmul.mubr.msk.f32.vlgmr.msra.gmra.mrb[4].mxu0 %vm62_vm3, %v5461_v57  ;;  %6259 = vmatprep.subr.bf16.mxu1 %v7060_v8 }
  0x56   :  { %5469 = vmatmul.mubr.msk.f32.vlgmr.msra.gmra.mrb[4].mxu1 %vm62_vm3, %v5461_v57  ;;  %6251 = vmatpush1.bf16.msra.mxu0 %v7062_v9  ;;  %v6482_v57 = vpack.c.bf16 %v3952_v55, %v3951_v46  ;;  %v3948_v46 = vld [vmem:[%s9428_s3 + $0xe8] sm:$0xff] }
  0x57   :  { %6261 = vmatpush1.bf16.msra.mxu1 %v7076_v13  ;;  %1723 = vmatprep.mubr.f32.mxu0 %v7001_v7 }
  0x58   :  { %1800 = vmatprep.mubr.f32.mxu1 %v7001_v7  ;;  %6254 = vmatprep.subr.msk.bf16.mxu0 %vm7082_vm2, %v7697_v63 }
  0x59   :  { %5466 = vmatmul.mubr.msk.f32.gmra.mrb[6].mxu0 %vm62_vm3, %v5462_v12  ;;  %6264 = vmatprep.subr.msk.bf16.mxu1 %vm7082_vm2, %v7705_v4 }
  0x5a   :  { %5470 = vmatmul.mubr.msk.f32.gmra.mrb[6].mxu1 %vm62_vm3, %v5462_v12  ;;  %6257 = vmatpush1.bf16.msk.msra.mxu0 %vm7082_vm2, %v7713_v10 }
  0x5b   :  { %6267 = vmatpush1.bf16.msk.msra.mxu1 %vm7082_vm2, %v7718_v18  ;;  %2104 = vmatprep.mubr.f32.mxu0 %v7001_v7 }
  0x5c   :  { %2181 = vmatprep.mubr.f32.mxu1 %v7001_v7  ;;  %6269 = vmatprep.subr.bf16.mxu0 %v7140_v29 }
  0x5d   :  { %5493 = vmatmul.mubr.msk.f32.vlgmr.msra.gmra.mrb[8].mxu0 %vm62_vm3, %v7738_v19  ;;  %6279 = vmatprep.subr.bf16.mxu1 %v7159_v34 }
  0x5e   :  { %5497 = vmatmul.mubr.msk.f32.vlgmr.msra.gmra.mrb[8].mxu1 %vm62_vm3, %v7738_v19  ;;  %6271 = vmatpush1.bf16.msra.mxu0 %v7161_v35 }
  0x5f   :  { %6281 = vmatpush1.bf16.msra.mxu1 %v7173_v38  ;;  %2110 = vmatprep.mubr.f32.mxu0 %v7001_v7 }
  0x60   :  { %2187 = vmatprep.mubr.f32.mxu1 %v7001_v7  ;;  %6274 = vmatprep.subr.msk.bf16.mxu0 %vm7082_vm2, %v7753_v30 }
  0x61   :  { %5494 = vmatmul.mubr.msk.f32.gmra.mrb[10].mxu0 %vm62_vm3, %v7770_v39  ;;  %6284 = vmatprep.subr.msk.bf16.mxu1 %vm7082_vm2, %v7762_v22 }
  0x62   :  { %5498 = vmatmul.mubr.msk.f32.gmra.mrb[10].mxu1 %vm62_vm3, %v7770_v39  ;;  %6277 = vmatpush1.bf16.msk.msra.mxu0 %vm7082_vm2, %v7773_v31 }
  0x63   :  { %6287 = vmatpush1.bf16.msk.msra.mxu1 %vm7082_vm2, %v7778_v41  ;;  %2276 = vmatprep.mubr.f32.mxu0 %v7001_v7 }
  0x64   :  { %2353 = vmatprep.mubr.f32.mxu1 %v7001_v7  ;;  %6289 = vmatprep.subr.bf16.mxu0 %v7254_v58 }
  0x65   :  { %5501 = vmatmul.mubr.msk.f32.vlgmr.msra.gmra.mrb[8].mxu0 %vm62_vm3, %v5471_v48  ;;  %6299 = vmatprep.subr.bf16.mxu1 %v7267_v61 }
  0x66   :  { %5505 = vmatmul.mubr.msk.f32.vlgmr.msra.gmra.mrb[8].mxu1 %vm62_vm3, %v5471_v48  ;;  %6291 = vmatpush1.bf16.msra.mxu0 %v7285_v1  ;;  %v3972_v48 = vld [vmem:[%s9428_s3 + $0x1a8] sm:$0xff] }
  0x67   :  { %6301 = vmatpush1.bf16.msra.mxu1 %v7299_v5  ;;  %2282 = vmatprep.mubr.f32.mxu0 %v7001_v7  ;;  %v6488_v37 = vpack.c.bf16 %v3972_v48, %v3971_v44 }
  0x68   :  { %2359 = vmatprep.mubr.f32.mxu1 %v7001_v7  ;;  %6294 = vmatprep.subr.msk.bf16.mxu0 %vm7082_vm2, %v7813_v45 }
  0x69   :  { %5502 = vmatmul.mubr.msk.f32.gmra.mrb[10].mxu0 %vm62_vm3, %v5472_v62  ;;  %6304 = vmatprep.subr.msk.bf16.mxu1 %vm7082_vm2, %v7821_v53 }
  0x6a   :  { %5506 = vmatmul.mubr.msk.f32.gmra.mrb[10].mxu1 %vm62_vm3, %v5472_v62  ;;  %6297 = vmatpush1.bf16.msk.msra.mxu0 %vm7082_vm2, %v7829_v56  ;;  %v3942_v62 = vld [vmem:[%s9428_s3 + $0xb8] sm:$0xff] }
  0x6b   :  { %6307 = vmatpush1.bf16.msk.msra.mxu1 %vm7082_vm2, %v7834_v33  ;;  %2468 = vmatprep.mubr.f32.mxu0 %v7001_v7 }
  0x6c   :  { %2545 = vmatprep.mubr.f32.mxu1 %v7001_v7  ;;  %6309 = vmatprep.subr.bf16.mxu0 %v7047_v3  ;;  %v5564_v3 = vld [vmem:[%s9426_s1 + $0x1e8] sm:$0xf] }
  0x6d   :  { %5527 = vmatmul.mubr.msk.f32.vlgmr.msra.gmra.mrb[8].mxu0 %vm62_vm3, %v5507_v2  ;;  %6319 = vmatprep.subr.bf16.mxu1 %v7060_v8  ;;  %v5566_v8 = vld [vmem:[%s9426_s1 + $0x1f8] sm:$0xf] }
  0x6e   :  { %5531 = vmatmul.mubr.msk.f32.vlgmr.msra.gmra.mrb[8].mxu1 %vm62_vm3, %v5507_v2  ;;  %6311 = vmatpush1.bf16.msra.mxu0 %v7062_v9  ;;  %v5563_v9 = vld [vmem:[%s9426_s1 + $0x1e0] sm:$0xf] }
  0x6f   :  { %6321 = vmatpush1.bf16.msra.mxu1 %v7076_v13  ;;  %2474 = vmatprep.mubr.f32.mxu0 %v7001_v7  ;;  %v7918_v13 = vpack.c.bf16 %v5564_v3, %v7433_v42  ;;  %v5550_v42 = vld [vmem:[%s9425_s0 + $0x33] ss:$2 sm:$0xf] }
  0x70   :  { %2551 = vmatprep.mubr.f32.mxu1 %v7001_v7  ;;  %6314 = vmatprep.subr.msk.bf16.mxu0 %vm7082_vm2, %v7697_v63  ;;  %v6452_v63 = vpack.c.bf16 %v3938_v60, %v3937_v59  ;;  %v3973_v3 = vld [vmem:[%s9428_s3 + $0x1b0] sm:$0xff]  ;;  %v3932_v59 = vld [vmem:[%s9428_s3 + $0x68] sm:$0xff] }
  0x71   :  { %5528 = vmatmul.mubr.msk.f32.gmra.mrb[10].mxu0 %vm62_vm3, %v5508_v6  ;;  %6324 = vmatprep.subr.msk.bf16.mxu1 %vm7082_vm2, %v7705_v4  ;;  %v3922_v4 = vld [vmem:[%s9428_s3 + $0x18] sm:$0xff] }
  0x72   :  { %5532 = vmatmul.mubr.msk.f32.gmra.mrb[10].mxu1 %vm62_vm3, %v5508_v6  ;;  %6317 = vmatpush1.bf16.msk.msra.mxu0 %vm7082_vm2, %v7713_v10  ;;  %v6454_v12 = vpack.c.bf16 %v3922_v4, %v3921_v0  ;;  %v3969_v10 = vld [vmem:[%s9428_s3 + $0x190] sm:$0xff]  ;;  %v3980_v0 = vld [vmem:[%s9428_s3 + $0x1e8] sm:$0xff] }
  0x73   :  { %6327 = vmatpush1.bf16.msk.msra.mxu1 %vm7082_vm2, %v7718_v18  ;;  %2630 = vmatprep.mubr.f32.mxu0 %v7001_v7  ;;  %v3970_v18 = vld [vmem:[%s9428_s3 + $0x198] sm:$0xff] }
  0x74   :  { %2707 = vmatprep.mubr.f32.mxu1 %v7001_v7  ;;  %6329 = vmatprep.subr.bf16.mxu0 %v7140_v29  ;;  %v5565_v29 = vld [vmem:[%s9426_s1 + $0x1f0] sm:$0xf]  ;;  %v6484_v16 = vpack.c.bf16 %v3970_v18, %v3969_v10  ;;  %v3964_v10 = vld [vmem:[%s9428_s3 + $0x168] sm:$0xff] }
  0x75   :  { %5535 = vmatmul.mubr.msk.f32.vlgmr.msra.gmra.mrb[12].mxu0 %vm62_vm3, %v5507_v2  ;;  %6339 = vmatprep.subr.bf16.mxu1 %v7159_v34  ;;  %v7927_v34 = vpack.c.bf16 %v5566_v8, %v7447_v47  ;;  %v5599_v47 = vld [vmem:[%s9426_s1 + $0x270] sm:$0xf]  ;;  %v3974_v8 = vld [vmem:[%s9428_s3 + $0x1b8] sm:$0xff] }
  0x76   :  { %5539 = vmatmul.mubr.msk.f32.vlgmr.msra.gmra.mrb[12].mxu1 %vm62_vm3, %v5507_v2  ;;  %6331 = vmatpush1.bf16.msra.mxu0 %v7161_v35  ;;  %v7933_v35 = vpack.c.bf16 %v5563_v9, %v7461_v50  ;;  %v3926_v2 = vld [vmem:[%s9428_s3 + $0x38] sm:$0xff]  ;;  %v6492_v9 = vpack.c.bf16 %v3974_v8, %v3973_v3  ;;  %v1824_v3 = vlaneseq }
  0x77   :  { %6341 = vmatpush1.bf16.msra.mxu1 %v7173_v38  ;;  %2636 = vmatprep.mubr.f32.mxu0 %v7001_v7  ;;  %v7938_v38 = vpack.c.bf16 %v5565_v29, %v7474_v54  ;;  %v3958_v29 = vld [vmem:[%s9428_s3 + $0x138] sm:$0xff] }
  0x78   :  { %2713 = vmatprep.mubr.f32.mxu1 %v7001_v7  ;;  %6334 = vmatprep.subr.msk.bf16.mxu0 %vm7082_vm2, %v7753_v30  ;;  %v3939_v30 = vld [vmem:[%s9428_s3 + $0xa0] sm:$0xff]  ;;  %vm8321_vm4 = vcmp.lt.s32.totalorder %v1824_v3, 256 }
  0x79   :  { %5536 = vmatmul.mubr.msk.f32.gmra.mrb[14].mxu0 %vm62_vm3, %v5508_v6  ;;  %6344 = vmatprep.subr.msk.bf16.mxu1 %vm7082_vm2, %v7762_v22  ;;  %v6456_v22 = vpack.c.bf16 %v3940_v17, %v3939_v30  ;;  %v3934_v30 = vld [vmem:[%s9428_s3 + $0x78] sm:$0xff]  ;;  %v3981_v17 = vld [vmem:[%s9428_s3 + $0x1f0] sm:$0xff] }
  0x7a   :  { %5540 = vmatmul.mubr.msk.f32.gmra.mrb[14].mxu1 %vm62_vm3, %v5508_v6  ;;  %6337 = vmatpush1.bf16.msk.msra.mxu0 %vm7082_vm2, %v7773_v31  ;;  %v3924_v31 = vld [vmem:[%s9428_s3 + $0x28] sm:$0xff] }
  0x7b   :  { %6347 = vmatpush1.bf16.msk.msra.mxu1 %vm7082_vm2, %v7778_v41  ;;  %2784 = vmatprep.mubr.f32.mxu0 %v7001_v7 }
  0x7c   :  { %2861 = vmatprep.mubr.f32.mxu1 %v7001_v7  ;;  %6349 = vmatprep.subr.bf16.mxu0 %v7416_v36 }
  0x7d   :  { %5543 = vmatmul.mubr.msk.f32.vlgmr.msra.gmra.mrb[12].mxu0 %vm62_vm3, %v7738_v19  ;;  %6359 = vmatprep.subr.bf16.mxu1 %v7428_v43 }
  0x7e   :  { %5547 = vmatmul.mubr.msk.f32.vlgmr.msra.gmra.mrb[12].mxu1 %vm62_vm3, %v7738_v19  ;;  %6351 = vmatpush1.bf16.msra.mxu0 %v7442_v49  ;;  %v3953_v19 = vld [vmem:[%s9428_s3 + $0x110] sm:$0xff] }
  0x7f   :  { %6361 = vmatpush1.bf16.msra.mxu1 %v7456_v52  ;;  %2790 = vmatprep.mubr.f32.mxu0 %v7001_v7  ;;  %v6486_v24 = vpack.c.bf16 %v3954_v23, %v3953_v19  ;;  %v3950_v19 = vld [vmem:[%s9428_s3 + $0xf8] sm:$0xff] }
  0x80   :  { %2867 = vmatprep.mubr.f32.mxu1 %v7001_v7  ;;  %6354 = vmatprep.subr.msk.bf16.mxu0 %vm7082_vm2, %v7918_v13 }
  0x81   :  { %5544 = vmatmul.mubr.msk.f32.gmra.mrb[14].mxu0 %vm62_vm3, %v7770_v39  ;;  %6364 = vmatprep.subr.msk.bf16.mxu1 %vm7082_vm2, %v7927_v34 }
  0x82   :  { %5548 = vmatmul.mubr.msk.f32.gmra.mrb[14].mxu1 %vm62_vm3, %v7770_v39  ;;  %6357 = vmatpush1.bf16.msk.msra.mxu0 %vm7082_vm2, %v7933_v35  ;;  %v3923_v39 = vld [vmem:[%s9428_s3 + $0x20] sm:$0xff] }
  0x83   :  { %6367 = vmatpush1.bf16.msk.msra.mxu1 %vm7082_vm2, %v7938_v38  ;;  %2976 = vmatprep.mubr.f32.mxu0 %v7001_v7  ;;  %v6458_v41 = vpack.c.bf16 %v3924_v31, %v3923_v39  ;;  %v3982_v39 = vld [vmem:[%s9428_s3 + $0x1f8] sm:$0xff]  ;;  %v3965_v31 = vld [vmem:[%s9428_s3 + $0x170] sm:$0xff] }
  0x84   :  { %3053 = vmatprep.mubr.f32.mxu1 %v7001_v7  ;;  %6369 = vmatprep.subr.bf16.mxu0 %v7254_v58  ;;  %v5598_v58 = vld [vmem:[%s9426_s1 + $0x268] sm:$0xf]  ;;  %v6508_v44 = vpack.c.bf16 %v3982_v39, %v3981_v17 }
  0x85   :  { %5569 = vmatmul.mubr.msk.f32.vlgmr.msra.gmra.mrb[8].mxu0 %vm62_vm3, %v5549_v14  ;;  %6379 = vmatprep.subr.bf16.mxu1 %v7267_v61  ;;  %v5600_v61 = vld [vmem:[%s9426_s1 + $0x278] sm:$0xf] }
  0x86   :  { %5573 = vmatmul.mubr.msk.f32.vlgmr.msra.gmra.mrb[8].mxu1 %vm62_vm3, %v5549_v14  ;;  %6371 = vmatpush1.bf16.msra.mxu0 %v7285_v1  ;;  %v5597_v1 = vld [vmem:[%s9426_s1 + $0x260] sm:$0xf]  ;;  %v6402_v50 = vpack.c.bf16 %v5600_v61, %v7581_v20  ;;  %v5583_v20 = vld [vmem:[%s9425_s0 + $0x24] ss:$2 sm:$0xff] }
  0x87   :  { %6381 = vmatpush1.bf16.msra.mxu1 %v7299_v5  ;;  %2982 = vmatprep.mubr.f32.mxu0 %v7001_v7  ;;  %v6392_v5 = vpack.c.bf16 %v5598_v58, %v7567_v11  ;;  %v6395_v54 = vpack.c.bf16 %v5597_v1, %v7595_v26  ;;  %v6405_v11 = vpack.c.bf16 %v5599_v47, %v7606_v27  ;;  %v5584_v26 = vld [vmem:[%s9425_s0 + $0x34] ss:$2 sm:$0xf]  ;;  %v3928_v58 = vld [vmem:[%s9428_s3 + $0x48] sm:$0xff]  ;;  %v3975_v1 = vld [vmem:[%s9428_s3 + $0x1c0] sm:$0xff] }
  0x88   :  { %3059 = vmatprep.mubr.f32.mxu1 %v7001_v7  ;;  %6374 = vmatprep.subr.msk.bf16.mxu0 %vm7082_vm2, %v7813_v45  ;;  %v3956_v45 = vld [vmem:[%s9428_s3 + $0x128] sm:$0xff] }
  0x89   :  { %5570 = vmatmul.mubr.msk.f32.gmra.mrb[10].mxu0 %vm62_vm3, %v5550_v42  ;;  %6384 = vmatprep.subr.msk.bf16.mxu1 %vm7082_vm2, %v7821_v53  ;;  %v6490_v51 = vpack.c.bf16 %v3956_v45, %v3955_v40  ;;  %v3941_v53 = vld [vmem:[%s9428_s3 + $0xb0] sm:$0xff]  ;;  %v4000_v40 = vld [vmem:[%s9428_s3 + $0x288] sm:$0xff] }
  0x8a   :  { %5574 = vmatmul.mubr.msk.f32.gmra.mrb[10].mxu1 %vm62_vm3, %v5550_v42  ;;  %6377 = vmatpush1.bf16.msk.msra.mxu0 %vm7082_vm2, %v7829_v56  ;;  %v6460_v56 = vpack.c.bf16 %v3942_v62, %v3941_v53  ;;  %v4032_v53 = vld [vmem:[%s9428_s3 + $0x388] sm:$0xff] }
  0x8b   :  { %6387 = vmatpush1.bf16.msk.msra.mxu1 %vm7082_vm2, %v7834_v33  ;;  %3138 = vmatprep.mubr.f32.mxu0 %v7001_v7  ;;  %v3925_v33 = vld [vmem:[%s9428_s3 + $0x30] sm:$0xff] }
  0x8c   :  { %3215 = vmatprep.mubr.f32.mxu1 %v7001_v7  ;;  %6389 = vmatprep.subr.bf16.mxu0 %v7550_v28  ;;  %v6462_v6 = vpack.c.bf16 %v3926_v2, %v3925_v33 }
  0x8d   :  { %5577 = vmatmul.mubr.msk.f32.vlgmr.msra.gmra.mrb[12].mxu0 %vm62_vm3, %v5549_v14  ;;  %6399 = vmatprep.subr.bf16.mxu1 %v7562_v21 }
  0x8e   :  { %5581 = vmatmul.mubr.msk.f32.vlgmr.msra.gmra.mrb[12].mxu1 %vm62_vm3, %v5549_v14  ;;  %6391 = vmatpush1.bf16.msra.mxu0 %v7576_v25 }
  0x8f   :  { %6401 = vmatpush1.bf16.msra.mxu1 %v7590_v32  ;;  %3144 = vmatprep.mubr.f32.mxu0 %v7001_v7 }
  0x90   :  { %3221 = vmatprep.mubr.f32.mxu1 %v7001_v7  ;;  %6394 = vmatprep.subr.msk.bf16.mxu0 %vm7082_vm2, %v6392_v5 }
  0x91   :  { %5578 = vmatmul.mubr.msk.f32.gmra.mrb[14].mxu0 %vm62_vm3, %v5550_v42  ;;  %6404 = vmatprep.subr.msk.bf16.mxu1 %vm7082_vm2, %v6402_v50 }
  0x92   :  { %5582 = vmatmul.mubr.msk.f32.gmra.mrb[14].mxu1 %vm62_vm3, %v5550_v42  ;;  %6397 = vmatpush1.bf16.msk.msra.mxu0 %vm7082_vm2, %v6395_v54  ;;  %v3927_v42 = vld [vmem:[%s9428_s3 + $0x40] sm:$0xff] }
  0x93   :  { %6407 = vmatpush1.bf16.msk.msra.mxu1 %vm7082_vm2, %v6405_v11  ;;  %3338 = vmatprep.mubr.f32.mxu0 %v7001_v7  ;;  %v6466_v61 = vpack.c.bf16 %v3928_v58, %v3927_v42 }
  0x94   :  { %3415 = vmatprep.mubr.f32.mxu1 %v7001_v7  ;;  %6409 = vmatprep.subr.bf16.mxu0 %v7416_v36  ;;  %v5617_v36 = vld [vmem:[%s9425_s0 + $0x25] ss:$2 sm:$0xff] }
  0x95   :  { %5603 = vmatmul.mubr.msk.f32.vlgmr.msra.gmra.mrb[8].mxu0 %vm62_vm3, %v5583_v20  ;;  %6419 = vmatprep.subr.bf16.mxu1 %v7428_v43  ;;  %v5618_v43 = vld [vmem:[%s9425_s0 + $0x35] ss:$2 sm:$0xf] }
  0x96   :  { %5607 = vmatmul.mubr.msk.f32.vlgmr.msra.gmra.mrb[8].mxu1 %vm62_vm3, %v5583_v20  ;;  %6411 = vmatpush1.bf16.msra.mxu0 %v7442_v49  ;;  %v3936_v49 = vld [vmem:[%s9428_s3 + $0x88] sm:$0xff] }
  0x97   :  { %6421 = vmatpush1.bf16.msra.mxu1 %v7456_v52  ;;  %3344 = vmatprep.mubr.f32.mxu0 %v7001_v7  ;;  %v3919_v52 = vld [vmem:[%s9428_s3] sm:$0xff] }
  0x98   :  { %3421 = vmatprep.mubr.f32.mxu1 %v7001_v7  ;;  %6414 = vmatprep.subr.msk.bf16.mxu0 %vm7082_vm2, %v7918_v13  ;;  %v3957_v13 = vld [vmem:[%s9428_s3 + $0x130] sm:$0xff] }
  0x99   :  { %5604 = vmatmul.mubr.msk.f32.gmra.mrb[10].mxu0 %vm62_vm3, %v5584_v26  ;;  %6424 = vmatprep.subr.msk.bf16.mxu1 %vm7082_vm2, %v7927_v34  ;;  %v6494_v34 = vpack.c.bf16 %v3958_v29, %v3957_v13 }
  0x9a   :  { %5608 = vmatmul.mubr.msk.f32.gmra.mrb[10].mxu1 %vm62_vm3, %v5584_v26  ;;  %6417 = vmatpush1.bf16.msk.msra.mxu0 %vm7082_vm2, %v7933_v35  ;;  %v3943_v35 = vld [vmem:[%s9428_s3 + $0xc0] sm:$0xff] }
  0x9b   :  { %6427 = vmatpush1.bf16.msk.msra.mxu1 %vm7082_vm2, %v7938_v38  ;;  %3500 = vmatprep.mubr.f32.mxu0 %v7001_v7  ;;  %v3944_v38 = vld [vmem:[%s9428_s3 + $0xc8] sm:$0xff] }
  0x9c   :  { %3577 = vmatprep.mubr.f32.mxu1 %v7001_v7  ;;  %6429 = vmatprep.subr.bf16.mxu0 %v7550_v28  ;;  %v6448_v28 = vpack.c.bf16 %v3936_v49, %v3935_v15  ;;  %v6464_v14 = vpack.c.bf16 %v3944_v38, %v3943_v35  ;;  %v3930_v15 = vld [vmem:[%s9428_s3 + $0x58] sm:$0xff]  ;;  %v21_v38 = vld [vmem:[%s9427_s2] sm:$0xf] }
  0x9d   :  { %5611 = vmatmul.mubr.msk.f32.vlgmr.msra.gmra.mrb[12].mxu0 %vm62_vm3, %v5583_v20  ;;  %6439 = vmatprep.subr.bf16.mxu1 %v7562_v21 }
  0x9e   :  { %5615 = vmatmul.mubr.msk.f32.vlgmr.msra.gmra.mrb[12].mxu1 %vm62_vm3, %v5583_v20  ;;  %6431 = vmatpush1.bf16.msra.mxu0 %v7576_v25  ;;  %v3967_v25 = vld [vmem:[%s9428_s3 + $0x180] sm:$0xff]  ;;  %v3945_v20 = vld [vmem:[%s9428_s3 + $0xd0] sm:$0xff] }
  0x9f   :  { %6441 = vmatpush1.bf16.msra.mxu1 %v7590_v32  ;;  %3506 = vmatprep.mubr.f32.mxu0 %v7001_v7  ;;  %v3968_v32 = vld [vmem:[%s9428_s3 + $0x188] sm:$0xff] }
  0xa0   :  { %3583 = vmatprep.mubr.f32.mxu1 %v7001_v7  ;;  %6434 = vmatprep.subr.msk.bf16.mxu0 %vm7082_vm2, %v6392_v5  ;;  %v6480_v27 = vpack.c.bf16 %v3968_v32, %v3967_v25  ;;  %v3976_v5 = vld [vmem:[%s9428_s3 + $0x1c8] sm:$0xff]  ;;  %v3962_v25 = vld [vmem:[%s9428_s3 + $0x158] sm:$0xff] }
  0xa1   :  { %5612 = vmatmul.mubr.msk.f32.gmra.mrb[14].mxu0 %vm62_vm3, %v5584_v26  ;;  %6444 = vmatprep.subr.msk.bf16.mxu1 %vm7082_vm2, %v6402_v50  ;;  %v6496_v47 = vpack.c.bf16 %v3976_v5, %v3975_v1  ;;  %v3959_v50 = vld [vmem:[%s9428_s3 + $0x140] sm:$0xff] }
  0xa2   :  { %5616 = vmatmul.mubr.msk.f32.gmra.mrb[14].mxu1 %vm62_vm3, %v5584_v26  ;;  %6437 = vmatpush1.bf16.msk.msra.mxu0 %vm7082_vm2, %v6395_v54  ;;  %v3960_v54 = vld [vmem:[%s9428_s3 + $0x148] sm:$0xff]  ;;  %v3946_v26 = vld [vmem:[%s9428_s3 + $0xd8] sm:$0xff] }
  0xa3   :  { %6447 = vmatpush1.bf16.msk.msra.mxu1 %vm7082_vm2, %v6405_v11  ;;  %3672 = vmatprep.mubr.f32.mxu0 %v7001_v7  ;;  %v6498_v11 = vpack.c.bf16 %v3960_v54, %v3959_v50  ;;  %v7003_v54 = vmov 1966171168  }
  0xa4   :  { %3749 = vmatprep.mubr.f32.mxu1 %v7001_v7  ;;  %6449 = vmatprep.subr.bf16.mxu0 %v6448_v28  ;;  %v3978_v28 = vld [vmem:[%s9428_s3 + $0x1d8] sm:$0xff] }
  0xa5   :  { %5621 = vmatmul.mubr.msk.f32.vlgmr.msra.gmra.mrb[12].mxu0 %vm62_vm3, %v5617_v36  ;;  %6481 = vmatprep.subr.bf16.mxu1 %v6480_v27  ;;  %v3947_v27 = vld [vmem:[%s9428_s3 + $0xe0] sm:$0xff] }
  0xa6   :  { %5625 = vmatmul.mubr.msk.f32.vlgmr.msra.gmra.mrb[12].mxu1 %vm62_vm3, %v5617_v36  ;;  %3678 = vmatprep.mubr.f32.mxu0 %v7001_v7  ;;  %v6468_v36 = vpack.c.bf16 %v3946_v26, %v3945_v20  ;;  %v6472_v55 = vpack.c.bf16 %v3948_v46, %v3947_v27 }
  0xa7   :  { %3755 = vmatprep.mubr.f32.mxu1 %v7001_v7  ;;  %v3920_v7 = vld [vmem:[%s9428_s3 + $0x8] sm:$0xff]  ;;  %6483 = vmatpush3.bf16.msra.mxu1 %v6482_v57  ;;  %v3931_v57 = vld [vmem:[%s9428_s3 + $0x60] sm:$0xff] }
  0xa8   :  { %v6450_v21 = vpack.c.bf16 %v3920_v7, %v3919_v52  ;;  %6485 = vmatprep.subr.bf16.mxu1 %v6484_v16  ;;  %v3977_v52 = vld [vmem:[%s9428_s3 + $0x1d0] sm:$0xff]  ;;  %v6474_v60 = vpack.c.bf16 %v3932_v59, %v3931_v57 }
  0xa9   :  { %5622 = vmatmul.mubr.msk.f32.gmra.mrb[14].mxu0 %vm62_vm3, %v5618_v43  ;;  %v6500_v7 = vpack.c.bf16 %v3978_v28, %v3977_v52  ;;  %v3949_v16 = vld [vmem:[%s9428_s3 + $0xf0] sm:$0xff] }
  0xaa   :  { %5626 = vmatmul.mubr.msk.f32.gmra.mrb[14].mxu1 %vm62_vm3, %v5618_v43  ;;  %6451 = vmatpush3.bf16.msra.mxu0 %v6450_v21  ;;  %v3929_v43 = vld [vmem:[%s9428_s3 + $0x50] sm:$0xff]  ;;  %v6476_v23 = vpack.c.bf16 %v3950_v19, %v3949_v16 }
  0xab   :  { %6453 = vmatprep.subr.bf16.mxu0 %v6452_v63  ;;  %6487 = vmatpush3.bf16.msra.mxu1 %v6486_v24  ;;  %v6470_v49 = vpack.c.bf16 %v3930_v15, %v3929_v43  ;;  %v3961_v21 = vld [vmem:[%s9428_s3 + $0x150] sm:$0xff]  ;;  %v3979_v63 = vld [vmem:[%s9428_s3 + $0x1e0] sm:$0xff] }
  0xac   :  { %6489 = vmatprep.subr.bf16.mxu1 %v6488_v37  ;;  %v6502_v32 = vpack.c.bf16 %v3962_v25, %v3961_v21  ;;  %v6504_v4 = vpack.c.bf16 %v3980_v0, %v3979_v63  ;;  %v3933_v24 = vld [vmem:[%s9428_s3 + $0x70] sm:$0xff]  ;;  %v3999_v37 = vld [vmem:[%s9428_s3 + $0x280] sm:$0xff] }
  0xad   :  { %v6512_v45 = vpack.c.bf16 %v4000_v40, %v3999_v37 }
  0xae   :  { %6455 = vmatpush3.bf16.msra.mxu0 %v6454_v12  ;;  %v3963_v12 = vld [vmem:[%s9428_s3 + $0x160] sm:$0xff] }
  0xaf   :  { %6457 = vmatprep.subr.bf16.mxu0 %v6456_v22  ;;  %6491 = vmatpush3.bf16.msra.mxu1 %v6490_v51  ;;  %v6506_v18 = vpack.c.bf16 %v3964_v10, %v3963_v12  ;;  %v6478_v22 = vpack.c.bf16 %v3934_v30, %v3933_v24  ;;  %v4031_v51 = vld [vmem:[%s9428_s3 + $0x380] sm:$0xff] }
  0xb0   :  { %6493 = vmatprep.subr.bf16.mxu1 %v6492_v9 }
  0xb2   :  { %6459 = vmatpush3.bf16.msra.mxu0 %v6458_v41  ;;  %v3966_v41 = vld [vmem:[%s9428_s3 + $0x178] sm:$0xff] }
  0xb3   :  { %6461 = vmatprep.subr.bf16.mxu0 %v6460_v56  ;;  %6495 = vmatpush3.bf16.msra.mxu1 %v6494_v34  ;;  %v6510_v48 = vpack.c.bf16 %v3966_v41, %v3965_v31  ;;  %v6544_v56 = vpack.c.bf16 %v4032_v53, %v4031_v51  ;;  %v8291_v34 = vshrl.u32 %v1824_v3, 7 }
  0xb4   :  { %6497 = vmatprep.subr.bf16.mxu1 %v6496_v47 }
  0xb5   :  { %v1826_v35 = vsub.s32 0, %v8291_v34  ;;  %v1830_v42 = vsub.s32 1, %v8291_v34  ;;  %v1838_v58 = vsub.s32 3, %v8291_v34 }
  0xb6   :  { %6463 = vmatpush3.bf16.msra.mxu0 %v6462_v6 }
  0xb7   :  { %6465 = vmatprep.subr.bf16.mxu0 %v6464_v14  ;;  %6499 = vmatpush3.bf16.msra.mxu1 %v6498_v11  ;;  %v1834_v14 = vsub.s32 2, %v8291_v34  ;;  %v8304_v47 = vrot.slane %v21_v38, %v1830_v42  ;;  %v1868_v11 = vunpack.c.l.s4 %v7003_v54 }
  0xb8   :  { %6501 = vmatprep.subr.bf16.mxu1 %v6500_v7 }
  0xb9   :  { %v8302_v5 = vrot.slane %v21_v38, %v1834_v14  ;;  %v1869_v27 = vunpack.c.0.s8 %v1868_v11 }
  0xba   :  { %6467 = vmatpush3.bf16.msra.mxu0 %v6466_v61  ;;  %v8300_v61 = vrot.slane %v21_v38, %v1826_v35 }
  0xbb   :  { %6469 = vmatprep.subr.bf16.mxu0 %v6468_v36  ;;  %6503 = vmatpush3.bf16.msra.mxu1 %v6502_v32  ;;  %v8306_v36 = vrot.slane %v21_v38, %v1838_v58  ;;  %v8316_v30 = vsub.s32 %v1869_v27, %v8291_v34 }
  0xbc   :  { %6505 = vmatprep.subr.bf16.mxu1 %v6504_v4 }
  0xbe   :  { %6471 = vmatpush3.bf16.msra.mxu0 %v6470_v49 }
  0xbf   :  { %6473 = vmatprep.subr.bf16.mxu0 %v6472_v55  ;;  %6507 = vmatpush3.bf16.msra.mxu1 %v6506_v18 }
  0xc0   :  { %6509 = vmatprep.subr.bf16.mxu1 %v6508_v44 }
  0xc2   :  { %6475 = vmatpush3.bf16.msra.mxu0 %v6474_v60 }
  0xc3   :  { %6477 = vmatprep.subr.bf16.mxu0 %v6476_v23  ;;  %6511 = vmatpush3.bf16.msra.mxu1 %v6510_v48 }
  0xc4   :  { %6545 = vmatprep.subr.bf16.mxu1 %v6544_v56 }
  0xc6   :  { %6479 = vmatpush3.bf16.msra.mxu0 %v6478_v22 }
  0xc7   :  { %6513 = vmatprep.subr.bf16.mxu0 %v6512_v45 }
 0x118   :  { %v1385_v62 = vpop.f32.mrb[0].mxu0 }
 0x119   :  { %v1462_v33 = vpop.f32.mrb[0].mxu1  ;;  %v1387_v2 = vpop.f32.mrb[1].mxu0 }
 0x11a   :  { %v1464_v6 = vpop.f32.mrb[1].mxu1 }
 0x11c   :  { %v1391_v8 = vpop.f32.mrb[2].mxu0 }
 0x11d   :  { %v1468_v9 = vpop.f32.mrb[2].mxu1  ;;  %v1393_v13 = vpop.f32.mrb[3].mxu0 }
 0x11e   :  { %v1470_v29 = vpop.f32.mrb[3].mxu1 }
 0x128   :  { %v1719_v1 = vpop.f32.mrb[4].mxu0 }
 0x129   :  { %v1815_v50 = vmax.f32 %v1385_v62, %v1719_v1  ;;  %v1796_v20 = vpop.f32.mrb[4].mxu1  ;;  %v1721_v26 = vpop.f32.mrb[5].mxu0  ;;  %v4002_v62 = vld [vmem:[%s9428_s3 + $0x298] sm:$0xff] }
 0x12a   :  { %v1817_v43 = vmax.f32 %v1462_v33, %v1796_v20  ;;  %v1816_v15 = vmax.f32 %v1387_v2, %v1721_v26  ;;  %v1798_v49 = vpop.f32.mrb[5].mxu1 }
 0x12b   :  { %v1844_v52 = vadd.f32 %v8300_v61, %v1815_v50  ;;  %v1818_v28 = vmax.f32 %v1464_v6, %v1798_v49 }
 0x12c   :  { %v1846_v7 = vadd.f32 %v8302_v5, %v1817_v43  ;;  %v1845_v21 = vadd.f32 %v8304_v47, %v1816_v15  ;;  %v1725_v25 = vpop.f32.mrb[6].mxu0 }
 0x12d   :  { %v1852_v32 = vmax.f32 %v1844_v52, 0.0  ;;  %v1847_v46 = vadd.f32 %v8306_v36, %v1818_v28  ;;  %v1819_v55 = vmax.f32 %v1391_v8, %v1725_v25  ;;  %v1802_v57 = vpop.f32.mrb[6].mxu1  ;;  %v1727_v59 = vpop.f32.mrb[7].mxu0 }
 0x12e   :  { %v1854_v60 = vmax.f32 %v1846_v7, 0.0  ;;  %v1853_v63 = vmax.f32 %v1845_v21, 0.0  ;;  %v1821_v0 = vmax.f32 %v1468_v9, %v1802_v57  ;;  %v1820_v4 = vmax.f32 %v1393_v13, %v1727_v59  ;;  %v1804_v12 = vpop.f32.mrb[7].mxu1 }
 0x12f   :  { %v1855_v10 = vmax.f32 %v1847_v46, 0.0  ;;  %v1848_v18 = vadd.f32 %v8300_v61, %v1819_v55  ;;  %v1822_v16 = vmax.f32 %v1470_v29, %v1804_v12 }
 0x130   :  { %v1860_v19 = vmax.f32 %v1852_v32, %v1854_v60  ;;  %v1850_v23 = vadd.f32 %v8302_v5, %v1821_v0  ;;  %v1849_v24 = vadd.f32 %v8304_v47, %v1820_v4 }
 0x131   :  { %v1861_v17 = vmax.f32 %v1853_v63, %v1855_v10  ;;  %v1856_v22 = vmax.f32 %v1848_v18, 0.0  ;;  %v1851_v39 = vadd.f32 %v8306_v36, %v1822_v16 }
 0x132   :  { %v1858_v31 = vmax.f32 %v1850_v23, 0.0  ;;  %v1857_v41 = vmax.f32 %v1849_v24, 0.0 }
 0x133   :  { %v1866_v44 = vcombine.low %v1860_v19, %v1861_v17  ;;  %v1906_v48 = vcombine.high %v1860_v19, %v1861_v17  ;;  %v1859_v37 = vmax.f32 %v1851_v39, 0.0 }
 0x134   :  { %v1862_v40 = vmax.f32 %v1856_v22, %v1858_v31 }
 0x135   :  { %v1873_v45 = vrot.slane %v1866_v44, %v8316_v30  ;;  %v1913_v51 = vrot.slane %v1906_v48, %v8316_v30  ;;  %v1863_v53 = vmax.f32 %v1857_v41, %v1859_v37 }
 0x137   :  { %v1880_v56 = vrot.slane %v1873_v45, %v8316_v30  ;;  %v1887_v33 = vcombine.high %v1873_v45, %v1873_v45  ;;  %v1920_v2 = vrot.slane %v1913_v51, %v8316_v30  ;;  %v1924_v6 = vcombine.high %v1913_v51, %v1913_v51 }
 0x138   :  { %v1945_v8 = vcombine.low %v1862_v40, %v1863_v53 }
 0x139   :  { %1886 = vst.msk [vmem:[#allocation2] ss:$2 sm:$0x3] %vm8321_vm4, %v1880_v56  ;;  %v1894_v9 = vrot.slane %v1887_v33, %v8316_v30  ;;  %v1898_v13 = vcombine.high %v1880_v56, %v1880_v56  ;;  %1923 = vst.msk [vmem:[#allocation2 + $0x10] ss:$2 sm:$0x3] %vm8321_vm4, %v1920_v2  ;;  %v1931_v3 = vrot.slane %v1924_v6, %v8316_v30 }
 0x13a   :  { %v1935_v29 = vcombine.high %v1920_v2, %v1920_v2  ;;  %v1952_v35 = vrot.slane %v1945_v8, %v8316_v30 }
 0x13b   :  { %1897 = vst.msk [vmem:[#allocation2 + $0x4] ss:$2 sm:$0x3] %vm8321_vm4, %v1894_v9  ;;  %1901 = vst.msk [vmem:[#allocation2 + $0x8] ss:$2 sm:$0x3] %vm8321_vm4, %v1898_v13  ;;  %v1902_v38 = vcombine.high %v1894_v9, %v1894_v9  ;;  %v1939_v14 = vcombine.high %v1931_v3, %v1931_v3 }
 0x13c   :  { %1934 = vst.msk [vmem:[#allocation2 + $0x14] ss:$2 sm:$0x3] %vm8321_vm4, %v1931_v3  ;;  %1938 = vst.msk [vmem:[#allocation2 + $0x18] ss:$2 sm:$0x3] %vm8321_vm4, %v1935_v29  ;;  %v1959_v42 = vrot.slane %v1952_v35, %v8316_v30  ;;  %v1963_v58 = vcombine.high %v1952_v35, %v1952_v35 }
 0x13d   :  { %1905 = vst.msk [vmem:[#allocation2 + $0xc] ss:$2 sm:$0x3] %vm8321_vm4, %v1902_v38  ;;  %1942 = vst.msk [vmem:[#allocation2 + $0x1c] ss:$2 sm:$0x3] %vm8321_vm4, %v1939_v14 }
 0x13e   :  { %1962 = vst.msk [vmem:[#allocation2 + $0x20] ss:$2 sm:$0x3] %vm8321_vm4, %v1959_v42  ;;  %v1970_v1 = vrot.slane %v1963_v58, %v8316_v30  ;;  %v1974_v50 = vcombine.high %v1959_v42, %v1959_v42  ;;  %v7004_v3 = vmov 1983009808  }
 0x13f   :  { %v4318_v29 = vunpack.c.l.s4 %v7004_v3  ;;  %v4037_v3 = vld [vmem:[%s9428_s3 + $0x3b0] sm:$0xff] }
 0x140   :  { %1973 = vst.msk [vmem:[#allocation2 + $0x24] ss:$2 sm:$0x3] %vm8321_vm4, %v1970_v1  ;;  %1977 = vst.msk [vmem:[#allocation2 + $0x28] ss:$2 sm:$0x3] %vm8321_vm4, %v1974_v50  ;;  %v1978_v54 = vcombine.high %v1970_v1, %v1970_v1 }
 0x142   :  { %1981 = vst.msk [vmem:[#allocation2 + $0x2c] ss:$2 sm:$0x3] %vm8321_vm4, %v1978_v54  ;;  %v4319_v54 = vunpack.c.0.s8 %v4318_v29  ;;  %v4038_v29 = vld [vmem:[%s9428_s3 + $0x3b8] sm:$0xff] }
 0x168   :  { %v3340_v11 = vpop.f32.mrb[8].mxu0 }
 0x169   :  { %v3417_v20 = vpop.f32.mrb[8].mxu1  ;;  %v3342_v26 = vpop.f32.mrb[9].mxu0 }
 0x16a   :  { %v3419_v43 = vpop.f32.mrb[9].mxu1 }
 0x16c   :  { %v3346_v15 = vpop.f32.mrb[10].mxu0 }
 0x16d   :  { %v3423_v49 = vpop.f32.mrb[10].mxu1  ;;  %v3348_v52 = vpop.f32.mrb[11].mxu0 }
 0x16e   :  { %v3425_v28 = vpop.f32.mrb[11].mxu1 }
 0x178   :  { %v3674_v7 = vpop.f32.mrb[12].mxu0 }
 0x179   :  { %v3770_v21 = vmax.f32 %v3340_v11, %v3674_v7  ;;  %v3751_v25 = vpop.f32.mrb[12].mxu1  ;;  %v3676_v32 = vpop.f32.mrb[13].mxu0  ;;  %v3983_v7 = vld [vmem:[%s9428_s3 + $0x200] sm:$0xff] }
 0x17a   :  { %v3772_v27 = vmax.f32 %v3417_v20, %v3751_v25  ;;  %v3771_v46 = vmax.f32 %v3342_v26, %v3676_v32  ;;  %v3753_v55 = vpop.f32.mrb[13].mxu1  ;;  %v4015_v32 = vld [vmem:[%s9428_s3 + $0x300] sm:$0xff] }
 0x17b   :  { %v3778_v57 = vadd.f32 %v3770_v21, %v8300_v61  ;;  %v3773_v59 = vmax.f32 %v3419_v43, %v3753_v55  ;;  %v3984_v21 = vld [vmem:[%s9428_s3 + $0x208] sm:$0xff] }
 0x17c   :  { %v3780_v60 = vadd.f32 %v3772_v27, %v8302_v5  ;;  %v3779_v63 = vadd.f32 %v3771_v46, %v8304_v47  ;;  %v3680_v0 = vpop.f32.mrb[14].mxu0  ;;  %v4016_v27 = vld [vmem:[%s9428_s3 + $0x308] sm:$0xff]  ;;  %v6514_v46 = vpack.c.bf16 %v3984_v21, %v3983_v7  ;;  %v4023_v21 = vld [vmem:[%s9428_s3 + $0x340] sm:$0xff] }
 0x17d   :  { %v3786_v4 = vmax.f32 %v3778_v57, 0.0  ;;  %v3781_v12 = vadd.f32 %v3773_v59, %v8306_v36  ;;  %v3774_v10 = vmax.f32 %v3346_v15, %v3680_v0  ;;  %v3757_v18 = vpop.f32.mrb[14].mxu1  ;;  %v3682_v16 = vpop.f32.mrb[15].mxu0  ;;  %v4001_v57 = vld [vmem:[%s9428_s3 + $0x290] sm:$0xff] }
 0x17e   :  { %v3788_v19 = vmax.f32 %v3780_v60, 0.0  ;;  %v3787_v23 = vmax.f32 %v3779_v63, 0.0  ;;  %v3776_v24 = vmax.f32 %v3423_v49, %v3757_v18  ;;  %v3775_v17 = vmax.f32 %v3348_v52, %v3682_v16  ;;  %v3759_v22 = vpop.f32.mrb[15].mxu1  ;;  %v3985_v18 = vld [vmem:[%s9428_s3 + $0x210] sm:$0xff]  ;;  %v3986_v16 = vld [vmem:[%s9428_s3 + $0x218] sm:$0xff] }
 0x17f   :  { %v3789_v39 = vmax.f32 %v3781_v12, 0.0  ;;  %v3782_v31 = vadd.f32 %v3774_v10, %v8300_v61  ;;  %v3777_v41 = vmax.f32 %v3425_v28, %v3759_v22  ;;  %v8392_v52 = vsub.s32 %v4319_v54, %v8291_v34  ;;  %v4034_v12 = vld [vmem:[%s9428_s3 + $0x398] sm:$0xff]  ;;  %v4003_v22 = vld [vmem:[%s9428_s3 + $0x2a0] sm:$0xff] }
 0x180   :  { %v3794_v44 = vmax.f32 %v3786_v4, %v3788_v19  ;;  %v3784_v48 = vadd.f32 %v3776_v24, %v8302_v5  ;;  %v3783_v37 = vadd.f32 %v3775_v17, %v8304_v47  ;;  %v4033_v4 = vld [vmem:[%s9428_s3 + $0x390] sm:$0xff]  ;;  %v6546_v10 = vpack.c.bf16 %v4016_v27, %v4015_v32  ;;  %v4039_v54 = vld [vmem:[%s9428_s3 + $0x3c0] sm:$0xff]  ;;  %v4042_v32 = vld [vmem:[%s9428_s3 + $0x3d8] sm:$0xff] }
 0x181   :  { %v3795_v40 = vmax.f32 %v3787_v23, %v3789_v39  ;;  %v3790_v45 = vmax.f32 %v3782_v31, 0.0  ;;  %v3785_v51 = vadd.f32 %v3777_v41, %v8306_v36  ;;  %v6516_v24 = vpack.c.bf16 %v4002_v62, %v4001_v57  ;;  %v4004_v39 = vld [vmem:[%s9428_s3 + $0x2a8] sm:$0xff]  ;;  %v4017_v41 = vld [vmem:[%s9428_s3 + $0x310] sm:$0xff]  ;;  %v4011_v62 = vld [vmem:[%s9428_s3 + $0x2e0] sm:$0xff] }
 0x182   :  { %v3792_v53 = vmax.f32 %v3784_v48, 0.0  ;;  %v3791_v56 = vmax.f32 %v3783_v37, 0.0  ;;  %v6548_v31 = vpack.c.bf16 %v4034_v12, %v4033_v4  ;;  %v6518_v37 = vpack.c.bf16 %v3986_v16, %v3985_v18  ;;  %v4026_v4 = vld [vmem:[%s9428_s3 + $0x358] sm:$0xff]  ;;  %v4044_v18 = vld [vmem:[%s9428_s3 + $0x3e8] sm:$0xff] }
 0x183   :  { %v3800_v33 = vcombine.low %v3794_v44, %v3795_v40  ;;  %v3837_v2 = vcombine.high %v3794_v44, %v3795_v40  ;;  %v3793_v6 = vmax.f32 %v3785_v51, 0.0  ;;  %v4018_v44 = vld [vmem:[%s9428_s3 + $0x318] sm:$0xff]  ;;  %v4035_v40 = vld [vmem:[%s9428_s3 + $0x3a0] sm:$0xff]  ;;  %v6520_v51 = vpack.c.bf16 %v4004_v39, %v4003_v22  ;;  %v4013_v22 = vld [vmem:[%s9428_s3 + $0x2f0] sm:$0xff] }
 0x184   :  { %v3796_v8 = vmax.f32 %v3790_v45, %v3792_v53  ;;  %v4036_v45 = vld [vmem:[%s9428_s3 + $0x3a8] sm:$0xff]  ;;  %v3987_v53 = vld [vmem:[%s9428_s3 + $0x220] sm:$0xff]  ;;  %v4014_v39 = vld [vmem:[%s9428_s3 + $0x2f8] sm:$0xff] }
 0x185   :  { %v3807_v9 = vrot.slane %v3800_v33, %v8316_v30  ;;  %v3844_v61 = vrot.slane %v3837_v2, %v8316_v30  ;;  %v3797_v13 = vmax.f32 %v3791_v56, %v3793_v6  ;;  %v3988_v56 = vld [vmem:[%s9428_s3 + $0x228] sm:$0xff]  ;;  %v6550_v33 = vpack.c.bf16 %v4018_v44, %v4017_v41  ;;  %v4005_v2 = vld [vmem:[%s9428_s3 + $0x2b0] sm:$0xff]  ;;  %v4006_v6 = vld [vmem:[%s9428_s3 + $0x2b8] sm:$0xff] }
 0x186   :  { %v4027_v41 = vld [vmem:[%s9428_s3 + $0x360] sm:$0xff]  ;;  %v4028_v44 = vld [vmem:[%s9428_s3 + $0x368] sm:$0xff] }
 0x187   :  { %v3814_v5 = vrot.slane %v3807_v9, %v8316_v30  ;;  %v3818_v47 = vcombine.high %v3807_v9, %v3807_v9  ;;  %v3851_v35 = vrot.slane %v3844_v61, %v8316_v30  ;;  %v3855_v38 = vcombine.high %v3844_v61, %v3844_v61  ;;  %v4019_v9 = vld [vmem:[%s9428_s3 + $0x320] sm:$0xff]  ;;  %v4020_v61 = vld [vmem:[%s9428_s3 + $0x328] sm:$0xff] }
 0x188   :  { %v3876_v36 = vcombine.low %v3796_v8, %v3797_v13  ;;  %v6552_v8 = vpack.c.bf16 %v4036_v45, %v4035_v40  ;;  %v6522_v13 = vpack.c.bf16 %v3988_v56, %v3987_v53  ;;  %v4046_v40 = vld [vmem:[%s9428_s3 + $0x3f8] sm:$0xff]  ;;  %v6540_v45 = vpack.c.bf16 %v4014_v39, %v4013_v22  ;;  %v4053_v22 = vld [vmem:[%s9428_s3 + $0x430] sm:$0xff] }
 0x189   :  { %3817 = vst.msk [vmem:[#allocation2 + $0x1] ss:$2 sm:$0x3] %vm8321_vm4, %v3814_v5  ;;  %v3825_v14 = vrot.slane %v3818_v47, %v8316_v30  ;;  %v3829_v42 = vcombine.high %v3814_v5, %v3814_v5  ;;  %3854 = vst.msk [vmem:[#allocation2 + $0x11] ss:$2 sm:$0x3] %vm8321_vm4, %v3851_v35  ;;  %v3862_v58 = vrot.slane %v3855_v38, %v8316_v30 }
 0x18a   :  { %v3866_v1 = vcombine.high %v3851_v35, %v3851_v35  ;;  %v3883_v50 = vrot.slane %v3876_v36, %v8316_v30  ;;  %v6524_v5 = vpack.c.bf16 %v4006_v6, %v4005_v2  ;;  %v3989_v47 = vld [vmem:[%s9428_s3 + $0x230] sm:$0xff]  ;;  %v3990_v35 = vld [vmem:[%s9428_s3 + $0x238] sm:$0xff]  ;;  %v6554_v38 = vpack.c.bf16 %v4020_v61, %v4019_v9  ;;  %v4007_v36 = vld [vmem:[%s9428_s3 + $0x2c0] sm:$0xff] }
 0x18b   :  { %3828 = vst.msk [vmem:[#allocation2 + $0x5] ss:$2 sm:$0x3] %vm8321_vm4, %v3825_v14  ;;  %3832 = vst.msk [vmem:[#allocation2 + $0x9] ss:$2 sm:$0x3] %vm8321_vm4, %v3829_v42  ;;  %v3833_v11 = vcombine.high %v3825_v14, %v3825_v14  ;;  %v3870_v20 = vcombine.high %v3862_v58, %v3862_v58  ;;  %v6556_v42 = vpack.c.bf16 %v4038_v29, %v4037_v3 }
 0x18c   :  { %3865 = vst.msk [vmem:[#allocation2 + $0x15] ss:$2 sm:$0x3] %vm8321_vm4, %v3862_v58  ;;  %3869 = vst.msk [vmem:[#allocation2 + $0x19] ss:$2 sm:$0x3] %vm8321_vm4, %v3866_v1  ;;  %v3890_v26 = vrot.slane %v3883_v50, %v8316_v30  ;;  %v3894_v43 = vcombine.high %v3883_v50, %v3883_v50  ;;  %v6526_v50 = vpack.c.bf16 %v3990_v35, %v3989_v47 }
 0x18d   :  { %3836 = vst.msk [vmem:[#allocation2 + $0xd] ss:$2 sm:$0x3] %vm8321_vm4, %v3833_v11  ;;  %3873 = vst.msk [vmem:[#allocation2 + $0x1d] ss:$2 sm:$0x3] %vm8321_vm4, %v3870_v20 }
 0x18e   :  { %3893 = vst.msk [vmem:[#allocation2 + $0x21] ss:$2 sm:$0x3] %vm8321_vm4, %v3890_v26  ;;  %v3901_v15 = vrot.slane %v3894_v43, %v8316_v30  ;;  %v3905_v49 = vcombine.high %v3890_v26, %v3890_v26  ;;  %v4008_v14 = vld [vmem:[%s9428_s3 + $0x2c8] sm:$0xff]  ;;  %v4021_v58 = vld [vmem:[%s9428_s3 + $0x330] sm:$0xff]  ;;  %v4022_v1 = vld [vmem:[%s9428_s3 + $0x338] sm:$0xff] }
 0x18f   :  { %v4040_v11 = vld [vmem:[%s9428_s3 + $0x3c8] sm:$0xff]  ;;  %v6528_v20 = vpack.c.bf16 %v4008_v14, %v4007_v36  ;;  %v3991_v26 = vld [vmem:[%s9428_s3 + $0x240] sm:$0xff]  ;;  %v3998_v53 = vld [vmem:[%s9428_s3 + $0x278] sm:$0xff] }
 0x190   :  { %3904 = vst.msk [vmem:[#allocation2 + $0x25] ss:$2 sm:$0x3] %vm8321_vm4, %v3901_v15  ;;  %3908 = vst.msk [vmem:[#allocation2 + $0x29] ss:$2 sm:$0x3] %vm8321_vm4, %v3905_v49  ;;  %v3909_v28 = vcombine.high %v3901_v15, %v3901_v15  ;;  %v6558_v15 = vpack.c.bf16 %v4022_v1, %v4021_v58  ;;  %v6560_v7 = vpack.c.bf16 %v4040_v11, %v4039_v54 }
 0x191   :  { %v3992_v43 = vld [vmem:[%s9428_s3 + $0x248] sm:$0xff]  ;;  %v4009_v49 = vld [vmem:[%s9428_s3 + $0x2d0] sm:$0xff]  ;;  %v4063_v2 = vld [vmem:[%s9428_s3 + $0x480] sm:$0xff] }
 0x192   :  { %3912 = vst.msk [vmem:[#allocation2 + $0x2d] ss:$2 sm:$0x3] %vm8321_vm4, %v3909_v28  ;;  %v3913_v34 = vld [vmem:[#allocation2] sm:$0xff]  ;;  %v4010_v28 = vld [vmem:[%s9428_s3 + $0x2d8] sm:$0xff]  ;;  %v4064_v6 = vld [vmem:[%s9428_s3 + $0x488] sm:$0xff] }
 0x193   :  { %v4323_v30 = vrot.slane %v3913_v34, %v8392_v52  ;;  %v4316_v25 = vcombine.high %v3913_v34, %v3913_v34  ;;  %v4024_v34 = vld [vmem:[%s9428_s3 + $0x348] sm:$0xff]  ;;  %v6532_v27 = vpack.c.bf16 %v4010_v28, %v4009_v49  ;;  %v3915_v56 = vld [vmem:[#allocation2 + $0x10] sm:$0xff]  ;;  %v4030_v61 = vld [vmem:[%s9428_s3 + $0x378] sm:$0xff]  ;;  %v6576_v47 = vpack.c.bf16 %v4064_v6, %v4063_v2 }
 0x194   :  { %v3914_v55 = vld [vmem:[#allocation2 + $0x8] sm:$0xff]  ;;  %v6562_v57 = vpack.c.bf16 %v4024_v34, %v4023_v21  ;;  %v4029_v9 = vld [vmem:[%s9428_s3 + $0x370] sm:$0xff]  ;;  %v4095_v3 = vld [vmem:[%s9428_s3 + $0x580] sm:$0xff]  ;;  %v8611_v14 = vrot.slane %v3915_v56, %v8392_v52 }
 0x195   :  { %v4331_v59 = vcombine.high %v4323_v30, %v4323_v30  ;;  %v4330_v60 = vrot.slane %v4316_v25, %v8392_v52  ;;  %v8421_v63 = vrot.slane %v3914_v55, %v8392_v52  ;;  %v4333_v0 = vcombine.high %v3914_v55, %v3914_v55  ;;  %v4041_v25 = vld [vmem:[%s9428_s3 + $0x3d0] sm:$0xff]  ;;  %v3994_v55 = vld [vmem:[%s9428_s3 + $0x258] sm:$0xff]  ;;  %v4096_v29 = vld [vmem:[%s9428_s3 + $0x588] sm:$0xff] }
 0x196   :  { %v4047_v35 = vld [vmem:[%s9428_s3 + $0x400] sm:$0xff]  ;;  %v6574_v36 = vpack.c.bf16 %v4030_v61, %v4029_v9  ;;  %v4066_v58 = vld [vmem:[%s9428_s3 + $0x498] sm:$0xff]  ;;  %v6608_v1 = vpack.c.bf16 %v4096_v29, %v4095_v3  ;;  %v4080_v54 = vld [vmem:[%s9428_s3 + $0x508] sm:$0xff] }
 0x197   :  { %4506 = vmatprep.mubr.f32.mxu0 %v4331_v59  ;;  %v4332_v19 = vcombine.high %v4330_v60, %v4330_v60  ;;  %v4348_v23 = vcombine.high %v8421_v63, %v8421_v63  ;;  %v8438_v17 = vrot.slane %v4333_v0, %v8392_v52  ;;  %v4012_v59 = vld [vmem:[%s9428_s3 + $0x2e8] sm:$0xff]  ;;  %v4025_v0 = vld [vmem:[%s9428_s3 + $0x350] sm:$0xff]  ;;  %v4050_v28 = vld [vmem:[%s9428_s3 + $0x418] sm:$0xff] }
 0x198   :  { %4507 = vmatmul.mubr.f32.vlgmr.msra.gmra.mrb[16].mxu0 %v4323_v30  ;;  %v6530_v30 = vpack.c.bf16 %v3992_v43, %v3991_v26  ;;  %v6536_v16 = vpack.c.bf16 %v4012_v59, %v4011_v62  ;;  %v4097_v26 = vld [vmem:[%s9428_s3 + $0x590] sm:$0xff]  ;;  %v4098_v43 = vld [vmem:[%s9428_s3 + $0x598] sm:$0xff]  ;;  %v4067_v34 = vld [vmem:[%s9428_s3 + $0x4a0] sm:$0xff] }
 0x199   :  { %6515 = vmatpush3.bf16.msra.mxu0 %v6514_v46  ;;  %4576 = vmatprep.mubr.f32.mxu1 %v4332_v19  ;;  %v4349_v48 = vcombine.high %v8438_v17, %v8438_v17  ;;  %v3993_v46 = vld [vmem:[%s9428_s3 + $0x250] sm:$0xff]  ;;  %v3995_v19 = vld [vmem:[%s9428_s3 + $0x260] sm:$0xff]  ;;  %v4054_v39 = vld [vmem:[%s9428_s3 + $0x438] sm:$0xff] }
 0x19a   :  { %4646 = vmatprep.mubr.f32.mxu0 %v4348_v23  ;;  %4577 = vmatmul.mubr.f32.vlgmr.msra.gmra.mrb[16].mxu1 %v4330_v60  ;;  %v6564_v60 = vpack.c.bf16 %v4042_v32, %v4041_v25  ;;  %v6534_v12 = vpack.c.bf16 %v3994_v55, %v3993_v46  ;;  %v3996_v23 = vld [vmem:[%s9428_s3 + $0x268] sm:$0xff]  ;;  %v4049_v49 = vld [vmem:[%s9428_s3 + $0x410] sm:$0xff]  ;;  %v6612_v25 = vpack.c.bf16 %v4098_v43, %v4097_v26  ;;  %v4051_v59 = vld [vmem:[%s9428_s3 + $0x420] sm:$0xff] }
 0x19b   :  { %6547 = vmatpush3.bf16.msra.mxu1 %v6546_v10  ;;  %6517 = vmatprep.subr.bf16.mxu0 %v6516_v24  ;;  %v4043_v10 = vld [vmem:[%s9428_s3 + $0x3e0] sm:$0xff]  ;;  %v6566_v24 = vpack.c.bf16 %v4026_v4, %v4025_v0  ;;  %v4081_v32 = vld [vmem:[%s9428_s3 + $0x510] sm:$0xff]  ;;  %v6582_v55 = vpack.c.bf16 %v4050_v28, %v4049_v49  ;;  %v4056_v2 = vld [vmem:[%s9428_s3 + $0x448] sm:$0xff] }
 0x19c   :  { %4716 = vmatprep.mubr.f32.mxu1 %v4349_v48  ;;  %6549 = vmatprep.subr.bf16.mxu1 %v6548_v31  ;;  %v6568_v31 = vpack.c.bf16 %v4044_v18, %v4043_v10  ;;  %v6538_v48 = vpack.c.bf16 %v3996_v23, %v3995_v19  ;;  %v4069_v4 = vld [vmem:[%s9428_s3 + $0x4b0] sm:$0xff]  ;;  %v4083_v10 = vld [vmem:[%s9428_s3 + $0x520] sm:$0xff]  ;;  %v4084_v18 = vld [vmem:[%s9428_s3 + $0x528] sm:$0xff] }
 0x19d   :  { %6519 = vmatpush3.bf16.msra.mxu0 %v6518_v37  ;;  %v4045_v37 = vld [vmem:[%s9428_s3 + $0x3f0] sm:$0xff]  ;;  %v4102_v23 = vld [vmem:[%s9428_s3 + $0x5b8] sm:$0xff]  ;;  %v4088_v3 = vld [vmem:[%s9428_s3 + $0x548] sm:$0xff] }
 0x19e   :  { %6521 = vmatprep.subr.bf16.mxu0 %v6520_v51  ;;  %v3997_v51 = vld [vmem:[%s9428_s3 + $0x270] sm:$0xff]  ;;  %v4074_v9 = vld [vmem:[%s9428_s3 + $0x4d8] sm:$0xff]  ;;  %v4107_v43 = vld [vmem:[%s9428_s3 + $0x5e0] sm:$0xff] }
 0x19f   :  { %6551 = vmatpush3.bf16.msra.mxu1 %v6550_v33  ;;  %v6570_v33 = vpack.c.bf16 %v4028_v44, %v4027_v41  ;;  %v4101_v19 = vld [vmem:[%s9428_s3 + $0x5b0] sm:$0xff]  ;;  %v4071_v41 = vld [vmem:[%s9428_s3 + $0x4c0] sm:$0xff]  ;;  %v4072_v44 = vld [vmem:[%s9428_s3 + $0x4c8] sm:$0xff] }
 0x1a0   :  { %6553 = vmatprep.subr.bf16.mxu1 %v6552_v8  ;;  %v6572_v8 = vpack.c.bf16 %v4046_v40, %v4045_v37  ;;  %v4085_v37 = vld [vmem:[%s9428_s3 + $0x530] sm:$0xff]  ;;  %v4086_v40 = vld [vmem:[%s9428_s3 + $0x538] sm:$0xff]  ;;  %v4059_v28 = vld [vmem:[%s9428_s3 + $0x460] sm:$0xff] }
 0x1a1   :  { %6523 = vmatpush3.bf16.msra.mxu0 %v6522_v13  ;;  %v6542_v13 = vpack.c.bf16 %v3998_v53, %v3997_v51  ;;  %v4103_v51 = vld [vmem:[%s9428_s3 + $0x5c0] sm:$0xff]  ;;  %v4104_v53 = vld [vmem:[%s9428_s3 + $0x5c8] sm:$0xff]  ;;  %v6622_v6 = vpack.c.bf16 %v4086_v40, %v4085_v37  ;;  %v4130_v37 = vld [vmem:[%s9428_s3 + $0x698] sm:$0xff] }
 0x1a2   :  { %6525 = vmatprep.subr.bf16.mxu0 %v6524_v5  ;;  %v4350_v5 = vcombine.high %v3915_v56, %v3915_v56  ;;  %v6592_v56 = vpack.c.bf16 %v4072_v44, %v4071_v41  ;;  %v6624_v61 = vpack.c.bf16 %v4104_v53, %v4103_v51  ;;  %v4144_v51 = vld [vmem:[%s9428_s3 + $0x708] sm:$0xff] }
 0x1a3   :  { %6555 = vmatpush3.bf16.msra.mxu1 %v6554_v38  ;;  %v4048_v38 = vld [vmem:[%s9428_s3 + $0x408] sm:$0xff] }
 0x1a4   :  { %6557 = vmatprep.subr.bf16.mxu1 %v6556_v42  ;;  %v4065_v42 = vld [vmem:[%s9428_s3 + $0x490] sm:$0xff]  ;;  %v6578_v11 = vpack.c.bf16 %v4048_v38, %v4047_v35 }
 0x1a5   :  { %6527 = vmatpush3.bf16.msra.mxu0 %v6526_v50  ;;  %v4079_v50 = vld [vmem:[%s9428_s3 + $0x500] sm:$0xff]  ;;  %v4057_v38 = vld [vmem:[%s9428_s3 + $0x450] sm:$0xff] }
 0x1a6   :  { %6529 = vmatprep.subr.bf16.mxu0 %v6528_v20  ;;  %v8626_v20 = vrot.slane %v4350_v5, %v8392_v52  ;;  %v6610_v21 = vpack.c.bf16 %v4080_v54, %v4079_v50  ;;  %v4105_v5 = vld [vmem:[%s9428_s3 + $0x5d0] sm:$0xff] }
 0x1a7   :  { %6559 = vmatpush3.bf16.msra.mxu1 %v6558_v15  ;;  %v6580_v15 = vpack.c.bf16 %v4066_v58, %v4065_v42  ;;  %v4075_v58 = vld [vmem:[%s9428_s3 + $0x4e0] sm:$0xff]  ;;  %v4089_v54 = vld [vmem:[%s9428_s3 + $0x550] sm:$0xff] }
 0x1a8   :  { %6561 = vmatprep.subr.bf16.mxu1 %v6560_v7  ;;  %v4365_v7 = vcombine.high %v8611_v14, %v8611_v14  ;;  %v4366_v46 = vcombine.high %v8626_v20, %v8626_v20 }
 0x1a9   :  { %6531 = vmatpush3.bf16.msra.mxu0 %v6530_v30  ;;  %v4068_v30 = vld [vmem:[%s9428_s3 + $0x4a8] sm:$0xff] }
 0x1aa   :  { %6533 = vmatprep.subr.bf16.mxu0 %v6532_v27  ;;  %v4082_v27 = vld [vmem:[%s9428_s3 + $0x518] sm:$0xff]  ;;  %v6584_v62 = vpack.c.bf16 %v4068_v30, %v4067_v34  ;;  %v4077_v34 = vld [vmem:[%s9428_s3 + $0x4f0] sm:$0xff] }
 0x1ab   :  { %6563 = vmatpush3.bf16.msra.mxu1 %v6562_v57  ;;  %v4100_v57 = vld [vmem:[%s9428_s3 + $0x5a8] sm:$0xff]  ;;  %v6614_v0 = vpack.c.bf16 %v4082_v27, %v4081_v32  ;;  %v4078_v30 = vld [vmem:[%s9428_s3 + $0x4f8] sm:$0xff]  ;;  %v4091_v32 = vld [vmem:[%s9428_s3 + $0x560] sm:$0xff] }
 0x1ac   :  { %6565 = vmatprep.subr.bf16.mxu1 %v6564_v60  ;;  %v4052_v60 = vld [vmem:[%s9428_s3 + $0x428] sm:$0xff] }
 0x1ad   :  { %6535 = vmatpush3.bf16.msra.mxu0 %v6534_v12  ;;  %v4092_v27 = vld [vmem:[%s9428_s3 + $0x568] sm:$0xff] }
 0x1ae   :  { %6537 = vmatprep.subr.bf16.mxu0 %v6536_v16  ;;  %v6586_v16 = vpack.c.bf16 %v4052_v60, %v4051_v59  ;;  %v4062_v59 = vld [vmem:[%s9428_s3 + $0x478] sm:$0xff] }
 0x1af   :  { %6567 = vmatpush3.bf16.msra.mxu1 %v6566_v24  ;;  %v3916_v60 = vld [vmem:[#allocation2 + $0x18] sm:$0xff] }
 0x1b0   :  { %6569 = vmatprep.subr.bf16.mxu1 %v6568_v31  ;;  %v6618_v31 = vpack.c.bf16 %v4084_v18, %v4083_v10  ;;  %v4093_v10 = vld [vmem:[%s9428_s3 + $0x570] sm:$0xff]  ;;  %v4094_v18 = vld [vmem:[%s9428_s3 + $0x578] sm:$0xff]  ;;  %v8815_v44 = vrot.slane %v3916_v60, %v8392_v52 }
 0x1b1   :  { %6539 = vmatpush3.bf16.msra.mxu0 %v6538_v48  ;;  %v6620_v48 = vpack.c.bf16 %v4102_v23, %v4101_v19  ;;  %v4159_v19 = vld [vmem:[%s9428_s3 + $0x780] sm:$0xff]  ;;  %v4160_v23 = vld [vmem:[%s9428_s3 + $0x788] sm:$0xff]  ;;  %v6638_v41 = vpack.c.bf16 %v4094_v18, %v4093_v10  ;;  %v4138_v10 = vld [vmem:[%s9428_s3 + $0x6d8] sm:$0xff] }
 0x1b2   :  { %6541 = vmatprep.subr.bf16.mxu0 %v6540_v45  ;;  %v6590_v45 = vpack.c.bf16 %v4054_v39, %v4053_v22  ;;  %v4111_v39 = vld [vmem:[%s9428_s3 + $0x600] sm:$0xff]  ;;  %v6672_v40 = vpack.c.bf16 %v4160_v23, %v4159_v19  ;;  %v4152_v19 = vld [vmem:[%s9428_s3 + $0x748] sm:$0xff] }
 0x1b3   :  { %6571 = vmatpush3.bf16.msra.mxu1 %v6570_v33  ;;  %v4055_v33 = vld [vmem:[%s9428_s3 + $0x440] sm:$0xff] }
 0x1b4   :  { %6573 = vmatprep.subr.bf16.mxu1 %v6572_v8  ;;  %v4073_v8 = vld [vmem:[%s9428_s3 + $0x4d0] sm:$0xff]  ;;  %v6594_v29 = vpack.c.bf16 %v4056_v2, %v4055_v33  ;;  %v4162_v2 = vld [vmem:[%s9428_s3 + $0x798] sm:$0xff] }
 0x1b5   :  { %6543 = vmatpush3.bf16.msra.mxu0 %v6542_v13  ;;  %v4087_v13 = vld [vmem:[%s9428_s3 + $0x540] sm:$0xff]  ;;  %v6596_v35 = vpack.c.bf16 %v4074_v9, %v4073_v8  ;;  %v4161_v33 = vld [vmem:[%s9428_s3 + $0x790] sm:$0xff]  ;;  %v4114_v9 = vld [vmem:[%s9428_s3 + $0x618] sm:$0xff] }
 0x1b6   :  { %6577 = vmatprep.subr.bf16.mxu0 %v6576_v47  ;;  %v4106_v47 = vld [vmem:[%s9428_s3 + $0x5d8] sm:$0xff]  ;;  %v6626_v42 = vpack.c.bf16 %v4088_v3, %v4087_v13  ;;  %v4113_v8 = vld [vmem:[%s9428_s3 + $0x610] sm:$0xff]  ;;  %v4131_v3 = vld [vmem:[%s9428_s3 + $0x6a0] sm:$0xff] }
 0x1b7   :  { %6575 = vmatpush3.bf16.msra.mxu1 %v6574_v36  ;;  %v4058_v36 = vld [vmem:[%s9428_s3 + $0x458] sm:$0xff]  ;;  %v6628_v50 = vpack.c.bf16 %v4106_v47, %v4105_v5  ;;  %v6676_v5 = vpack.c.bf16 %v4162_v2, %v4161_v33  ;;  %v4145_v47 = vld [vmem:[%s9428_s3 + $0x710] sm:$0xff]  ;;  %v4171_v2 = vld [vmem:[%s9428_s3 + $0x7e0] sm:$0xff] }
 0x1b8   :  { %4647 = vmatmul.mubr.f32.vlgmr.msra.gmra.mrb[18].mxu0 %v8421_v63  ;;  %6609 = vmatprep.subr.bf16.mxu1 %v6608_v1  ;;  %v4099_v63 = vld [vmem:[%s9428_s3 + $0x5a0] sm:$0xff]  ;;  %v4076_v1 = vld [vmem:[%s9428_s3 + $0x4e8] sm:$0xff]  ;;  %v6598_v26 = vpack.c.bf16 %v4058_v36, %v4057_v38  ;;  %v6646_v36 = vpack.c.bf16 %v4114_v9, %v4113_v8 }
 0x1b9   :  { %6579 = vmatpush3.bf16.msra.mxu0 %v6578_v11  ;;  %4786 = vmatprep.mubr.f32.mxu0 %v4365_v7  ;;  %v6616_v12 = vpack.c.bf16 %v4100_v57, %v4099_v63  ;;  %v4090_v11 = vld [vmem:[%s9428_s3 + $0x558] sm:$0xff]  ;;  %v6600_v49 = vpack.c.bf16 %v4076_v1, %v4075_v58  ;;  %v4060_v7 = vld [vmem:[%s9428_s3 + $0x468] sm:$0xff]  ;;  %v6604_v57 = vpack.c.bf16 %v4078_v30, %v4077_v34  ;;  %v4115_v1 = vld [vmem:[%s9428_s3 + $0x620] sm:$0xff] }
 0x1ba   :  { %4717 = vmatmul.mubr.f32.vlgmr.msra.gmra.mrb[18].mxu1 %v8438_v17  ;;  %6581 = vmatprep.subr.bf16.mxu0 %v6580_v15  ;;  %v4070_v17 = vld [vmem:[%s9428_s3 + $0x4b8] sm:$0xff]  ;;  %v4108_v15 = vld [vmem:[%s9428_s3 + $0x5e8] sm:$0xff]  ;;  %v4117_v34 = vld [vmem:[%s9428_s3 + $0x630] sm:$0xff] }
 0x1bb   :  { %6611 = vmatpush3.bf16.msra.mxu1 %v6610_v21  ;;  %4856 = vmatprep.mubr.f32.mxu1 %v4366_v46  ;;  %v6588_v24 = vpack.c.bf16 %v4070_v17, %v4069_v4  ;;  %v6630_v21 = vpack.c.bf16 %v4090_v11, %v4089_v54  ;;  %v6602_v46 = vpack.c.bf16 %v4060_v7, %v4059_v28  ;;  %v4110_v63 = vld [vmem:[%s9428_s3 + $0x5f8] sm:$0xff]  ;;  %v4127_v4 = vld [vmem:[%s9428_s3 + $0x680] sm:$0xff]  ;;  %v4128_v17 = vld [vmem:[%s9428_s3 + $0x688] sm:$0xff] }
 0x1bc   :  { %6613 = vmatprep.subr.bf16.mxu1 %v6612_v25  ;;  %v6632_v25 = vpack.c.bf16 %v4108_v15, %v4107_v43  ;;  %v6640_v22 = vpack.c.bf16 %v4128_v17, %v4127_v4  ;;  %v4133_v11 = vld [vmem:[%s9428_s3 + $0x6b0] sm:$0xff]  ;;  %v4147_v43 = vld [vmem:[%s9428_s3 + $0x720] sm:$0xff]  ;;  %v4148_v15 = vld [vmem:[%s9428_s3 + $0x728] sm:$0xff] }
 0x1bd   :  { %6583 = vmatpush3.bf16.msra.mxu0 %v6582_v55  ;;  %v4109_v55 = vld [vmem:[%s9428_s3 + $0x5f0] sm:$0xff]  ;;  %v4166_v7 = vld [vmem:[%s9428_s3 + $0x7b8] sm:$0xff]  ;;  %v4120_v4 = vld [vmem:[%s9428_s3 + $0x648] sm:$0xff] }
 0x1be   :  { %6585 = vmatprep.subr.bf16.mxu0 %v6584_v62  ;;  %v4061_v62 = vld [vmem:[%s9428_s3 + $0x470] sm:$0xff]  ;;  %v4118_v30 = vld [vmem:[%s9428_s3 + $0x638] sm:$0xff]  ;;  %v4123_v9 = vld [vmem:[%s9428_s3 + $0x660] sm:$0xff] }
 0x1bf   :  { %6615 = vmatpush3.bf16.msra.mxu1 %v6614_v0  ;;  %v6634_v0 = vpack.c.bf16 %v4092_v27, %v4091_v32  ;;  %v4165_v28 = vld [vmem:[%s9428_s3 + $0x7b0] sm:$0xff]  ;;  %v4135_v32 = vld [vmem:[%s9428_s3 + $0x6c0] sm:$0xff]  ;;  %v4136_v27 = vld [vmem:[%s9428_s3 + $0x6c8] sm:$0xff] }
 0x1c0   :  { %6617 = vmatprep.subr.bf16.mxu1 %v6616_v12  ;;  %v6636_v12 = vpack.c.bf16 %v4110_v63, %v4109_v55  ;;  %v4149_v55 = vld [vmem:[%s9428_s3 + $0x730] sm:$0xff]  ;;  %v4150_v63 = vld [vmem:[%s9428_s3 + $0x738] sm:$0xff] }
 0x1c1   :  { %6587 = vmatpush3.bf16.msra.mxu0 %v6586_v16  ;;  %v6606_v16 = vpack.c.bf16 %v4062_v59, %v4061_v62  ;;  %v4167_v62 = vld [vmem:[%s9428_s3 + $0x7c0] sm:$0xff]  ;;  %v4168_v59 = vld [vmem:[%s9428_s3 + $0x7c8] sm:$0xff]  ;;  %v6686_v17 = vpack.c.bf16 %v4150_v63, %v4149_v55  ;;  %v4194_v55 = vld [vmem:[%s9428_s3 + $0x898] sm:$0xff] }
 0x1c2   :  { %6589 = vmatprep.subr.bf16.mxu0 %v6588_v24  ;;  %v4367_v24 = vcombine.high %v3916_v60, %v3916_v60  ;;  %v6656_v60 = vpack.c.bf16 %v4136_v27, %v4135_v32  ;;  %v6688_v18 = vpack.c.bf16 %v4168_v59, %v4167_v62  ;;  %v4208_v62 = vld [vmem:[%s9428_s3 + $0x908] sm:$0xff] }
 0x1c3   :  { %6619 = vmatpush3.bf16.msra.mxu1 %v6618_v31  ;;  %v4112_v31 = vld [vmem:[%s9428_s3 + $0x608] sm:$0xff] }
 0x1c4   :  { %6621 = vmatprep.subr.bf16.mxu1 %v6620_v48  ;;  %v4129_v48 = vld [vmem:[%s9428_s3 + $0x690] sm:$0xff]  ;;  %v6642_v53 = vpack.c.bf16 %v4112_v31, %v4111_v39 }
 0x1c5   :  { %6591 = vmatpush3.bf16.msra.mxu0 %v6590_v45  ;;  %v4143_v45 = vld [vmem:[%s9428_s3 + $0x700] sm:$0xff]  ;;  %v4121_v31 = vld [vmem:[%s9428_s3 + $0x650] sm:$0xff] }
 0x1c6   :  { %6593 = vmatprep.subr.bf16.mxu0 %v6592_v56  ;;  %v8830_v56 = vrot.slane %v4367_v24, %v8392_v52  ;;  %v6674_v13 = vpack.c.bf16 %v4144_v51, %v4143_v45  ;;  %v4169_v24 = vld [vmem:[%s9428_s3 + $0x7d0] sm:$0xff] }
 0x1c7   :  { %6623 = vmatpush3.bf16.msra.mxu1 %v6622_v6  ;;  %v6644_v6 = vpack.c.bf16 %v4130_v37, %v4129_v48  ;;  %v4139_v37 = vld [vmem:[%s9428_s3 + $0x6e0] sm:$0xff]  ;;  %v4153_v51 = vld [vmem:[%s9428_s3 + $0x750] sm:$0xff] }
 0x1c8   :  { %6625 = vmatprep.subr.bf16.mxu1 %v6624_v61  ;;  %v4382_v61 = vcombine.high %v8815_v44, %v8815_v44  ;;  %v4383_v38 = vcombine.high %v8830_v56, %v8830_v56 }
 0x1c9   :  { %6595 = vmatpush3.bf16.msra.mxu0 %v6594_v29  ;;  %v4132_v29 = vld [vmem:[%s9428_s3 + $0x6a8] sm:$0xff] }
 0x1ca   :  { %6597 = vmatprep.subr.bf16.mxu0 %v6596_v35  ;;  %v4146_v35 = vld [vmem:[%s9428_s3 + $0x718] sm:$0xff]  ;;  %v6648_v58 = vpack.c.bf16 %v4132_v29, %v4131_v3  ;;  %v4141_v3 = vld [vmem:[%s9428_s3 + $0x6f0] sm:$0xff] }
 0x1cb   :  { %6627 = vmatpush3.bf16.msra.mxu1 %v6626_v42  ;;  %v4164_v42 = vld [vmem:[%s9428_s3 + $0x7a8] sm:$0xff]  ;;  %v6678_v54 = vpack.c.bf16 %v4146_v35, %v4145_v47  ;;  %v4142_v29 = vld [vmem:[%s9428_s3 + $0x6f8] sm:$0xff]  ;;  %v4155_v47 = vld [vmem:[%s9428_s3 + $0x760] sm:$0xff] }
 0x1cc   :  { %6629 = vmatprep.subr.bf16.mxu1 %v6628_v50  ;;  %v4116_v50 = vld [vmem:[%s9428_s3 + $0x628] sm:$0xff] }
 0x1cd   :  { %6599 = vmatpush3.bf16.msra.mxu0 %v6598_v26  ;;  %v4156_v35 = vld [vmem:[%s9428_s3 + $0x768] sm:$0xff] }
 0x1ce   :  { %6601 = vmatprep.subr.bf16.mxu0 %v6600_v49  ;;  %v6650_v49 = vpack.c.bf16 %v4116_v50, %v4115_v1  ;;  %v4126_v1 = vld [vmem:[%s9428_s3 + $0x678] sm:$0xff]  ;;  %v3917_v50 = vld [vmem:[#allocation2 + $0x20] sm:$0xff] }
 0x1cf   :  { %6631 = vmatpush3.bf16.msra.mxu1 %v6630_v21  ;;  %v9019_v27 = vrot.slane %v3917_v50, %v8392_v52 }
 0x1d0   :  { %6633 = vmatprep.subr.bf16.mxu1 %v6632_v25  ;;  %v6682_v25 = vpack.c.bf16 %v4148_v15, %v4147_v43  ;;  %v4157_v43 = vld [vmem:[%s9428_s3 + $0x770] sm:$0xff]  ;;  %v4158_v15 = vld [vmem:[%s9428_s3 + $0x778] sm:$0xff] }
 0x1d1   :  { %6603 = vmatpush3.bf16.msra.mxu0 %v6602_v46  ;;  %v6684_v46 = vpack.c.bf16 %v4166_v7, %v4165_v28  ;;  %v4223_v28 = vld [vmem:[%s9428_s3 + $0x980] sm:$0xff]  ;;  %v4224_v7 = vld [vmem:[%s9428_s3 + $0x988] sm:$0xff]  ;;  %v6702_v32 = vpack.c.bf16 %v4158_v15, %v4157_v43  ;;  %v4202_v43 = vld [vmem:[%s9428_s3 + $0x8d8] sm:$0xff] }
 0x1d2   :  { %6605 = vmatprep.subr.bf16.mxu0 %v6604_v57  ;;  %v6654_v57 = vpack.c.bf16 %v4118_v30, %v4117_v34  ;;  %v4175_v30 = vld [vmem:[%s9428_s3 + $0x800] sm:$0xff]  ;;  %v6736_v63 = vpack.c.bf16 %v4224_v7, %v4223_v28  ;;  %v4216_v28 = vld [vmem:[%s9428_s3 + $0x948] sm:$0xff] }
 0x1d3   :  { %6635 = vmatpush3.bf16.msra.mxu1 %v6634_v0  ;;  %v4119_v0 = vld [vmem:[%s9428_s3 + $0x640] sm:$0xff] }
 0x1d4   :  { %6637 = vmatprep.subr.bf16.mxu1 %v6636_v12  ;;  %v4137_v12 = vld [vmem:[%s9428_s3 + $0x6d0] sm:$0xff]  ;;  %v6658_v23 = vpack.c.bf16 %v4120_v4, %v4119_v0  ;;  %v4226_v4 = vld [vmem:[%s9428_s3 + $0x998] sm:$0xff] }
 0x1d5   :  { %6607 = vmatpush3.bf16.msra.mxu0 %v6606_v16  ;;  %v4151_v16 = vld [vmem:[%s9428_s3 + $0x740] sm:$0xff]  ;;  %v6660_v39 = vpack.c.bf16 %v4138_v10, %v4137_v12  ;;  %v4225_v0 = vld [vmem:[%s9428_s3 + $0x990] sm:$0xff]  ;;  %v4178_v10 = vld [vmem:[%s9428_s3 + $0x818] sm:$0xff] }
 0x1d6   :  { %6641 = vmatprep.subr.bf16.mxu0 %v6640_v22  ;;  %v4170_v22 = vld [vmem:[%s9428_s3 + $0x7d8] sm:$0xff]  ;;  %v6690_v48 = vpack.c.bf16 %v4152_v19, %v4151_v16  ;;  %v4177_v12 = vld [vmem:[%s9428_s3 + $0x810] sm:$0xff]  ;;  %v4195_v19 = vld [vmem:[%s9428_s3 + $0x8a0] sm:$0xff] }
 0x1d7   :  { %6639 = vmatpush3.bf16.msra.mxu1 %v6638_v41  ;;  %v4122_v41 = vld [vmem:[%s9428_s3 + $0x658] sm:$0xff]  ;;  %v6692_v45 = vpack.c.bf16 %v4170_v22, %v4169_v24  ;;  %v6740_v24 = vpack.c.bf16 %v4226_v4, %v4225_v0  ;;  %v4209_v22 = vld [vmem:[%s9428_s3 + $0x910] sm:$0xff]  ;;  %v4235_v4 = vld [vmem:[%s9428_s3 + $0x9e0] sm:$0xff] }
 0x1d8   :  { %4787 = vmatmul.mubr.f32.vlgmr.msra.gmra.mrb[20].mxu0 %v8611_v14  ;;  %6673 = vmatprep.subr.bf16.mxu1 %v6672_v40  ;;  %v4163_v14 = vld [vmem:[%s9428_s3 + $0x7a0] sm:$0xff]  ;;  %v4140_v40 = vld [vmem:[%s9428_s3 + $0x6e8] sm:$0xff]  ;;  %v6662_v33 = vpack.c.bf16 %v4122_v41, %v4121_v31  ;;  %v6710_v41 = vpack.c.bf16 %v4178_v10, %v4177_v12 }
 0x1d9   :  { %6643 = vmatpush3.bf16.msra.mxu0 %v6642_v53  ;;  %4926 = vmatprep.mubr.f32.mxu0 %v4382_v61  ;;  %v6680_v26 = vpack.c.bf16 %v4164_v42, %v4163_v14  ;;  %v4154_v53 = vld [vmem:[%s9428_s3 + $0x758] sm:$0xff]  ;;  %v6664_v8 = vpack.c.bf16 %v4140_v40, %v4139_v37  ;;  %v4124_v61 = vld [vmem:[%s9428_s3 + $0x668] sm:$0xff]  ;;  %v6668_v42 = vpack.c.bf16 %v4142_v29, %v4141_v3  ;;  %v4179_v40 = vld [vmem:[%s9428_s3 + $0x820] sm:$0xff] }
 0x1da   :  { %4857 = vmatmul.mubr.f32.vlgmr.msra.gmra.mrb[20].mxu1 %v8626_v20  ;;  %6645 = vmatprep.subr.bf16.mxu0 %v6644_v6  ;;  %v4134_v20 = vld [vmem:[%s9428_s3 + $0x6b8] sm:$0xff]  ;;  %v4172_v6 = vld [vmem:[%s9428_s3 + $0x7e8] sm:$0xff]  ;;  %v4181_v3 = vld [vmem:[%s9428_s3 + $0x830] sm:$0xff] }
 0x1db   :  { %6675 = vmatpush3.bf16.msra.mxu1 %v6674_v13  ;;  %4996 = vmatprep.mubr.f32.mxu1 %v4383_v38  ;;  %v6652_v21 = vpack.c.bf16 %v4134_v20, %v4133_v11  ;;  %v6694_v13 = vpack.c.bf16 %v4154_v53, %v4153_v51  ;;  %v6666_v38 = vpack.c.bf16 %v4124_v61, %v4123_v9  ;;  %v4174_v14 = vld [vmem:[%s9428_s3 + $0x7f8] sm:$0xff]  ;;  %v4191_v11 = vld [vmem:[%s9428_s3 + $0x880] sm:$0xff]  ;;  %v4192_v20 = vld [vmem:[%s9428_s3 + $0x888] sm:$0xff] }
 0x1dc   :  { %6677 = vmatprep.subr.bf16.mxu1 %v6676_v5  ;;  %v6696_v5 = vpack.c.bf16 %v4172_v6, %v4171_v2  ;;  %v6704_v34 = vpack.c.bf16 %v4192_v20, %v4191_v11  ;;  %v4197_v53 = vld [vmem:[%s9428_s3 + $0x8b0] sm:$0xff]  ;;  %v4211_v2 = vld [vmem:[%s9428_s3 + $0x920] sm:$0xff]  ;;  %v4212_v6 = vld [vmem:[%s9428_s3 + $0x928] sm:$0xff] }
 0x1dd   :  { %6647 = vmatpush3.bf16.msra.mxu0 %v6646_v36  ;;  %v4173_v36 = vld [vmem:[%s9428_s3 + $0x7f0] sm:$0xff]  ;;  %v4230_v61 = vld [vmem:[%s9428_s3 + $0x9b8] sm:$0xff]  ;;  %v4184_v11 = vld [vmem:[%s9428_s3 + $0x848] sm:$0xff] }
 0x1de   :  { %6649 = vmatprep.subr.bf16.mxu0 %v6648_v58  ;;  %v4125_v58 = vld [vmem:[%s9428_s3 + $0x670] sm:$0xff]  ;;  %v4182_v29 = vld [vmem:[%s9428_s3 + $0x838] sm:$0xff]  ;;  %v4187_v10 = vld [vmem:[%s9428_s3 + $0x860] sm:$0xff] }
 0x1df   :  { %6679 = vmatpush3.bf16.msra.mxu1 %v6678_v54  ;;  %v6698_v54 = vpack.c.bf16 %v4156_v35, %v4155_v47  ;;  %v4229_v9 = vld [vmem:[%s9428_s3 + $0x9b0] sm:$0xff]  ;;  %v4199_v47 = vld [vmem:[%s9428_s3 + $0x8c0] sm:$0xff]  ;;  %v4200_v35 = vld [vmem:[%s9428_s3 + $0x8c8] sm:$0xff] }
 0x1e0   :  { %6681 = vmatprep.subr.bf16.mxu1 %v6680_v26  ;;  %v6700_v26 = vpack.c.bf16 %v4174_v14, %v4173_v36  ;;  %v4213_v36 = vld [vmem:[%s9428_s3 + $0x930] sm:$0xff]  ;;  %v4214_v14 = vld [vmem:[%s9428_s3 + $0x938] sm:$0xff] }
 0x1e1   :  { %6651 = vmatpush3.bf16.msra.mxu0 %v6650_v49  ;;  %v6670_v49 = vpack.c.bf16 %v4126_v1, %v4125_v58  ;;  %v4231_v58 = vld [vmem:[%s9428_s3 + $0x9c0] sm:$0xff]  ;;  %v4232_v1 = vld [vmem:[%s9428_s3 + $0x9c8] sm:$0xff]  ;;  %v6750_v20 = vpack.c.bf16 %v4214_v14, %v4213_v36  ;;  %v4258_v36 = vld [vmem:[%s9428_s3 + $0xa98] sm:$0xff] }
 0x1e2   :  { %6653 = vmatprep.subr.bf16.mxu0 %v6652_v21  ;;  %v4384_v21 = vcombine.high %v3917_v50, %v3917_v50  ;;  %v6720_v50 = vpack.c.bf16 %v4200_v35, %v4199_v47  ;;  %v6752_v15 = vpack.c.bf16 %v4232_v1, %v4231_v58  ;;  %v4272_v58 = vld [vmem:[%s9428_s3 + $0xb08] sm:$0xff] }
 0x1e3   :  { %6683 = vmatpush3.bf16.msra.mxu1 %v6682_v25  ;;  %v4176_v25 = vld [vmem:[%s9428_s3 + $0x808] sm:$0xff] }
 0x1e4   :  { %6685 = vmatprep.subr.bf16.mxu1 %v6684_v46  ;;  %v4193_v46 = vld [vmem:[%s9428_s3 + $0x890] sm:$0xff]  ;;  %v6706_v59 = vpack.c.bf16 %v4176_v25, %v4175_v30 }
 0x1e5   :  { %6655 = vmatpush3.bf16.msra.mxu0 %v6654_v57  ;;  %v4207_v57 = vld [vmem:[%s9428_s3 + $0x900] sm:$0xff]  ;;  %v4185_v25 = vld [vmem:[%s9428_s3 + $0x850] sm:$0xff] }
 0x1e6   :  { %6657 = vmatprep.subr.bf16.mxu0 %v6656_v60  ;;  %v9034_v60 = vrot.slane %v4384_v21, %v8392_v52  ;;  %v6738_v16 = vpack.c.bf16 %v4208_v62, %v4207_v57  ;;  %v4233_v21 = vld [vmem:[%s9428_s3 + $0x9d0] sm:$0xff] }
 0x1e7   :  { %6687 = vmatpush3.bf16.msra.mxu1 %v6686_v17  ;;  %v6708_v17 = vpack.c.bf16 %v4194_v55, %v4193_v46  ;;  %v4203_v55 = vld [vmem:[%s9428_s3 + $0x8e0] sm:$0xff]  ;;  %v4217_v62 = vld [vmem:[%s9428_s3 + $0x950] sm:$0xff] }
 0x1e8   :  { %6689 = vmatprep.subr.bf16.mxu1 %v6688_v18  ;;  %v4399_v18 = vcombine.high %v9019_v27, %v9019_v27  ;;  %v4400_v31 = vcombine.high %v9034_v60, %v9034_v60 }
 0x1e9   :  { %6659 = vmatpush3.bf16.msra.mxu0 %v6658_v23  ;;  %v4196_v23 = vld [vmem:[%s9428_s3 + $0x8a8] sm:$0xff] }
 0x1ea   :  { %6661 = vmatprep.subr.bf16.mxu0 %v6660_v39  ;;  %v4210_v39 = vld [vmem:[%s9428_s3 + $0x918] sm:$0xff]  ;;  %v6712_v37 = vpack.c.bf16 %v4196_v23, %v4195_v19  ;;  %v4205_v19 = vld [vmem:[%s9428_s3 + $0x8f0] sm:$0xff] }
 0x1eb   :  { %6691 = vmatpush3.bf16.msra.mxu1 %v6690_v48  ;;  %v4228_v48 = vld [vmem:[%s9428_s3 + $0x9a8] sm:$0xff]  ;;  %v6742_v51 = vpack.c.bf16 %v4210_v39, %v4209_v22  ;;  %v4206_v23 = vld [vmem:[%s9428_s3 + $0x8f8] sm:$0xff]  ;;  %v4219_v22 = vld [vmem:[%s9428_s3 + $0x960] sm:$0xff] }
 0x1ec   :  { %6693 = vmatprep.subr.bf16.mxu1 %v6692_v45  ;;  %v4180_v45 = vld [vmem:[%s9428_s3 + $0x828] sm:$0xff] }
 0x1ed   :  { %6663 = vmatpush3.bf16.msra.mxu0 %v6662_v33  ;;  %v4220_v39 = vld [vmem:[%s9428_s3 + $0x968] sm:$0xff] }
 0x1ee   :  { %6665 = vmatprep.subr.bf16.mxu0 %v6664_v8  ;;  %v6714_v8 = vpack.c.bf16 %v4180_v45, %v4179_v40  ;;  %v4190_v40 = vld [vmem:[%s9428_s3 + $0x878] sm:$0xff]  ;;  %v3918_v45 = vld [vmem:[#allocation2 + $0x28] sm:$0xff] }
 0x1ef   :  { %6695 = vmatpush3.bf16.msra.mxu1 %v6694_v13  ;;  %v9223_v35 = vrot.slane %v3918_v45, %v8392_v52 }
 0x1f0   :  { %6697 = vmatprep.subr.bf16.mxu1 %v6696_v5  ;;  %v6746_v5 = vpack.c.bf16 %v4212_v6, %v4211_v2  ;;  %v4221_v2 = vld [vmem:[%s9428_s3 + $0x970] sm:$0xff]  ;;  %v4222_v6 = vld [vmem:[%s9428_s3 + $0x978] sm:$0xff] }
 0x1f1   :  { %6667 = vmatpush3.bf16.msra.mxu0 %v6666_v38  ;;  %v6748_v38 = vpack.c.bf16 %v4230_v61, %v4229_v9  ;;  %v4287_v9 = vld [vmem:[%s9428_s3 + $0xb80] sm:$0xff]  ;;  %v4288_v61 = vld [vmem:[%s9428_s3 + $0xb88] sm:$0xff]  ;;  %v6766_v47 = vpack.c.bf16 %v4222_v6, %v4221_v2 }
 0x1f2   :  { %6669 = vmatprep.subr.bf16.mxu0 %v6668_v42  ;;  %v6718_v42 = vpack.c.bf16 %v4182_v29, %v4181_v3  ;;  %v4239_v29 = vld [vmem:[%s9428_s3 + $0xa00] sm:$0xff]  ;;  %v6800_v14 = vpack.c.bf16 %v4288_v61, %v4287_v9  ;;  %v4297_v61 = vld [vmem:[%s9428_s3 + $0xbd0] sm:$0xff] }
 0x1f3   :  { %6699 = vmatpush3.bf16.msra.mxu1 %v6698_v54  ;;  %v4183_v54 = vld [vmem:[%s9428_s3 + $0x840] sm:$0xff] }
 0x1f4   :  { %6701 = vmatprep.subr.bf16.mxu1 %v6700_v26  ;;  %v4201_v26 = vld [vmem:[%s9428_s3 + $0x8d0] sm:$0xff]  ;;  %v6722_v7 = vpack.c.bf16 %v4184_v11, %v4183_v54  ;;  %v4290_v11 = vld [vmem:[%s9428_s3 + $0xb98] sm:$0xff]  ;;  %v4279_v6 = vld [vmem:[%s9428_s3 + $0xb40] sm:$0xff] }
 0x1f5   :  { %6671 = vmatpush3.bf16.msra.mxu0 %v6670_v49  ;;  %v4215_v49 = vld [vmem:[%s9428_s3 + $0x940] sm:$0xff]  ;;  %v6724_v30 = vpack.c.bf16 %v4202_v43, %v4201_v26  ;;  %v4289_v54 = vld [vmem:[%s9428_s3 + $0xb90] sm:$0xff]  ;;  %v4242_v43 = vld [vmem:[%s9428_s3 + $0xa18] sm:$0xff] }
 0x1f6   :  { %6705 = vmatprep.subr.bf16.mxu0 %v6704_v34  ;;  %v4234_v34 = vld [vmem:[%s9428_s3 + $0x9d8] sm:$0xff]  ;;  %v6754_v46 = vpack.c.bf16 %v4216_v28, %v4215_v49  ;;  %v4241_v26 = vld [vmem:[%s9428_s3 + $0xa10] sm:$0xff]  ;;  %v4259_v49 = vld [vmem:[%s9428_s3 + $0xaa0] sm:$0xff] }
 0x1f7   :  { %6703 = vmatpush3.bf16.msra.mxu1 %v6702_v32  ;;  %v4186_v32 = vld [vmem:[%s9428_s3 + $0x858] sm:$0xff]  ;;  %v6756_v57 = vpack.c.bf16 %v4234_v34, %v4233_v21  ;;  %v4260_v28 = vld [vmem:[%s9428_s3 + $0xaa8] sm:$0xff]  ;;  %v4273_v21 = vld [vmem:[%s9428_s3 + $0xb10] sm:$0xff] }
 0x1f8   :  { %4927 = vmatmul.mubr.f32.vlgmr.msra.gmra.mrb[22].mxu0 %v8815_v44  ;;  %6737 = vmatprep.subr.bf16.mxu1 %v6736_v63  ;;  %v4227_v44 = vld [vmem:[%s9428_s3 + $0x9a0] sm:$0xff]  ;;  %v4204_v63 = vld [vmem:[%s9428_s3 + $0x8e8] sm:$0xff]  ;;  %v6726_v0 = vpack.c.bf16 %v4186_v32, %v4185_v25  ;;  %v4274_v34 = vld [vmem:[%s9428_s3 + $0xb18] sm:$0xff]  ;;  %v6774_v25 = vpack.c.bf16 %v4242_v43, %v4241_v26 }
 0x1f9   :  { %6707 = vmatpush3.bf16.msra.mxu0 %v6706_v59  ;;  %5066 = vmatprep.mubr.f32.mxu0 %v4399_v18  ;;  %v6744_v33 = vpack.c.bf16 %v4228_v48, %v4227_v44  ;;  %v4218_v59 = vld [vmem:[%s9428_s3 + $0x958] sm:$0xff]  ;;  %v6728_v12 = vpack.c.bf16 %v4204_v63, %v4203_v55  ;;  %v4188_v18 = vld [vmem:[%s9428_s3 + $0x868] sm:$0xff]  ;;  %v6732_v48 = vpack.c.bf16 %v4206_v23, %v4205_v19  ;;  %v4243_v55 = vld [vmem:[%s9428_s3 + $0xa20] sm:$0xff] }
 0x1fa   :  { %4997 = vmatmul.mubr.f32.vlgmr.msra.gmra.mrb[22].mxu1 %v8830_v56  ;;  %6709 = vmatprep.subr.bf16.mxu0 %v6708_v17  ;;  %v4198_v56 = vld [vmem:[%s9428_s3 + $0x8b8] sm:$0xff]  ;;  %v4236_v17 = vld [vmem:[%s9428_s3 + $0x9e8] sm:$0xff]  ;;  %v4251_v26 = vld [vmem:[%s9428_s3 + $0xa60] sm:$0xff] }
 0x1fb   :  { %6739 = vmatpush3.bf16.msra.mxu1 %v6738_v16  ;;  %5136 = vmatprep.mubr.f32.mxu1 %v4400_v31  ;;  %v6716_v13 = vpack.c.bf16 %v4198_v56, %v4197_v53  ;;  %v6758_v16 = vpack.c.bf16 %v4218_v59, %v4217_v62  ;;  %v6730_v31 = vpack.c.bf16 %v4188_v18, %v4187_v10  ;;  %v4238_v44 = vld [vmem:[%s9428_s3 + $0x9f8] sm:$0xff]  ;;  %v4255_v53 = vld [vmem:[%s9428_s3 + $0xa80] sm:$0xff]  ;;  %v4256_v56 = vld [vmem:[%s9428_s3 + $0xa88] sm:$0xff] }
 0x1fc   :  { %6741 = vmatprep.subr.bf16.mxu1 %v6740_v24  ;;  %v6760_v24 = vpack.c.bf16 %v4236_v17, %v4235_v4  ;;  %v6768_v3 = vpack.c.bf16 %v4256_v56, %v4255_v53  ;;  %v4292_v32 = vld [vmem:[%s9428_s3 + $0xba8] sm:$0xff]  ;;  %v4261_v62 = vld [vmem:[%s9428_s3 + $0xab0] sm:$0xff]  ;;  %v4294_v10 = vld [vmem:[%s9428_s3 + $0xbb8] sm:$0xff] }
 0x1fd   :  { %6711 = vmatpush3.bf16.msra.mxu0 %v6710_v41  ;;  %v4237_v41 = vld [vmem:[%s9428_s3 + $0x9f0] sm:$0xff]  ;;  %v4244_v63 = vld [vmem:[%s9428_s3 + $0xa28] sm:$0xff]  ;;  %v4246_v19 = vld [vmem:[%s9428_s3 + $0xa38] sm:$0xff] }
 0x1fe   :  { %6713 = vmatprep.subr.bf16.mxu0 %v6712_v37  ;;  %v4189_v37 = vld [vmem:[%s9428_s3 + $0x870] sm:$0xff]  ;;  %v4276_v4 = vld [vmem:[%s9428_s3 + $0xb28] sm:$0xff]  ;;  %v6778_v17 = vpack.c.bf16 %v4244_v63, %v4243_v55 }
 0x1ff   :  { %6743 = vmatpush3.bf16.msra.mxu1 %v6742_v51  ;;  %v6762_v51 = vpack.c.bf16 %v4220_v39, %v4219_v22  ;;  %v4264_v22 = vld [vmem:[%s9428_s3 + $0xac8] sm:$0xff]  ;;  %v4265_v56 = vld [vmem:[%s9428_s3 + $0xad0] sm:$0xff] }
 0x200   :  { %6745 = vmatprep.subr.bf16.mxu1 %v6744_v33  ;;  %v6764_v33 = vpack.c.bf16 %v4238_v44, %v4237_v41  ;;  %v4278_v41 = vld [vmem:[%s9428_s3 + $0xb38] sm:$0xff]  ;;  %v4252_v43 = vld [vmem:[%s9428_s3 + $0xa68] sm:$0xff] }
 0x201   :  { %6715 = vmatpush3.bf16.msra.mxu0 %v6714_v8  ;;  %v6734_v8 = vpack.c.bf16 %v4190_v40, %v4189_v37  ;;  %v4296_v37 = vld [vmem:[%s9428_s3 + $0xbc8] sm:$0xff] }
 0x202   :  { %6717 = vmatprep.subr.bf16.mxu0 %v6716_v13  ;;  %v4401_v13 = vcombine.high %v3918_v45, %v3918_v45  ;;  %v4247_v45 = vld [vmem:[%s9428_s3 + $0xa40] sm:$0xff] }
 0x203   :  { %6747 = vmatpush3.bf16.msra.mxu1 %v6746_v5  ;;  %v4240_v5 = vld [vmem:[%s9428_s3 + $0xa08] sm:$0xff] }
 0x204   :  { %6749 = vmatprep.subr.bf16.mxu1 %v6748_v38  ;;  %v4257_v38 = vld [vmem:[%s9428_s3 + $0xa90] sm:$0xff]  ;;  %v6770_v1 = vpack.c.bf16 %v4240_v5, %v4239_v29  ;;  %v4250_v5 = vld [vmem:[%s9428_s3 + $0xa58] sm:$0xff] }
 0x205   :  { %6719 = vmatpush3.bf16.msra.mxu0 %v6718_v42  ;;  %v4271_v42 = vld [vmem:[%s9428_s3 + $0xb00] sm:$0xff]  ;;  %v4249_v29 = vld [vmem:[%s9428_s3 + $0xa50] sm:$0xff] }
 0x206   :  { %6721 = vmatprep.subr.bf16.mxu0 %v6720_v50  ;;  %v9238_v50 = vrot.slane %v4401_v13, %v8392_v52  ;;  %v4416_v52 = vcombine.high %v9223_v35, %v9223_v35  ;;  %v4298_v13 = vld [vmem:[%s9428_s3 + $0xbd8] sm:$0xff] }
 0x207   :  { %6751 = vmatpush3.bf16.msra.mxu1 %v6750_v20  ;;  %v6772_v20 = vpack.c.bf16 %v4258_v36, %v4257_v38  ;;  %v4267_v38 = vld [vmem:[%s9428_s3 + $0xae0] sm:$0xff]  ;;  %v4268_v36 = vld [vmem:[%s9428_s3 + $0xae8] sm:$0xff] }
 0x208   :  { %6753 = vmatprep.subr.bf16.mxu1 %v6752_v15  ;;  %v6802_v15 = vpack.c.bf16 %v4272_v58, %v4271_v42  ;;  %v4281_v42 = vld [vmem:[%s9428_s3 + $0xb50] sm:$0xff]  ;;  %v4282_v58 = vld [vmem:[%s9428_s3 + $0xb58] sm:$0xff] }
 0x209   :  { %6723 = vmatpush3.bf16.msra.mxu0 %v6722_v7  ;;  %v6804_v7 = vpack.c.bf16 %v4290_v11, %v4289_v54  ;;  %v4299_v54 = vld [vmem:[%s9428_s3 + $0xbe0] sm:$0xff]  ;;  %v4300_v11 = vld [vmem:[%s9428_s3 + $0xbe8] sm:$0xff] }
 0x20a   :  { %6725 = vmatprep.subr.bf16.mxu0 %v6724_v30  ;;  %v4417_v30 = vcombine.high %v9238_v50, %v9238_v50 }
 0x20b   :  { %6755 = vmatpush3.bf16.msra.mxu1 %v6754_v46  ;;  %v6776_v46 = vpack.c.bf16 %v4260_v28, %v4259_v49  ;;  %v4270_v49 = vld [vmem:[%s9428_s3 + $0xaf8] sm:$0xff]  ;;  %v6824_v28 = vpack.c.bf16 %v4300_v11, %v4299_v54 }
 0x20c   :  { %6757 = vmatprep.subr.bf16.mxu1 %v6756_v57  ;;  %v6806_v57 = vpack.c.bf16 %v4274_v34, %v4273_v21  ;;  %v4284_v21 = vld [vmem:[%s9428_s3 + $0xb68] sm:$0xff]  ;;  %v6794_v34 = vpack.c.bf16 %v4252_v43, %v4251_v26 }
 0x20d   :  { %6727 = vmatpush3.bf16.msra.mxu0 %v6726_v0  ;;  %v4275_v0 = vld [vmem:[%s9428_s3 + $0xb20] sm:$0xff] }
 0x20e   :  { %6729 = vmatprep.subr.bf16.mxu0 %v6728_v12  ;;  %v4293_v12 = vld [vmem:[%s9428_s3 + $0xbb0] sm:$0xff]  ;;  %v6810_v23 = vpack.c.bf16 %v4276_v4, %v4275_v0  ;;  %v5627_v4 = vld [vmem:[%s9429_s4] ss:$0 sm:$0xff] }
 0x20f   :  { %6759 = vmatpush3.bf16.msra.mxu1 %v6758_v16  ;;  %v4245_v16 = vld [vmem:[%s9428_s3 + $0xa30] sm:$0xff]  ;;  %v6812_v39 = vpack.c.bf16 %v4294_v10, %v4293_v12 }
 0x210   :  { %6761 = vmatprep.subr.bf16.mxu1 %v6760_v24  ;;  %v4263_v24 = vld [vmem:[%s9428_s3 + $0xac0] sm:$0xff]  ;;  %v6782_v44 = vpack.c.bf16 %v4246_v19, %v4245_v16 }
 0x211   :  { %6731 = vmatpush3.bf16.msra.mxu0 %v6730_v31  ;;  %v4277_v31 = vld [vmem:[%s9428_s3 + $0xb30] sm:$0xff]  ;;  %v6784_v40 = vpack.c.bf16 %v4264_v22, %v4263_v24 }
 0x212   :  { %6733 = vmatprep.subr.bf16.mxu0 %v6732_v48  ;;  %v4295_v48 = vld [vmem:[%s9428_s3 + $0xbc0] sm:$0xff]  ;;  %v6814_v53 = vpack.c.bf16 %v4278_v41, %v4277_v31 }
 0x213   :  { %6763 = vmatpush3.bf16.msra.mxu1 %v6762_v51  ;;  %v4248_v51 = vld [vmem:[%s9428_s3 + $0xa48] sm:$0xff]  ;;  %v6816_v2 = vpack.c.bf16 %v4296_v37, %v4295_v48 }
 0x214   :  { %6765 = vmatprep.subr.bf16.mxu1 %v6764_v33  ;;  %v4266_v33 = vld [vmem:[%s9428_s3 + $0xad8] sm:$0xff]  ;;  %v6786_v9 = vpack.c.bf16 %v4248_v51, %v4247_v45 }
 0x215   :  { %6735 = vmatpush3.bf16.msra.mxu0 %v6734_v8  ;;  %v4280_v8 = vld [vmem:[%s9428_s3 + $0xb48] sm:$0xff] }
 0x216   :  { %6769 = vmatprep.subr.bf16.mxu0 %v6768_v3  ;;  %v6788_v3 = vpack.c.bf16 %v4266_v33, %v4265_v56 }
 0x217   :  { %6767 = vmatpush3.bf16.msra.mxu1 %v6766_v47  ;;  %v6818_v47 = vpack.c.bf16 %v4280_v8, %v4279_v6 }
 0x218   :  { %5067 = vmatmul.mubr.f32.vlgmr.msra.gmra.mrb[24].mxu0 %v9019_v27  ;;  %6801 = vmatprep.subr.bf16.mxu1 %v6800_v14  ;;  %v4291_v27 = vld [vmem:[%s9428_s3 + $0xba0] sm:$0xff]  ;;  %v6820_v14 = vpack.c.bf16 %v4298_v13, %v4297_v61 }
 0x219   :  { %6771 = vmatpush3.bf16.msra.mxu0 %v6770_v1  ;;  %5206 = vmatprep.mubr.f32.mxu0 %v4416_v52  ;;  %v6808_v59 = vpack.c.bf16 %v4292_v32, %v4291_v27  ;;  %v6790_v1 = vpack.c.bf16 %v4250_v5, %v4249_v29  ;;  %v6822_v52 = vpack.c.bf16 %v4282_v58, %v4281_v42  ;;  %v4253_v32 = vld [vmem:[%s9428_s3 + $0xa70] sm:$0xff] }
 0x21a   :  { %5137 = vmatmul.mubr.f32.vlgmr.msra.gmra.mrb[24].mxu1 %v9034_v60  ;;  %6773 = vmatprep.subr.bf16.mxu0 %v6772_v20  ;;  %v4262_v60 = vld [vmem:[%s9428_s3 + $0xab8] sm:$0xff]  ;;  %v6792_v20 = vpack.c.bf16 %v4268_v36, %v4267_v38 }
 0x21b   :  { %6803 = vmatpush3.bf16.msra.mxu1 %v6802_v15  ;;  %5276 = vmatprep.mubr.f32.mxu1 %v4417_v30  ;;  %v6780_v18 = vpack.c.bf16 %v4262_v60, %v4261_v62  ;;  %v4269_v15 = vld [vmem:[%s9428_s3 + $0xaf0] sm:$0xff]  ;;  %v4286_v62 = vld [vmem:[%s9428_s3 + $0xb78] sm:$0xff] }
 0x21c   :  { %6805 = vmatprep.subr.bf16.mxu1 %v6804_v7  ;;  %v4283_v7 = vld [vmem:[%s9428_s3 + $0xb60] sm:$0xff]  ;;  %v4301_v30 = vld [vmem:[%s9428_s3 + $0xbf0] sm:$0xff]  ;;  %v6796_v27 = vpack.c.bf16 %v4270_v49, %v4269_v15 }
 0x21d   :  { %6775 = vmatpush3.bf16.msra.mxu0 %v6774_v25  ;;  %v4302_v25 = vld [vmem:[%s9428_s3 + $0xbf8] sm:$0xff]  ;;  %v6826_v55 = vpack.c.bf16 %v4284_v21, %v4283_v7 }
 0x21e   :  { %6777 = vmatprep.subr.bf16.mxu0 %v6776_v46  ;;  %v4254_v46 = vld [vmem:[%s9428_s3 + $0xa78] sm:$0xff]  ;;  %v6828_v63 = vpack.c.bf16 %v4302_v25, %v4301_v30 }
 0x21f   :  { %6807 = vmatpush3.bf16.msra.mxu1 %v6806_v57  ;;  %v4285_v57 = vld [vmem:[%s9428_s3 + $0xb70] sm:$0xff]  ;;  %v6798_v60 = vpack.c.bf16 %v4254_v46, %v4253_v32  ;;  %s7005_s3 = smov [#allocation3]  }
 0x220   :  { %6809 = vmatprep.subr.bf16.mxu1 %v6808_v59  ;;  %v6830_v59 = vpack.c.bf16 %v4286_v62, %v4285_v57  ;;  %s5305_s4 = sshll.u32 %s7005_s3, 4  ;;  %s5306_s4 = int_to_ptr.vmem [resolvable:$true] %s5305_s4 }
 0x221   :  { %6779 = vmatpush3.bf16.msra.mxu0 %v6778_v17  ;;  %s6977_s8 = scalar_lea.vmem %s5306_s4, 32  ;;  %p6982_p1 = scmp.lt.s32.totalorder %s5306_s4, %s5306_s4 }
 0x222   :  { %6781 = vmatprep.subr.bf16.mxu0 %v6780_v18  ;;  %p6978_p0 = scmp.ne.s32.totalorder %s5306_s4, %s6977_s8  ;;  %p6983_p2 = scmp.lt.s32.totalorder %s6977_s8, %s6977_s8 }
 0x223   :  { %6811 = vmatpush3.bf16.msra.mxu1 %v6810_v23 }
 0x224   :  { %6813 = vmatprep.subr.bf16.mxu1 %v6812_v39  ;;  %p6984_p3 = por %p6983_p2, %p6982_p1 }
 0x225   :  { %6783 = vmatpush3.bf16.msra.mxu0 %v6782_v44 }
 0x226   :  { %6785 = vmatprep.subr.bf16.mxu0 %v6784_v40  ;;  %p6985_p4 = pnand %p6984_p3, %p6978_p0 }
 0x227   :  { %6815 = vmatpush3.bf16.msra.mxu1 %v6814_v53 }
 0x228   :  { %6817 = vmatprep.subr.bf16.mxu1 %v6816_v2 }
 0x229   :  { %6787 = vmatpush3.bf16.msra.mxu0 %v6786_v9 }
 0x22a   :  { %6789 = vmatprep.subr.bf16.mxu0 %v6788_v3 }
 0x22b   :  { %6819 = vmatpush3.bf16.msra.mxu1 %v6818_v47 }
 0x22c   :  { %6821 = vmatprep.subr.bf16.mxu1 %v6820_v14 }
 0x22d   :  { %6791 = vmatpush3.bf16.msra.mxu0 %v6790_v1 }
 0x22e   :  { %6793 = vmatprep.subr.bf16.mxu0 %v6792_v20 }
 0x22f   :  { %6823 = vmatpush3.bf16.msra.mxu1 %v6822_v52 }
 0x230   :  { %6825 = vmatprep.subr.bf16.mxu1 %v6824_v28 }
 0x231   :  { %6795 = vmatpush3.bf16.msra.mxu0 %v6794_v34 }
 0x232   :  { %6797 = vmatprep.subr.bf16.mxu0 %v6796_v27 }
 0x233   :  { %6827 = vmatpush3.bf16.msra.mxu1 %v6826_v55 }
 0x234   :  { %6829 = vmatprep.subr.bf16.mxu1 %v6828_v63 }
 0x235   :  { %6799 = vmatpush3.bf16.msra.mxu0 %v6798_v60 }
 0x237   :  { %6831 = vmatpush3.bf16.msra.mxu1 %v6830_v59 }
 0x238   :  { %5207 = vmatmul.mubr.f32.vlgmr.msra.gmra.mrb[26].mxu0 %v9223_v35 }
 0x23a   :  { %5277 = vmatmul.mubr.f32.vlgmr.msra.gmra.mrb[26].mxu1 %v9238_v50 }
 0x26b   :  { %v5660_v0 = vpop.f32.mrb[16].mxu0 }
 0x26c   :  { %v5661_v17 = vpop.f32.mrb[17].mxu0 }
 0x26d   :  { %v5662_v12 = vadd.f32 %v5661_v17, %v5660_v0  ;;  %v5695_v10 = vpop.f32.mrb[16].mxu1 }
 0x26e   :  { %v5696_v18 = vpop.f32.mrb[17].mxu1 }
 0x26f   :  { %v4509_v16 = vadd.f32 %v5662_v12, %v5627_v4  ;;  %v5697_v19 = vadd.f32 %v5696_v18, %v5695_v10 }
 0x271   :  { %v4579_v23 = vadd.f32 %v5697_v19, %v4509_v16 }
 0x28b   :  { %v5730_v24 = vpop.f32.mrb[18].mxu0 }
 0x28c   :  { %v5731_v22 = vpop.f32.mrb[19].mxu0 }
 0x28d   :  { %v5732_v39 = vadd.f32 %v5731_v22, %v5730_v24  ;;  %v5765_v31 = vpop.f32.mrb[18].mxu1 }
 0x28e   :  { %v5766_v41 = vpop.f32.mrb[19].mxu1 }
 0x28f   :  { %v4649_v35 = vadd.f32 %v5732_v39, %v4579_v23  ;;  %v5767_v44 = vadd.f32 %v5766_v41, %v5765_v31 }
 0x291   :  { %v4719_v50 = vadd.f32 %v5767_v44, %v4649_v35 }
 0x2ab   :  { %v5800_v48 = vpop.f32.mrb[20].mxu0 }
 0x2ac   :  { %v5801_v37 = vpop.f32.mrb[21].mxu0 }
 0x2ad   :  { %v5802_v40 = vadd.f32 %v5801_v37, %v5800_v48  ;;  %v5835_v45 = vpop.f32.mrb[20].mxu1 }
 0x2ae   :  { %v5836_v51 = vpop.f32.mrb[21].mxu1 }
 0x2af   :  { %v4789_v53 = vadd.f32 %v5802_v40, %v4719_v50  ;;  %v5837_v56 = vadd.f32 %v5836_v51, %v5835_v45 }
 0x2b1   :  { %v4859_v33 = vadd.f32 %v5837_v56, %v4789_v53 }
 0x2cb   :  { %v5870_v2 = vpop.f32.mrb[22].mxu0 }
 0x2cc   :  { %v5871_v6 = vpop.f32.mrb[23].mxu0 }
 0x2cd   :  { %v5872_v8 = vadd.f32 %v5871_v6, %v5870_v2  ;;  %v5905_v9 = vpop.f32.mrb[22].mxu1 }
 0x2ce   :  { %v5906_v61 = vpop.f32.mrb[23].mxu1 }
 0x2cf   :  { %v4929_v13 = vadd.f32 %v5872_v8, %v4859_v33  ;;  %v5907_v3 = vadd.f32 %v5906_v61, %v5905_v9 }
 0x2d1   :  { %v4999_v29 = vadd.f32 %v5907_v3, %v4929_v13 }
 0x2eb   :  { %v5940_v5 = vpop.f32.mrb[24].mxu0 }
 0x2ec   :  { %v5941_v47 = vpop.f32.mrb[25].mxu0 }
 0x2ed   :  { %v5942_v38 = vadd.f32 %v5941_v47, %v5940_v5  ;;  %v5975_v36 = vpop.f32.mrb[24].mxu1 }
 0x2ee   :  { %v5976_v14 = vpop.f32.mrb[25].mxu1 }
 0x2ef   :  { %v5069_v42 = vadd.f32 %v5942_v38, %v4999_v29  ;;  %v5977_v58 = vadd.f32 %v5976_v14, %v5975_v36 }
 0x2f1   :  { %v5139_v1 = vadd.f32 %v5977_v58, %v5069_v42 }
 0x30b   :  { %v6010_v54 = vpop.f32.mrb[26].mxu0 }
 0x30c   :  { %v6011_v11 = vpop.f32.mrb[27].mxu0 }
 0x30d   :  { %v6012_v20 = vadd.f32 %v6011_v11, %v6010_v54  ;;  %v6045_v26 = vpop.f32.mrb[26].mxu1 }
 0x30e   :  { %v6046_v43 = vpop.f32.mrb[27].mxu1 }
 0x30f   :  { %v5209_v52 = vadd.f32 %v6012_v20, %v5139_v1  ;;  %v6047_v15 = vadd.f32 %v6046_v43, %v6045_v26 }
 0x311   :  { %v5279_v49 = vadd.f32 %v6047_v15, %v5209_v52 }
 0x313   :  { %v5283_v28 = vsel %vm5282_vm5, %v5279_v49, -inf }
 0x314   :  { %5284 = vmax.xlane.f32.xlu0 %v5283_v28 }
 0x3a1   :  { %v5285_v7 = vpop.xlane.xlu0 %5284 }
 0x3a2   :  { %v5286_v21 = vsub.f32 %v5279_v49, %v5285_v7 }
 0x3a4   :  { %v5287_v34 = vmul.f32 1.442695, %v5286_v21 }
 0x3a6   :  { %6973 = vpow2.f32 %v5287_v34 }
 0x3b0   :  { %v6974_v30 = vpop.eup %6973 }
 0x3b1   :  { %v5289_v25 = vsel %vm5282_vm5, %v6974_v30, 0.0 }
 0x3b2   :  { %5290 = vadd.xlane.f32.xlu0 %v5289_v25 }
 0x43f   :  { %v5291_v27 = vpop.xlane.xlu0 %5290 }
 0x440   :  { %6975 = vlog2.f32 %v5291_v27 }
 0x44a   :  { %v6976_v32 = vpop.eup %6975 }
 0x44b   :  { %v5293_v46 = vmul.f32 0.6931472, %v6976_v32 }
 0x44d   :  { %v5294_v55 = vsub.f32 %v5286_v21, %v5293_v46 }
 0x44f   :  { %5296 = vst.msk [vmem:[#allocation3] sm:$0x1] %vm5295_vm6, %v5294_v55 }
 0x450   :  { %5299 = vst.msk [vmem:[#allocation3] sm:$0x2] %vm5298_vm7, %v5294_v55 }
 0x451   :  { %6988 = shalt.err (!%p6985_p4)
}
 0x452   :  { %s6989_s11 = scalar_lea.hbm %s9430_s5, 32 }
 0x453   :  { %p6990_p5 = scmp.ne.s32.totalorder %s9430_s5, %s6989_s11  ;;  %p6993_p6 = scmp.lt.u32.totalorder %s6989_s11, %s9430_s5 }
 0x455   :  { %p6995_p7 = pnand %p6993_p6, %p6990_p5 }
 0x457   :  { %6998 = shalt.err (!%p6995_p7)
}
 0x458   :  { %s7006_s16 = smov 16   ;;  %s7007_s17 = smov 1  }
 0x459   :  { %5311 = dma.vmem_to_hbm [thread:$0]  %s5306_s4, 32, %s9430_s5, [#allocation4], %s7006_s16, %s7006_s16, %s7007_s17  }
 0x45a   :  { %6999 = dma.done.wait [#allocation4], 32  }
 0x45b   :  { %7000 = vsyncadd [#allocation4], 4294967264 }
 0x45c   :  { %5315 = vsyncpa [#allocation4], 1 }

</bundles_post_ra>
